<compile_context>
chip_gen: v6e
topology: v6e:2x2x1
jax: 0.10.0
libtpu: 0.0.40
codegen_flags: <defaults>
</compile_context>

<pallas_src>
import functools

import jax
import jax.numpy as jnp
from jax.experimental import pallas as pl
from jax.experimental.pallas import tpu as pltpu

LANE = 128


def _round_up(n, m):
    return ((n + m - 1) // m) * m


def _device_kind():
    try:
        return jax.devices()[0].device_kind.lower()
    except Exception:
        return ""


def _default_epilogue_dtype():
    # v6e / v7x have bf16 VALUs -> bf16 bias+ReLU epilogue halves VPU pressure.
    # v5e (and older) have no bf16 VPU -> keep the f32 epilogue there.
    kind = _device_kind()
    if ("v6" in kind) or ("v7" in kind):
        return jnp.bfloat16
    return jnp.float32


def _vmem_limit_bytes():
    # v7x has 64 MiB VMEM per TensorCore (vs 128 MiB on v5e/v6e); keep headroom.
    return (48 if "v7" in _device_kind() else 64) * 1024 * 1024


def fc_generator_kernel(x_ref, w1, w2, w3, w4, w5, w6, bias_ref, out_ref,
                        *, bias_offsets, bias_sizes, epilogue_dtype):
    """x tile (TB, in_pad) f32; weights (in_pad, out_pad) bf16 (VMEM-resident);
    biases (1, total) in epilogue_dtype; out tile (TB, out_pad)."""
    weight_refs = (w1, w2, w3, w4, w5, w6)
    n_layers = len(weight_refs)
    h = x_ref[...]
    for layer, w_ref in enumerate(weight_refs):
        off = bias_offsets[layer]
        dout = bias_sizes[layer]
        b = bias_ref[:, off:off + dout]                        # (1, dout), static slice
        acc = jnp.dot(h.astype(jnp.bfloat16), w_ref[...],
                      preferred_element_type=jnp.float32)      # MXU, f32 accumulate
        y = acc.astype(epilogue_dtype) + b                     # bias add (VPU)
        h = jnp.maximum(y, 0) if layer < n_layers - 1 else y   # ReLU (VPU)
    # TODO(synk): FCGenerator.forward calls self.transform(), which is only
    # defined in subclasses; identity is used here.
    out_ref[...] = h.astype(out_ref.dtype)


def init_params(key, input_dim, output_dim):
    """Deterministic synthetic parameters. Weights stored as (in, out), f32."""
    dims = [(input_dim, 256), (256, 512), (512, 256), (256, 128), (128, 64),
            (64, output_dim)]
    params = []
    for din, dout in dims:
        key, kw, kb = jax.random.split(key, 3)
        scale = 1.0 / jnp.sqrt(jnp.float32(din))
        w = jax.random.normal(kw, (din, dout), jnp.float32) * scale
        b = jax.random.normal(kb, (1, dout), jnp.float32) * 0.01
        params.append((w, b))
    return params


def fc_generator(x, params, *, tb=512, epilogue_dtype=None, out_dtype=jnp.float32):
    if epilogue_dtype is None:
        epilogue_dtype = _default_epilogue_dtype()

    B, input_dim = x.shape
    output_dim = params[-1][0].shape[1]

    # --- lane-align every layer width (zero padding is numerically inert) ---
    weights, bias_segs, bias_offsets, bias_sizes = [], [], [], []
    off = 0
    for w, b in params:
        din, dout = w.shape
        din_p, dout_p = _round_up(din, LANE), _round_up(dout, LANE)
        weights.append(
            jnp.pad(w, ((0, din_p - din), (0, dout_p - dout))).astype(jnp.bfloat16))
        bias_segs.append(
            jnp.pad(b, ((0, 0), (0, dout_p - dout))).astype(epilogue_dtype))
        bias_offsets.append(off)
        bias_sizes.append(dout_p)
        off += dout_p
    bias_all = jnp.concatenate(bias_segs, axis=1)      # (1, total), 128-aligned segs
    in_pad = weights[0].shape[0]
    out_pad = weights[-1].shape[1]
    if in_pad != input_dim:
        x = jnp.pad(x, ((0, 0), (0, in_pad - input_dim)))

    # --- batch tiling: big tiles amortize per-step overhead; >=2 tiles so both
    #     v7x TensorCores (fed via dimension_semantics="parallel") get work ---
    TB = _round_up(max(8, min(tb, _round_up(B, 8))), 8)
    if _round_up(B, TB) // TB < 2:
        TB = max(8, _round_up(-(-B // 2), 8))          # cap at ~half the batch
    padded_B = _round_up(B, TB)
    if padded_B != B:
        x = jnp.pad(x, ((0, padded_B - B), (0, 0)))
    grid = (padded_B // TB,)

    vmem_limit = _vmem_limit_bytes()
    # VMEM budget: resident weights (x2 in case the compiler double-buffers
    # them) + bias + double-buffered x/out tiles + largest live intermediate.
    resident = 2 * sum(int(w.size) * 2 for w in weights) \
        + int(bias_all.size) * jnp.dtype(epilogue_dtype).itemsize
    streamed = 2 * TB * (in_pad * 4 + out_pad * jnp.dtype(out_dtype).itemsize)
    live = TB * max(bias_sizes) * 4
    # TODO(synk): if input_dim grows enough that W1 cannot stay VMEM-resident,
    # tile its K dimension on a second "arbitrary" grid axis instead.
    assert resident + streamed + live <= vmem_limit, (
        "FCGenerator weights too large to keep VMEM-resident on this chip")

    kernel = functools.partial(
        fc_generator_kernel,
        bias_offsets=tuple(bias_offsets),
        bias_sizes=tuple(bias_sizes),
        epilogue_dtype=epilogue_dtype)

    def build_and_call(single_buffer_resident):
        extra = {}
        if single_buffer_resident:
            # Constant index_map -> fetched once and VMEM-resident; Buffered(1)
            # drops the pointless second pipeline buffer for weights / bias.
            extra = dict(pipeline_mode=pl.Buffered(1))
        w_specs = [pl.BlockSpec(w.shape, lambda i: (0, 0), **extra)
                   for w in weights]
        b_spec = pl.BlockSpec(bias_all.shape, lambda i: (0, 0), **extra)
        call = pl.pallas_call(
            kernel,
            out_shape=jax.ShapeDtypeStruct((padded_B, out_pad), out_dtype),
            grid=grid,
            in_specs=[pl.BlockSpec((TB, in_pad), lambda i: (i, 0))]
                     + w_specs + [b_spec],
            out_specs=pl.BlockSpec((TB, out_pad), lambda i: (i, 0)),
            compiler_params=pltpu.CompilerParams(
                dimension_semantics=("parallel",),
                vmem_limit_bytes=vmem_limit,
            ),
        )
        return call(x, *weights, bias_all)

    try:
        out = build_and_call(True)
    except Exception:
        # pipeline_mode=pl.Buffered(1) not supported on this jax version/backend.
        out = build_and_call(False)

    return out[:B, :output_dim]


def fc_generator_ref(x, params, epilogue_dtype=jnp.float32):
    """Mirror of the kernel's numerics (bf16 weights, f32 MXU accumulation,
    bias+ReLU in epilogue_dtype)."""
    h = x
    n = len(params)
    for i, (w, b) in enumerate(params):
        acc = jnp.dot(h.astype(jnp.bfloat16), w.astype(jnp.bfloat16),
                      preferred_element_type=jnp.float32)
        y = acc.astype(epilogue_dtype) + b.astype(epilogue_dtype)
        h = jnp.maximum(y, 0) if i < n - 1 else y
    return h.astype(jnp.float32)


def fc_generator_ref_f32(x, params):
    """Pure-float32 forward matching the PyTorch module (quantifies bf16 error)."""
    h = x
    n = len(params)
    for i, (w, b) in enumerate(params):
        h = jnp.dot(h, w, precision=jax.lax.Precision.HIGHEST) + b
        if i < n - 1:
            h = jnp.maximum(h, 0.0)
    return h


if __name__ == "__main__":
    key = jax.random.PRNGKey(0)
    k_x, k_p = jax.random.split(key)

    batch, input_dim, output_dim = 256, 32, 16
    x = jax.random.normal(k_x, (batch, input_dim), jnp.float32)
    params = init_params(k_p, input_dim, output_dim)

    epi = _default_epilogue_dtype()
    out = jax.block_until_ready(fc_generator(x, params, epilogue_dtype=epi))
    assert out.shape == (batch, output_dim)

    # Tight check vs. a reference with identical numerics (bf16 weights,
    # f32 accumulation, same epilogue dtype).
    ref_same = fc_generator_ref(x, params, epilogue_dtype=epi)
    assert jnp.allclose(out, ref_same, atol=2e-3, rtol=2e-3)

    # Non-circular check vs. the pure-f32 (PyTorch-equivalent) forward; the
    # looser tolerance bounds the bf16-cast error.
    ref_f32 = fc_generator_ref_f32(x, params)
    assert jnp.allclose(out, ref_f32, atol=5e-2, rtol=5e-2)

    print("KERNEL_OK")
</pallas_src>

<mosaic_0001>
module attributes {stable_mosaic.version = 11 : i64} {
  func.func @fc_generator_kernel(%arg0: i32, %arg1: memref<128x128xf32, #tpu.memory_space<vmem>>, %arg2: memref<128x256xbf16, #tpu.memory_space<vmem>>, %arg3: memref<256x512xbf16, #tpu.memory_space<vmem>>, %arg4: memref<512x256xbf16, #tpu.memory_space<vmem>>, %arg5: memref<256x128xbf16, #tpu.memory_space<vmem>>, %arg6: memref<128x128xbf16, #tpu.memory_space<vmem>>, %arg7: memref<128x128xbf16, #tpu.memory_space<vmem>>, %arg8: memref<1x1408xf32, #tpu.memory_space<vmem>>, %arg9: memref<128x128xf32, #tpu.memory_space<vmem>>) attributes {dimension_semantics = [#tpu.dimension_semantics<parallel>], iteration_bounds = array<i64: 2>, scalar_prefetch = 0 : i64, scratch_operands = 0 : i64, tpu.core_type = #tpu.core_type<tc>, window_params = [{transform_indices = @transform_0, window_bounds = array<i64: 128, 128>}, {pipeline_mode = #tpu.pipeline_mode<synchronous>, transform_indices = @transform_1, window_bounds = array<i64: 128, 256>}, {pipeline_mode = #tpu.pipeline_mode<synchronous>, transform_indices = @transform_2, window_bounds = array<i64: 256, 512>}, {pipeline_mode = #tpu.pipeline_mode<synchronous>, transform_indices = @transform_3, window_bounds = array<i64: 512, 256>}, {pipeline_mode = #tpu.pipeline_mode<synchronous>, transform_indices = @transform_4, window_bounds = array<i64: 256, 128>}, {pipeline_mode = #tpu.pipeline_mode<synchronous>, transform_indices = @transform_5, window_bounds = array<i64: 128, 128>}, {pipeline_mode = #tpu.pipeline_mode<synchronous>, transform_indices = @transform_6, window_bounds = array<i64: 128, 128>}, {pipeline_mode = #tpu.pipeline_mode<synchronous>, transform_indices = @transform_7, window_bounds = array<i64: 1, 1408>}, {transform_indices = @transform_8, window_bounds = array<i64: 128, 128>}]} {
    %c0 = arith.constant 0 : index
    %c0_0 = arith.constant 0 : index
    %0 = vector.load %arg1[%c0, %c0_0] : memref<128x128xf32, #tpu.memory_space<vmem>>, vector<128x128xf32>
    %c0_1 = arith.constant 0 : index
    %c0_2 = arith.constant 0 : index
    %1 = vector.load %arg8[%c0_1, %c0_2] : memref<1x1408xf32, #tpu.memory_space<vmem>>, vector<1x256xf32>
    %2 = arith.truncf %0 : vector<128x128xf32> to vector<128x128xbf16>
    %c0_3 = arith.constant 0 : index
    %c0_4 = arith.constant 0 : index
    %3 = vector.load %arg2[%c0_3, %c0_4] : memref<128x256xbf16, #tpu.memory_space<vmem>>, vector<128x256xbf16>
    %cst = arith.constant dense<0.000000e+00> : vector<128x256xf32>
    %4 = tpu.matmul %2, %3, %cst {dimension_numbers = #tpu.dot_dimension_numbers<[1], [0], [0], [1], [0, 0, 1, 1], [], []>} : vector<128x128xbf16>, vector<128x256xbf16>, vector<128x256xf32> -> vector<128x256xf32>
    %5 = vector.broadcast %1 : vector<1x256xf32> to vector<128x256xf32>
    %6 = arith.addf %4, %5 : vector<128x256xf32>
    %cst_5 = arith.constant 0.000000e+00 : f32
    %7 = vector.broadcast %cst_5 : f32 to vector<128x256xf32>
    %8 = arith.maximumf %6, %7 : vector<128x256xf32>
    %c0_6 = arith.constant 0 : index
    %c256 = arith.constant 256 : index
    %9 = vector.load %arg8[%c0_6, %c256] : memref<1x1408xf32, #tpu.memory_space<vmem>>, vector<1x512xf32>
    %10 = arith.truncf %8 : vector<128x256xf32> to vector<128x256xbf16>
    %c0_7 = arith.constant 0 : index
    %c0_8 = arith.constant 0 : index
    %11 = vector.load %arg3[%c0_7, %c0_8] : memref<256x512xbf16, #tpu.memory_space<vmem>>, vector<256x512xbf16>
    %cst_9 = arith.constant dense<0.000000e+00> : vector<128x512xf32>
    %12 = tpu.matmul %10, %11, %cst_9 {dimension_numbers = #tpu.dot_dimension_numbers<[1], [0], [0], [1], [0, 0, 1, 1], [], []>} : vector<128x256xbf16>, vector<256x512xbf16>, vector<128x512xf32> -> vector<128x512xf32>
    %13 = vector.broadcast %9 : vector<1x512xf32> to vector<128x512xf32>
    %14 = arith.addf %12, %13 : vector<128x512xf32>
    %cst_10 = arith.constant 0.000000e+00 : f32
    %15 = vector.broadcast %cst_10 : f32 to vector<128x512xf32>
    %16 = arith.maximumf %14, %15 : vector<128x512xf32>
    %c0_11 = arith.constant 0 : index
    %c768 = arith.constant 768 : index
    %17 = vector.load %arg8[%c0_11, %c768] : memref<1x1408xf32, #tpu.memory_space<vmem>>, vector<1x256xf32>
    %18 = arith.truncf %16 : vector<128x512xf32> to vector<128x512xbf16>
    %c0_12 = arith.constant 0 : index
    %c0_13 = arith.constant 0 : index
    %19 = vector.load %arg4[%c0_12, %c0_13] : memref<512x256xbf16, #tpu.memory_space<vmem>>, vector<512x256xbf16>
    %cst_14 = arith.constant dense<0.000000e+00> : vector<128x256xf32>
    %20 = tpu.matmul %18, %19, %cst_14 {dimension_numbers = #tpu.dot_dimension_numbers<[1], [0], [0], [1], [0, 0, 1, 1], [], []>} : vector<128x512xbf16>, vector<512x256xbf16>, vector<128x256xf32> -> vector<128x256xf32>
    %21 = vector.broadcast %17 : vector<1x256xf32> to vector<128x256xf32>
    %22 = arith.addf %20, %21 : vector<128x256xf32>
    %cst_15 = arith.constant 0.000000e+00 : f32
    %23 = vector.broadcast %cst_15 : f32 to vector<128x256xf32>
    %24 = arith.maximumf %22, %23 : vector<128x256xf32>
    %c0_16 = arith.constant 0 : index
    %c1024 = arith.constant 1024 : index
    %25 = vector.load %arg8[%c0_16, %c1024] : memref<1x1408xf32, #tpu.memory_space<vmem>>, vector<1x128xf32>
    %26 = arith.truncf %24 : vector<128x256xf32> to vector<128x256xbf16>
    %c0_17 = arith.constant 0 : index
    %c0_18 = arith.constant 0 : index
    %27 = vector.load %arg5[%c0_17, %c0_18] : memref<256x128xbf16, #tpu.memory_space<vmem>>, vector<256x128xbf16>
    %cst_19 = arith.constant dense<0.000000e+00> : vector<128x128xf32>
    %28 = tpu.matmul %26, %27, %cst_19 {dimension_numbers = #tpu.dot_dimension_numbers<[1], [0], [0], [1], [0, 0, 1, 1], [], []>} : vector<128x256xbf16>, vector<256x128xbf16>, vector<128x128xf32> -> vector<128x128xf32>
    %29 = vector.broadcast %25 : vector<1x128xf32> to vector<128x128xf32>
    %30 = arith.addf %28, %29 : vector<128x128xf32>
    %cst_20 = arith.constant 0.000000e+00 : f32
    %31 = vector.broadcast %cst_20 : f32 to vector<128x128xf32>
    %32 = arith.maximumf %30, %31 : vector<128x128xf32>
    %c0_21 = arith.constant 0 : index
    %c1152 = arith.constant 1152 : index
    %33 = vector.load %arg8[%c0_21, %c1152] : memref<1x1408xf32, #tpu.memory_space<vmem>>, vector<1x128xf32>
    %34 = arith.truncf %32 : vector<128x128xf32> to vector<128x128xbf16>
    %c0_22 = arith.constant 0 : index
    %c0_23 = arith.constant 0 : index
    %35 = vector.load %arg6[%c0_22, %c0_23] : memref<128x128xbf16, #tpu.memory_space<vmem>>, vector<128x128xbf16>
    %cst_24 = arith.constant dense<0.000000e+00> : vector<128x128xf32>
    %36 = tpu.matmul %34, %35, %cst_24 {dimension_numbers = #tpu.dot_dimension_numbers<[1], [0], [0], [1], [0, 0, 1, 1], [], []>} : vector<128x128xbf16>, vector<128x128xbf16>, vector<128x128xf32> -> vector<128x128xf32>
    %37 = vector.broadcast %33 : vector<1x128xf32> to vector<128x128xf32>
    %38 = arith.addf %36, %37 : vector<128x128xf32>
    %cst_25 = arith.constant 0.000000e+00 : f32
    %39 = vector.broadcast %cst_25 : f32 to vector<128x128xf32>
    %40 = arith.maximumf %38, %39 : vector<128x128xf32>
    %c0_26 = arith.constant 0 : index
    %c1280 = arith.constant 1280 : index
    %41 = vector.load %arg8[%c0_26, %c1280] : memref<1x1408xf32, #tpu.memory_space<vmem>>, vector<1x128xf32>
    %42 = arith.truncf %40 : vector<128x128xf32> to vector<128x128xbf16>
    %c0_27 = arith.constant 0 : index
    %c0_28 = arith.constant 0 : index
    %43 = vector.load %arg7[%c0_27, %c0_28] : memref<128x128xbf16, #tpu.memory_space<vmem>>, vector<128x128xbf16>
    %cst_29 = arith.constant dense<0.000000e+00> : vector<128x128xf32>
    %44 = tpu.matmul %42, %43, %cst_29 {dimension_numbers = #tpu.dot_dimension_numbers<[1], [0], [0], [1], [0, 0, 1, 1], [], []>} : vector<128x128xbf16>, vector<128x128xbf16>, vector<128x128xf32> -> vector<128x128xf32>
    %45 = vector.broadcast %41 : vector<1x128xf32> to vector<128x128xf32>
    %46 = arith.addf %44, %45 : vector<128x128xf32>
    %c0_30 = arith.constant 0 : index
    %c0_31 = arith.constant 0 : index
    %47 = vector.load %arg9[%c0_30, %c0_31] : memref<128x128xf32, #tpu.memory_space<vmem>>, vector<128x128xf32>
    tpu.vector_store %arg9[%c0_30, %c0_31], %46 {strides = array<i32>} : memref<128x128xf32, #tpu.memory_space<vmem>>, vector<128x128xf32>,
    return
  }
  func.func @transform_0(%arg0: i32) -> (i32, i32) {
    %c0_i32 = arith.constant 0 : i32
    %c0_i32_0 = arith.constant 0 : i32
    return %arg0, %c0_i32 : i32, i32
  }
  func.func @transform_1(%arg0: i32) -> (i32, i32) {
    %c0_i32 = arith.constant 0 : i32
    %c0_i32_0 = arith.constant 0 : i32
    %c0_i32_1 = arith.constant 0 : i32
    return %c0_i32, %c0_i32_0 : i32, i32
  }
  func.func @transform_2(%arg0: i32) -> (i32, i32) {
    %c0_i32 = arith.constant 0 : i32
    %c0_i32_0 = arith.constant 0 : i32
    %c0_i32_1 = arith.constant 0 : i32
    return %c0_i32, %c0_i32_0 : i32, i32
  }
  func.func @transform_3(%arg0: i32) -> (i32, i32) {
    %c0_i32 = arith.constant 0 : i32
    %c0_i32_0 = arith.constant 0 : i32
    %c0_i32_1 = arith.constant 0 : i32
    return %c0_i32, %c0_i32_0 : i32, i32
  }
  func.func @transform_4(%arg0: i32) -> (i32, i32) {
    %c0_i32 = arith.constant 0 : i32
    %c0_i32_0 = arith.constant 0 : i32
    %c0_i32_1 = arith.constant 0 : i32
    return %c0_i32, %c0_i32_0 : i32, i32
  }
  func.func @transform_5(%arg0: i32) -> (i32, i32) {
    %c0_i32 = arith.constant 0 : i32
    %c0_i32_0 = arith.constant 0 : i32
    %c0_i32_1 = arith.constant 0 : i32
    return %c0_i32, %c0_i32_0 : i32, i32
  }
  func.func @transform_6(%arg0: i32) -> (i32, i32) {
    %c0_i32 = arith.constant 0 : i32
    %c0_i32_0 = arith.constant 0 : i32
    %c0_i32_1 = arith.constant 0 : i32
    return %c0_i32, %c0_i32_0 : i32, i32
  }
  func.func @transform_7(%arg0: i32) -> (i32, i32) {
    %c0_i32 = arith.constant 0 : i32
    %c0_i32_0 = arith.constant 0 : i32
    %c0_i32_1 = arith.constant 0 : i32
    return %c0_i32, %c0_i32_0 : i32, i32
  }
  func.func @transform_8(%arg0: i32) -> (i32, i32) {
    %c0_i32 = arith.constant 0 : i32
    %c0_i32_0 = arith.constant 0 : i32
    return %arg0, %c0_i32 : i32, i32
  }
}

module attributes {stable_mosaic.version = 11 : i64} {
  func.func @fc_generator_kernel(%arg0: i32, %arg1: memref<128x128xf32, #tpu.memory_space<vmem>>, %arg2: memref<128x256xbf16, #tpu.memory_space<vmem>>, %arg3: memref<256x512xbf16, #tpu.memory_space<vmem>>, %arg4: memref<512x256xbf16, #tpu.memory_space<vmem>>, %arg5: memref<256x128xbf16, #tpu.memory_space<vmem>>, %arg6: memref<128x128xbf16, #tpu.memory_space<vmem>>, %arg7: memref<128x128xbf16, #tpu.memory_space<vmem>>, %arg8: memref<1x1408xf32, #tpu.memory_space<vmem>>, %arg9: memref<128x128xf32, #tpu.memory_space<vmem>>) attributes {dimension_semantics = [#tpu.dimension_semantics<parallel>], iteration_bounds = array<i64: 2>, scalar_prefetch = 0 : i64, scratch_operands = 0 : i64, tpu.core_type = #tpu.core_type<tc>, window_params = [{transform_indices = @transform_0, window_bounds = array<i64: 128, 128>}, {pipeline_mode = #tpu.pipeline_mode<synchronous>, transform_indices = @transform_1, window_bounds = array<i64: 128, 256>}, {pipeline_mode = #tpu.pipeline_mode<synchronous>, transform_indices = @transform_2, window_bounds = array<i64: 256, 512>}, {pipeline_mode = #tpu.pipeline_mode<synchronous>, transform_indices = @transform_3, window_bounds = array<i64: 512, 256>}, {pipeline_mode = #tpu.pipeline_mode<synchronous>, transform_indices = @transform_4, window_bounds = array<i64: 256, 128>}, {pipeline_mode = #tpu.pipeline_mode<synchronous>, transform_indices = @transform_5, window_bounds = array<i64: 128, 128>}, {pipeline_mode = #tpu.pipeline_mode<synchronous>, transform_indices = @transform_6, window_bounds = array<i64: 128, 128>}, {pipeline_mode = #tpu.pipeline_mode<synchronous>, transform_indices = @transform_7, window_bounds = array<i64: 1, 1408>}, {transform_indices = @transform_8, window_bounds = array<i64: 128, 128>}]} {
    %c0 = arith.constant 0 : index
    %c0_0 = arith.constant 0 : index
    %0 = vector.load %arg1[%c0, %c0_0] : memref<128x128xf32, #tpu.memory_space<vmem>>, vector<128x128xf32>
    %c0_1 = arith.constant 0 : index
    %c0_2 = arith.constant 0 : index
    %1 = vector.load %arg8[%c0_1, %c0_2] : memref<1x1408xf32, #tpu.memory_space<vmem>>, vector<1x256xf32>
    %2 = arith.truncf %0 : vector<128x128xf32> to vector<128x128xbf16>
    %c0_3 = arith.constant 0 : index
    %c0_4 = arith.constant 0 : index
    %3 = vector.load %arg2[%c0_3, %c0_4] : memref<128x256xbf16, #tpu.memory_space<vmem>>, vector<128x256xbf16>
    %cst = arith.constant dense<0.000000e+00> : vector<128x256xf32>
    %4 = tpu.matmul %2, %3, %cst {dimension_numbers = #tpu.dot_dimension_numbers<[1], [0], [0], [1], [0, 0, 1, 1], [], []>} : vector<128x128xbf16>, vector<128x256xbf16>, vector<128x256xf32> -> vector<128x256xf32>
    %5 = vector.broadcast %1 : vector<1x256xf32> to vector<128x256xf32>
    %6 = arith.addf %4, %5 : vector<128x256xf32>
    %cst_5 = arith.constant 0.000000e+00 : f32
    %7 = vector.broadcast %cst_5 : f32 to vector<128x256xf32>
    %8 = arith.maximumf %6, %7 : vector<128x256xf32>
    %c0_6 = arith.constant 0 : index
    %c256 = arith.constant 256 : index
    %9 = vector.load %arg8[%c0_6, %c256] : memref<1x1408xf32, #tpu.memory_space<vmem>>, vector<1x512xf32>
    %10 = arith.truncf %8 : vector<128x256xf32> to vector<128x256xbf16>
    %c0_7 = arith.constant 0 : index
    %c0_8 = arith.constant 0 : index
    %11 = vector.load %arg3[%c0_7, %c0_8] : memref<256x512xbf16, #tpu.memory_space<vmem>>, vector<256x512xbf16>
    %cst_9 = arith.constant dense<0.000000e+00> : vector<128x512xf32>
    %12 = tpu.matmul %10, %11, %cst_9 {dimension_numbers = #tpu.dot_dimension_numbers<[1], [0], [0], [1], [0, 0, 1, 1], [], []>} : vector<128x256xbf16>, vector<256x512xbf16>, vector<128x512xf32> -> vector<128x512xf32>
    %13 = vector.broadcast %9 : vector<1x512xf32> to vector<128x512xf32>
    %14 = arith.addf %12, %13 : vector<128x512xf32>
    %cst_10 = arith.constant 0.000000e+00 : f32
    %15 = vector.broadcast %cst_10 : f32 to vector<128x512xf32>
    %16 = arith.maximumf %14, %15 : vector<128x512xf32>
    %c0_11 = arith.constant 0 : index
    %c768 = arith.constant 768 : index
    %17 = vector.load %arg8[%c0_11, %c768] : memref<1x1408xf32, #tpu.memory_space<vmem>>, vector<1x256xf32>
    %18 = arith.truncf %16 : vector<128x512xf32> to vector<128x512xbf16>
    %c0_12 = arith.constant 0 : index
    %c0_13 = arith.constant 0 : index
    %19 = vector.load %arg4[%c0_12, %c0_13] : memref<512x256xbf16, #tpu.memory_space<vmem>>, vector<512x256xbf16>
    %cst_14 = arith.constant dense<0.000000e+00> : vector<128x256xf32>
    %20 = tpu.matmul %18, %19, %cst_14 {dimension_numbers = #tpu.dot_dimension_numbers<[1], [0], [0], [1], [0, 0, 1, 1], [], []>} : vector<128x512xbf16>, vector<512x256xbf16>, vector<128x256xf32> -> vector<128x256xf32>
    %21 = vector.broadcast %17 : vector<1x256xf32> to vector<128x256xf32>
    %22 = arith.addf %20, %21 : vector<128x256xf32>
    %cst_15 = arith.constant 0.000000e+00 : f32
    %23 = vector.broadcast %cst_15 : f32 to vector<128x256xf32>
    %24 = arith.maximumf %22, %23 : vector<128x256xf32>
    %c0_16 = arith.constant 0 : index
    %c1024 = arith.constant 1024 : index
    %25 = vector.load %arg8[%c0_16, %c1024] : memref<1x1408xf32, #tpu.memory_space<vmem>>, vector<1x128xf32>
    %26 = arith.truncf %24 : vector<128x256xf32> to vector<128x256xbf16>
    %c0_17 = arith.constant 0 : index
    %c0_18 = arith.constant 0 : index
    %27 = vector.load %arg5[%c0_17, %c0_18] : memref<256x128xbf16, #tpu.memory_space<vmem>>, vector<256x128xbf16>
    %cst_19 = arith.constant dense<0.000000e+00> : vector<128x128xf32>
    %28 = tpu.matmul %26, %27, %cst_19 {dimension_numbers = #tpu.dot_dimension_numbers<[1], [0], [0], [1], [0, 0, 1, 1], [], []>} : vector<128x256xbf16>, vector<256x128xbf16>, vector<128x128xf32> -> vector<128x128xf32>
    %29 = vector.broadcast %25 : vector<1x128xf32> to vector<128x128xf32>
    %30 = arith.addf %28, %29 : vector<128x128xf32>
    %cst_20 = arith.constant 0.000000e+00 : f32
    %31 = vector.broadcast %cst_20 : f32 to vector<128x128xf32>
    %32 = arith.maximumf %30, %31 : vector<128x128xf32>
    %c0_21 = arith.constant 0 : index
    %c1152 = arith.constant 1152 : index
    %33 = vector.load %arg8[%c0_21, %c1152] : memref<1x1408xf32, #tpu.memory_space<vmem>>, vector<1x128xf32>
    %34 = arith.truncf %32 : vector<128x128xf32> to vector<128x128xbf16>
    %c0_22 = arith.constant 0 : index
    %c0_23 = arith.constant 0 : index
    %35 = vector.load %arg6[%c0_22, %c0_23] : memref<128x128xbf16, #tpu.memory_space<vmem>>, vector<128x128xbf16>
    %cst_24 = arith.constant dense<0.000000e+00> : vector<128x128xf32>
    %36 = tpu.matmul %34, %35, %cst_24 {dimension_numbers = #tpu.dot_dimension_numbers<[1], [0], [0], [1], [0, 0, 1, 1], [], []>} : vector<128x128xbf16>, vector<128x128xbf16>, vector<128x128xf32> -> vector<128x128xf32>
    %37 = vector.broadcast %33 : vector<1x128xf32> to vector<128x128xf32>
    %38 = arith.addf %36, %37 : vector<128x128xf32>
    %cst_25 = arith.constant 0.000000e+00 : f32
    %39 = vector.broadcast %cst_25 : f32 to vector<128x128xf32>
    %40 = arith.maximumf %38, %39 : vector<128x128xf32>
    %c0_26 = arith.constant 0 : index
    %c1280 = arith.constant 1280 : index
    %41 = vector.load %arg8[%c0_26, %c1280] : memref<1x1408xf32, #tpu.memory_space<vmem>>, vector<1x128xf32>
    %42 = arith.truncf %40 : vector<128x128xf32> to vector<128x128xbf16>
    %c0_27 = arith.constant 0 : index
    %c0_28 = arith.constant 0 : index
    %43 = vector.load %arg7[%c0_27, %c0_28] : memref<128x128xbf16, #tpu.memory_space<vmem>>, vector<128x128xbf16>
    %cst_29 = arith.constant dense<0.000000e+00> : vector<128x128xf32>
    %44 = tpu.matmul %42, %43, %cst_29 {dimension_numbers = #tpu.dot_dimension_numbers<[1], [0], [0], [1], [0, 0, 1, 1], [], []>} : vector<128x128xbf16>, vector<128x128xbf16>, vector<128x128xf32> -> vector<128x128xf32>
    %45 = vector.broadcast %41 : vector<1x128xf32> to vector<128x128xf32>
    %46 = arith.addf %44, %45 : vector<128x128xf32>
    %c0_30 = arith.constant 0 : index
    %c0_31 = arith.constant 0 : index
    %47 = vector.load %arg9[%c0_30, %c0_31] : memref<128x128xf32, #tpu.memory_space<vmem>>, vector<128x128xf32>
    tpu.vector_store %arg9[%c0_30, %c0_31], %46 {strides = array<i32>} : memref<128x128xf32, #tpu.memory_space<vmem>>, vector<128x128xf32>,
    return
  }
  func.func @transform_0(%arg0: i32) -> (i32, i32) {
    %c0_i32 = arith.constant 0 : i32
    %c0_i32_0 = arith.constant 0 : i32
    return %arg0, %c0_i32 : i32, i32
  }
  func.func @transform_1(%arg0: i32) -> (i32, i32) {
    %c0_i32 = arith.constant 0 : i32
    %c0_i32_0 = arith.constant 0 : i32
    %c0_i32_1 = arith.constant 0 : i32
    return %c0_i32, %c0_i32_0 : i32, i32
  }
  func.func @transform_2(%arg0: i32) -> (i32, i32) {
    %c0_i32 = arith.constant 0 : i32
    %c0_i32_0 = arith.constant 0 : i32
    %c0_i32_1 = arith.constant 0 : i32
    return %c0_i32, %c0_i32_0 : i32, i32
  }
  func.func @transform_3(%arg0: i32) -> (i32, i32) {
    %c0_i32 = arith.constant 0 : i32
    %c0_i32_0 = arith.constant 0 : i32
    %c0_i32_1 = arith.constant 0 : i32
    return %c0_i32, %c0_i32_0 : i32, i32
  }
  func.func @transform_4(%arg0: i32) -> (i32, i32) {
    %c0_i32 = arith.constant 0 : i32
    %c0_i32_0 = arith.constant 0 : i32
    %c0_i32_1 = arith.constant 0 : i32
    return %c0_i32, %c0_i32_0 : i32, i32
  }
  func.func @transform_5(%arg0: i32) -> (i32, i32) {
    %c0_i32 = arith.constant 0 : i32
    %c0_i32_0 = arith.constant 0 : i32
    %c0_i32_1 = arith.constant 0 : i32
    return %c0_i32, %c0_i32_0 : i32, i32
  }
  func.func @transform_6(%arg0: i32) -> (i32, i32) {
    %c0_i32 = arith.constant 0 : i32
    %c0_i32_0 = arith.constant 0 : i32
    %c0_i32_1 = arith.constant 0 : i32
    return %c0_i32, %c0_i32_0 : i32, i32
  }
  func.func @transform_7(%arg0: i32) -> (i32, i32) {
    %c0_i32 = arith.constant 0 : i32
    %c0_i32_0 = arith.constant 0 : i32
    %c0_i32_1 = arith.constant 0 : i32
    return %c0_i32, %c0_i32_0 : i32, i32
  }
  func.func @transform_8(%arg0: i32) -> (i32, i32) {
    %c0_i32 = arith.constant 0 : i32
    %c0_i32_0 = arith.constant 0 : i32
    return %arg0, %c0_i32 : i32, i32
  }
}

</mosaic_0001>

<bundles_post_ra>
// kernel: tpu_custom_call.1
= control target key start
LH: loop header
LB: loop body
LE: loop exit
PB: predicated region body
PF: predicated region fallthrough
CT: control target
= control target key end

     0   :  { %s4457_s0 = inlined_call_operand.hbm [shape: f32[256,128], index: 0, kind: input, shape index: {}]   ;;  %s4458_s1 = inlined_call_operand.hbm [shape: bf16[128,256], index: 1, kind: input, shape index: {}]   ;;  %s4459_s2 = inlined_call_operand.hbm [shape: bf16[256,512], index: 2, kind: input, shape index: {}]   ;;  %s4460_s3 = inlined_call_operand.hbm [shape: bf16[512,256], index: 3, kind: input, shape index: {}]   ;;  %s4461_s4 = inlined_call_operand.hbm [shape: bf16[256,128], index: 4, kind: input, shape index: {}]   ;;  %s4462_s5 = inlined_call_operand.hbm [shape: bf16[128,128], index: 5, kind: input, shape index: {}]   ;;  %s4463_s6 = inlined_call_operand.hbm [shape: bf16[128,128], index: 6, kind: input, shape index: {}]   ;;  %s4464_s7 = inlined_call_operand.vmem [shape: f32[1,1408], index: 7, kind: input, shape index: {}]   ;;  %s4465_s8 = inlined_call_operand.hbm [shape: f32[256,128], index: 8, kind: output, shape index: {}]  }
   0x1   :  { %4472 = sst [smem:[#allocation20_spill]] %s4458_s1 }
   0x2   :  { %4473 = sst [smem:[#allocation21_spill]] %s4459_s2 }
   0x3   :  { %13 = vsyncpa [#allocation3], 0 }
   0x4   :  { %15 = vsyncpa [#allocation3 + $0x1], 0 }
   0x5   :  { %16 = vsyncpa [#allocation6], 0 }
   0x6   :  { %17 = vsyncpa [#allocation9], 0 }
   0x7   :  { %18 = vsyncpa [#allocation12], 0 }
   0x8   :  { %19 = vsyncpa [#allocation4], 0 }
   0x9   :  { %21 = vsyncpa [#allocation4 + $0x1], 0  ;;  %s3952_s27 = smov 0   ;;  %s3954_s28 = smov 0  }
   0xa   :  { %s3956_s29 = smov 0   ;;  %s3958_s30 = smov 0  }
   0xb LB: > { %s3890_s9 = smov [#allocation5]   ;;  %s3973_s11 = sadd.s32 4294967295, %s3888_s30   ;;  %s3888_s30 = sphi %s3958_s30, %s4500_s30   ;;  %s3884_s29 = sphi %s3956_s29, %s4499_s29   ;;  %s3880_s28 = sphi %s3954_s28, %s4498_s28   ;;  %s3876_s27 = sphi %s3952_s27, %s4497_s27  }
   0xc   : > { %s243_s10 = sshll.u32 %s3890_s9, 4  ;;  %p2882_p0 = scmp.ge.s32.totalorder %s3888_s30, 1  ;;  %s244_s10 = int_to_ptr.vmem [resolvable:$true] %s243_s10 }
   0xd   : > { %p4468_p1 = scmp.eq.s32.totalorder %s3973_s11, 0  ;;  %p231_p2 = scmp.lt.s32.totalorder %s3888_s30, 3 }
   0xe   : > { %s3891_s13 = smov [#allocation8]   ;;  %s3892_s16 = smov [#allocation11]  }
   0xf   : > { %p3978_p3 = pnand %p2882_p0, %p231_p2  ;;  %s269_s14 = sshll.u32 %s3891_s13, 4  ;;  %s270_s14 = int_to_ptr.vmem [resolvable:$true] %s269_s14 }
  0x10   : > { %s295_s17 = sshll.u32 %s3892_s16, 4  ;;  %s3639_s19 = scalar_lea.vmem %s244_s10, 2048  ;;  %s296_s17 = int_to_ptr.vmem [resolvable:$true] %s295_s17 }
  0x11   : > { %s4474_s12 = scalar_select %p3978_p3, 1, 0 }
  0x12   : > { %p3292_p5 = pneg %p3978_p3  ;;  %p3640_p8 = scmp.ne.s32.totalorder %s244_s10, %s3639_s19 }
  0x13   : > { %p3647_p11 = scmp.lt.s32.totalorder %s244_s10, %s244_s10  ;;  %p3648_p12 = scmp.lt.s32.totalorder %s3639_s19, %s3639_s19 }
  0x14   : > { %p3987_p6 = pnand %p3292_p5, %p4468_p1 }
  0x15   : > { %p3649_p13 = por %p3648_p12, %p3647_p11 }
  0x16   : > { %p3993_p7 = pneg %p3987_p6 }
  0x18   : > { %p3642_p9 = pnand %p3640_p8, %p3993_p7 }
  0x1a   : > { %p3643_p10 = pneg %p3642_p9 }
  0x1c   : > { %p3650_p0 = pnand %p3649_p13, %p3643_p10 }
  0x1e   : > { %3653 = shalt.err (!%p3650_p0)
}
  0x1f   : > { %s4466_s20 = smov 128   ;;  %s4467_s21 = smov 8  }
  0x20   : > { %s4477_s1 = sld [smem:[#allocation20_spill]]  ;;  %s3665_s24 = scalar_lea.vmem %s270_s14, 8192 }
  0x21   : > { %p3666_p2 = scmp.ne.s32.totalorder %s270_s14, %s3665_s24  ;;  %p3673_p9 = scmp.lt.s32.totalorder %s270_s14, %s270_s14 }
  0x22   : > { %p3674_p10 = scmp.lt.s32.totalorder %s3665_s24, %s3665_s24 }
  0x23   : > { %p3668_p5 = pnand %p3666_p2, %p3993_p7 }
  0x24   : > { %p3675_p11 = por %p3674_p10, %p3673_p9 }
  0x25   : > { %p3669_p8 = pneg %p3668_p5 }
  0x26   : > { %3295 = dma.hbm_to_vmem [thread:$0]  (!%p3987_p6), %s4477_s1, 2048, %s244_s10, [#allocation6], %s4466_s20, %s4466_s20, %s4467_s21  }
  0x27   : > { %p3676_p12 = pnand %p3675_p11, %p3669_p8 }
  0x29   : > { %3679 = shalt.err (!%p3676_p12)
}
  0x2a   : > { %3301 = dma.hbm_to_vmem [thread:$0]  (!%p3987_p6), %s4460_s3, 8192, %s270_s14, [#allocation9], %s4466_s20, %s4466_s20, %s4467_s21  }
  0x2b   : > { %s3691_s9 = scalar_lea.vmem %s296_s17, 1024  ;;  %p3699_p5 = scmp.lt.s32.totalorder %s296_s17, %s296_s17 }
  0x2c   : > { %p3692_p13 = scmp.ne.s32.totalorder %s296_s17, %s3691_s9  ;;  %p3700_p9 = scmp.lt.s32.totalorder %s3691_s9, %s3691_s9 }
  0x2e   : > { %p3694_p0 = pnand %p3692_p13, %p3993_p7  ;;  %p3701_p8 = por %p3700_p9, %p3699_p5 }
  0x30   : > { %p3695_p2 = pneg %p3694_p0 }
  0x32   : > { %p3702_p10 = pnand %p3701_p8, %p3695_p2 }
  0x34   : > { %3705 = shalt.err (!%p3702_p10)
}
  0x35   : > { %s3895_s10 = smov 64   ;;  %s3896_s13 = smov 4  }
  0x36   : > { %3307 = dma.hbm_to_vmem [thread:$0]  (!%p3987_p6), %s4462_s5, 1024, %s296_s17, [#allocation12], %s3895_s10, %s3895_s10, %s3896_s13  }
  0x37   : > { %s3897_s19 = smov [#allocation7]  }
  0x38   : > { %s256_s22 = sshll.u32 %s3897_s19, 4  ;;  %s257_s22 = int_to_ptr.vmem [resolvable:$true] %s256_s22 }
  0x39   : > { %s3717_s23 = scalar_lea.vmem %s257_s22, 8192  ;;  %p3725_p0 = scmp.lt.s32.totalorder %s257_s22, %s257_s22 }
  0x3a   : > { %p3718_p11 = scmp.ne.s32.totalorder %s257_s22, %s3717_s23  ;;  %p3726_p2 = scmp.lt.s32.totalorder %s3717_s23, %s3717_s23 }
  0x3c   : > { %p3720_p12 = pnand %p3718_p11, %p3993_p7  ;;  %p3727_p5 = por %p3726_p2, %p3725_p0 }
  0x3e   : > { %p3721_p13 = pneg %p3720_p12 }
  0x40   : > { %p3728_p9 = pnand %p3727_p5, %p3721_p13 }
  0x42   : > { %3731 = shalt.err (!%p3728_p9)
}
  0x43   : > { %s3898_s24 = smov 256   ;;  %s3899_s25 = smov 16  }
  0x44   : > { %s4478_s2 = sld [smem:[#allocation21_spill]]  ;;  %s3900_s9 = smov [#allocation10]  }
  0x45   : > { %s282_s14 = sshll.u32 %s3900_s9, 4  ;;  %s3901_s16 = smov [#allocation13]   ;;  %s283_s14 = int_to_ptr.vmem [resolvable:$true] %s282_s14 }
  0x46   : > { %s308_s19 = sshll.u32 %s3901_s16, 4  ;;  %s3743_s20 = scalar_lea.vmem %s283_s14, 2048  ;;  %s309_s19 = int_to_ptr.vmem [resolvable:$true] %s308_s19 }
  0x47   : > { %p3744_p8 = scmp.ne.s32.totalorder %s283_s14, %s3743_s20  ;;  %p3751_p12 = scmp.lt.s32.totalorder %s283_s14, %s283_s14 }
  0x48   : > { %p3752_p13 = scmp.lt.s32.totalorder %s3743_s20, %s3743_s20 }
  0x49   : > { %p3746_p10 = pnand %p3744_p8, %p3993_p7 }
  0x4a   : > { %3298 = dma.hbm_to_vmem [thread:$0]  (!%p3987_p6), %s4478_s2, 8192, %s257_s22, [#allocation6], %s3898_s24, %s3898_s24, %s3899_s25  }
  0x4b   : > { %p3747_p11 = pneg %p3746_p10  ;;  %p3753_p0 = por %p3752_p13, %p3751_p12 }
  0x4d   : > { %p3754_p2 = pnand %p3753_p0, %p3747_p11 }
  0x4f   : > { %3757 = shalt.err (!%p3754_p2)
}
  0x50   : > { %3304 = dma.hbm_to_vmem [thread:$0]  (!%p3987_p6), %s4461_s4, 2048, %s283_s14, [#allocation9], %s3895_s10, %s3895_s10, %s3896_s13  }
  0x51   : > { %s3769_s24 = scalar_lea.vmem %s309_s19, 1024  ;;  %p3777_p10 = scmp.lt.s32.totalorder %s309_s19, %s309_s19 }
  0x52   : > { %p3770_p5 = scmp.ne.s32.totalorder %s309_s19, %s3769_s24  ;;  %p3778_p4 = scmp.lt.s32.totalorder %s3769_s24, %s3769_s24 }
  0x54   : > { %p3772_p9 = pnand %p3770_p5, %p3993_p7  ;;  %p3779_p12 = por %p3778_p4, %p3777_p10 }
  0x56   : > { %p3773_p8 = pneg %p3772_p9 }
  0x58   : > { %p3780_p11 = pnand %p3779_p12, %p3773_p8 }
  0x5a   : > { %3783 = shalt.err (!%p3780_p11)
}
  0x5b   : > { %3310 = dma.hbm_to_vmem [thread:$0]  (!%p3987_p6), %s4463_s6, 1024, %s309_s19, [#allocation12], %s3895_s10, %s3895_s10, %s3896_s13  }
  0x5c   : > { %s2881_s15 = sadd.s32 4294967294, %s3888_s30   ;;  %s4056_s18 = sadd.s32 1, %s3888_s30  }
  0x5d   : > { %s31_s26 = ssub.s32 %s3888_s30, %s4056_s18  ;;  %s34_s17 = sadd.s32 1, %s3884_s29 }
  0x5e   : > { %p32_p4 = scmp.eq.s32.totalorder %s31_s26, 0  ;;  %p41_p7 = scmp.ne.s32.totalorder %s3884_s29, %s3880_s28 }
  0x5f   : > { %p42_p13 = scmp.eq.s32.totalorder %s3888_s30, 0  ;;  %p47_p0 = scmp.ne.s32.totalorder %s3880_s28, %s3876_s27 }
  0x60   : > { %s4067_s9 = scalar_select %p32_p4, %s3884_s29, %s34_s17  }
  0x61   : > { %p4069_p2 = por %p42_p13, %p41_p7  ;;  %p4075_p6 = por %p4468_p1, %p47_p0 }
  0x62   : > { %p218_p5 = scmp.eq.s32.totalorder %s3973_s11, 1  ;;  %p224_p9 = scmp.eq.s32.totalorder %s2881_s15, 1 }
  0x63   : > { %s4480_s10 = scalar_select %p4075_p6, 1, 0 }
  0x64   : > { %p3325_p8 = scmp.lt.s32.totalorder %s3888_s30, 2  ;;  %s325_s13 = sand.u32 1, %s3884_s29  }
  0x65   : > { %p4082_p10 = por %p218_p5, %p41_p7  ;;  %p4086_p12 = por %p224_p9, %p47_p0 }
  0x66   : > { %s2890_s22 = sshll.u32 %s325_s13, 7  ;;  %s3086_s23 = sshll.u32 %s3888_s30, 11 }
  0x67   : > { %s4481_s16 = scalar_select %p4082_p10, 1, 0 }
  0x68   : > { %s4482_s19 = scalar_select %p4086_p12, 1, 0 }
  0x69   : > { %s4094_s25 = scalar_lea.hbm %s4457_s0, %s3086_s23  ;;  %s329_s15 = scalar_lea.vmem [#allocation2], %s2890_s22 }
  0x6a   : > { %s336_s26 = sshll.u32 %s329_s15, 4  ;;  %p4100_p11 = pnand %p3325_p8, %p4069_p2  ;;  %s4096_s26 = int_to_ptr.vmem [resolvable:$true] %s336_s26 }
  0x6b   : > { %s4104_s21 = scalar_lea.sflag [#allocation3], %s325_s13  ;;  %s3784_s1 = scalar_lea.hbm %s4094_s25, 2048 }
  0x6c   : > { %p3785_p4 = scmp.ne.s32.totalorder %s4094_s25, %s3784_s1  ;;  %p3786_p7 = pneg %p4100_p11 }
  0x6d   : > { %s3789_s22 = scalar_lea.hbm %s4457_s0, 4096  ;;  %p3790_p2 = scmp.lt.s32.totalorder %s4094_s25, %s4457_s0 }
  0x6e   : > { %p3787_p13 = pnand %p3786_p7, %p3785_p4  ;;  %p3791_p5 = scmp.lt.s32.totalorder %s3789_s22, %s3784_s1 }
  0x70   : > { %p3788_p0 = pneg %p3787_p13  ;;  %p3792_p9 = por %p3791_p5, %p3790_p2 }
  0x72   : > { %p3793_p8 = pnand %p3792_p9, %p3788_p0 }
  0x74   : > { %3796 = shalt.err (!%p3793_p8)
}
  0x75   : > { %s3797_s14 = scalar_lea.vmem %s4096_s26, 2048  ;;  %s3902_s13 = smov [#allocation2]  }
  0x76   : > { %p3798_p1 = scmp.ne.s32.totalorder %s4096_s26, %s3797_s14  ;;  %s3802_s2 = sshll.u32 %s3902_s13, 4  ;;  %s3803_s2 = int_to_ptr.vmem [resolvable:$false] %s3802_s2 }
  0x77   : > { %s3804_s23 = scalar_lea.vmem %s3803_s2, 4096  ;;  %p3805_p13 = scmp.lt.s32.totalorder %s4096_s26, %s3803_s2 }
  0x78   : > { %p3800_p12 = pnand %p3798_p1, %p3786_p7  ;;  %p3806_p10 = scmp.lt.s32.totalorder %s3804_s23, %s3797_s14 }
  0x7a   : > { %p3801_p4 = pneg %p3800_p12  ;;  %p3807_p6 = por %p3806_p10, %p3805_p13 }
  0x7c   : > { %p3808_p3 = pnand %p3807_p6, %p3801_p4 }
  0x7e   : > { %3811 = shalt.err (!%p3808_p3)
}
  0x7f   : > { %s4484_s1 = smov 8   ;;  %s4485_s24 = smov 128  }
  0x80   : > { %3314 = dma.hbm_to_vmem [thread:$0]  (!%p4100_p11), %s4094_s25, 2048, %s4096_s26, %s4104_s21, %s4485_s24, %s4485_s24, %s4484_s1  }
  0x81   : > { %p4486_p1 = scmp.ne.s32.totalorder %s4474_s12, 0 }
  0x82   : > { %s4131_s22 = sand.u32 (!%p4486_p1), 1, %s3880_s28   ;;  %p4487_p3 = scmp.ne.s32.totalorder (!%p4486_p1), %s4480_s10, 0 }
  0x83   : > { %348 = sbr.rel (%p4486_p1) target bundleno = 1483 (0x5cb), region = 52  ;;  %s2894_s2 = sshll.u32 (!%p4486_p1), %s4131_s22, 7 }
  0x84   : > { %s351_s20 = scalar_lea.sflag (!%p4486_p1), [#allocation3], %s4131_s22  ;;  %s4137_s17 = scalar_lea.vmem (!%p4486_p1), [#allocation2], %s2894_s2 }
  0x88   : > { %3855 = dma.done.wait (%p4487_p3), %s351_s20, 2048  }
  0x89   : > { %3857 = vsyncadd (%p4487_p3), %s351_s20, 4294965248  ;;  %p4488_p6 = scmp.eq.s32.totalorder %s3973_s11, 0 }
  0x8b   : > { %3859 = dma.done.wait (%p4488_p6), [#allocation6], 10240   ;;  %p4489_p10 = pmov %p4488_p6 }
  0x8c   : > { %p4490_p12 = pmov %p4488_p6 }
  0x8d   : > { %3861 = vsyncadd (%p4489_p10), [#allocation6], 4294957056 }
  0x8e   : > { %3863 = dma.done.wait (%p4490_p12), [#allocation9], 10240   ;;  %p4491_p11 = pmov %p4488_p6 }
  0x8f   : > { %p4492_p7 = pmov %p4488_p6 }
  0x90   : > { %3865 = vsyncadd (%p4491_p11), [#allocation9], 4294957056 }
  0x91   : > { %3867 = dma.done.wait (%p4492_p7), [#allocation12], 2048   ;;  %p4493_p0 = pmov %p4488_p6 }
  0x92   : > { %v3903_v0 = vmov 0   ;;  %v3380_v1 = vld [vmem:[#allocation5 + $0x74] ss:$8 sps:$4 sm:$0xff]   ;;  %v3382_v2 = vld [vmem:[#allocation5 + $0x70] ss:$8 sps:$4 sm:$0xff]   ;;  %v414_v24 = vld [vmem:[%s4137_s17] sm:$0xff] }
  0x93   : > { %3869 = vsyncadd (%p4493_p0), [#allocation12], 4294965248  ;;  %578 = vmatprep.mubr.bf16.mxu0 %v3903_v0  ;;  %546 = vmatprep.subr.bf16.mxu0 %v3380_v1  ;;  %v3383_v3 = vld [vmem:[#allocation5 + $0x64] ss:$8 sps:$4 sm:$0xff]   ;;  %v3385_v4 = vld [vmem:[#allocation5 + $0x60] ss:$8 sps:$4 sm:$0xff]  }
  0x94   : > { %547 = vmatpush1.bf16.msra.mxu0 %v3382_v2  ;;  %v3386_v5 = vld [vmem:[#allocation5 + $0x54] ss:$8 sps:$4 sm:$0xff]   ;;  %v3388_v6 = vld [vmem:[#allocation5 + $0x50] ss:$8 sps:$4 sm:$0xff]   ;;  %v3389_v7 = vld [vmem:[#allocation5 + $0x44] ss:$8 sps:$4 sm:$0xff]  }
  0x95   : > { %548 = vmatprep.subr.bf16.mxu0 %v3383_v3  ;;  %v3391_v8 = vld [vmem:[#allocation5 + $0x40] ss:$8 sps:$4 sm:$0xff]   ;;  %v3392_v9 = vld [vmem:[#allocation5 + $0x34] ss:$8 sps:$4 sm:$0xff]   ;;  %v3394_v10 = vld [vmem:[#allocation5 + $0x30] ss:$8 sps:$4 sm:$0xff]  }
  0x96   : > { %v3395_v11 = vld [vmem:[#allocation5 + $0x24] ss:$8 sps:$4 sm:$0xff]   ;;  %v3397_v13 = vld [vmem:[#allocation5 + $0x20] ss:$8 sps:$4 sm:$0xff]   ;;  %v3398_v16 = vld [vmem:[#allocation5 + $0x14] ss:$8 sps:$4 sm:$0xff]  }
  0x97   : > { %v3404_v12 = vld [vmem:[#allocation7 + $0xe4] ss:$16 sps:$4 sm:$0xff]   ;;  %v3409_v14 = vld [vmem:[#allocation7 + $0xe0] ss:$16 sps:$4 sm:$0xff]   ;;  %v415_v25 = vld [vmem:[%s4137_s17 + $0x8] sm:$0xff]  ;;  %s2738_s26 = scalar_lea.sflag [#allocation4], %s4131_s22 }
  0x98   : > { %549 = vmatpush1.bf16.msra.mxu0 %v3385_v4  ;;  %1113 = vmatprep.subr.bf16.mxu1 %v3404_v12  ;;  %v3410_v15 = vld [vmem:[#allocation7 + $0xc4] ss:$16 sps:$4 sm:$0xff]   ;;  %v3415_v17 = vld [vmem:[#allocation7 + $0xc0] ss:$16 sps:$4 sm:$0xff]   ;;  %v3408_v26 = vld [vmem:[#allocation7 + $0xec] ss:$16 sps:$4 sm:$0xff]   ;;  %v431_v29 = vpack.c.bf16 %v415_v25, %v414_v24 }
  0x99   : > { %550 = vmatprep.subr.bf16.mxu0 %v3386_v5  ;;  %1114 = vmatpush1.bf16.msra.mxu1 %v3409_v14  ;;  %v3416_v18 = vld [vmem:[#allocation7 + $0xa4] ss:$16 sps:$4 sm:$0xff]   ;;  %v3400_v19 = vld [vmem:[#allocation5 + $0x10] ss:$8 sps:$4 sm:$0xff]   ;;  %v3403_v23 = vld [vmem:[#allocation5] ss:$8 sps:$4 sm:$0xff]  }
  0x9a   : > { %1115 = vmatprep.subr.bf16.mxu1 %v3410_v15  ;;  %v3401_v20 = vld [vmem:[#allocation5 + $0x4] ss:$8 sps:$4 sm:$0xff]   ;;  %v3421_v21 = vld [vmem:[#allocation7 + $0xa0] ss:$16 sps:$4 sm:$0xff]   ;;  %v3406_v30 = vld [vmem:[#allocation7 + $0xe8] ss:$16 sps:$4 sm:$0xff]  }
  0x9b   : > { %v3422_v22 = vld [vmem:[#allocation7 + $0x84] ss:$16 sps:$4 sm:$0xff]   ;;  %v3427_v27 = vld [vmem:[#allocation7 + $0x80] ss:$16 sps:$4 sm:$0xff]   ;;  %v3414_v31 = vld [vmem:[#allocation7 + $0xcc] ss:$16 sps:$4 sm:$0xff]  }
  0x9c   : > { %551 = vmatpush1.bf16.msra.mxu0 %v3388_v6  ;;  %v3428_v28 = vld [vmem:[#allocation7 + $0x64] ss:$16 sps:$4 sm:$0xff]   ;;  %v3433_v32 = vld [vmem:[#allocation7 + $0x60] ss:$16 sps:$4 sm:$0xff]   ;;  %v417_v35 = vld [vmem:[%s4137_s17 + $0x18] sm:$0xff]  ;;  %p4494_p5 = scmp.ne.s32.totalorder %s4481_s16, 0 }
  0x9d   : > { %552 = vmatprep.subr.bf16.mxu0 %v3389_v7  ;;  %1116 = vmatpush1.bf16.msra.mxu1 %v3415_v17  ;;  %v3434_v33 = vld [vmem:[#allocation7 + $0x44] ss:$16 sps:$4 sm:$0xff]   ;;  %v3412_v36 = vld [vmem:[#allocation7 + $0xc8] ss:$16 sps:$4 sm:$0xff]   ;;  %v3420_v37 = vld [vmem:[#allocation7 + $0xac] ss:$16 sps:$4 sm:$0xff]  }
  0x9e   : > { %1117 = vmatprep.subr.bf16.mxu1 %v3416_v18  ;;  %v416_v34 = vld [vmem:[%s4137_s17 + $0x10] sm:$0xff]  ;;  %v3418_v41 = vld [vmem:[#allocation7 + $0xa8] ss:$16 sps:$4 sm:$0xff]   ;;  %v3426_v42 = vld [vmem:[#allocation7 + $0x8c] ss:$16 sps:$4 sm:$0xff]   ;;  %s3904_s15 = smov [#allocation14]  }
  0x9f   : > { %v3439_v38 = vld [vmem:[#allocation7 + $0x40] ss:$16 sps:$4 sm:$0xff]   ;;  %v3440_v39 = vld [vmem:[#allocation7 + $0x24] ss:$16 sps:$4 sm:$0xff]   ;;  %v432_v40 = vpack.c.bf16 %v417_v35, %v416_v34  ;;  %v419_v46 = vld [vmem:[%s4137_s17 + $0x28] sm:$0xff]  ;;  %s3816_s14 = sshll.u32 %s3904_s15, 4  ;;  %s3817_s14 = int_to_ptr.vmem [resolvable:$false] %s3816_s14 }
  0xa0   : > { %553 = vmatpush1.bf16.msra.mxu0 %v3391_v8  ;;  %v3445_v43 = vld [vmem:[#allocation7 + $0x20] ss:$16 sps:$4 sm:$0xff]   ;;  %v3446_v44 = vld [vmem:[#allocation7 + $0x4] ss:$16 sps:$4 sm:$0xff]   ;;  %v3424_v47 = vld [vmem:[#allocation7 + $0x88] ss:$16 sps:$4 sm:$0xff]  }
  0xa1   : > { %554 = vmatprep.subr.bf16.mxu0 %v3392_v9  ;;  %1118 = vmatpush1.bf16.msra.mxu1 %v3421_v21  ;;  %v418_v45 = vld [vmem:[%s4137_s17 + $0x20] sm:$0xff]  ;;  %v3432_v48 = vld [vmem:[#allocation7 + $0x6c] ss:$16 sps:$4 sm:$0xff]   ;;  %v3430_v52 = vld [vmem:[#allocation7 + $0x68] ss:$16 sps:$4 sm:$0xff]   ;;  %s3818_s13 = scalar_lea.vmem %s3817_s14, 4096 }
  0xa2   : > { %1119 = vmatprep.subr.bf16.mxu1 %v3422_v22  ;;  %v3451_v49 = vld [vmem:[#allocation7] ss:$16 sps:$4 sm:$0xff]   ;;  %v3452_v50 = vld [vmem:[#allocation7 + $0x1e4] ss:$16 sps:$4 sm:$0xff]   ;;  %v433_v51 = vpack.c.bf16 %v419_v46, %v418_v45  ;;  %v3438_v53 = vld [vmem:[#allocation7 + $0x4c] ss:$16 sps:$4 sm:$0xff]  }
  0xa3   : > { %v3457_v54 = vld [vmem:[#allocation7 + $0x1e0] ss:$16 sps:$4 sm:$0xff]   ;;  %v421_v56 = vld [vmem:[%s4137_s17 + $0x38] sm:$0xff]  ;;  %v3458_v57 = vld [vmem:[#allocation7 + $0x1c4] ss:$16 sps:$4 sm:$0xff]  }
  0xa4   : > { %555 = vmatpush1.bf16.msra.mxu0 %v3394_v10  ;;  %v420_v55 = vld [vmem:[%s4137_s17 + $0x30] sm:$0xff]  ;;  %v3436_v58 = vld [vmem:[#allocation7 + $0x48] ss:$16 sps:$4 sm:$0xff]   ;;  %v3444_v59 = vld [vmem:[#allocation7 + $0x2c] ss:$16 sps:$4 sm:$0xff]  }
  0xa5   : > { %556 = vmatprep.subr.bf16.mxu0 %v3395_v11  ;;  %1120 = vmatpush1.bf16.msra.mxu1 %v3427_v27  ;;  %v3463_v60 = vld [vmem:[#allocation7 + $0x1c0] ss:$16 sps:$4 sm:$0xff]   ;;  %v3464_v61 = vld [vmem:[#allocation7 + $0x1a4] ss:$16 sps:$4 sm:$0xff]   ;;  %v3442_v62 = vld [vmem:[#allocation7 + $0x28] ss:$16 sps:$4 sm:$0xff]   ;;  %v434_v63 = vpack.c.bf16 %v421_v56, %v420_v55 }
  0xa6   : > { %1121 = vmatprep.subr.bf16.mxu1 %v3428_v28  ;;  %v3450_v1 = vld [vmem:[#allocation7 + $0xc] ss:$16 sps:$4 sm:$0xff]   ;;  %v3469_v2 = vld [vmem:[#allocation7 + $0x1a0] ss:$16 sps:$4 sm:$0xff]   ;;  %v3470_v3 = vld [vmem:[#allocation7 + $0x184] ss:$16 sps:$4 sm:$0xff]  }
  0xa7   : > { %v422_v4 = vld [vmem:[%s4137_s17 + $0x40] sm:$0xff]  ;;  %v423_v5 = vld [vmem:[%s4137_s17 + $0x48] sm:$0xff]  ;;  %v424_v14 = vld [vmem:[%s4137_s17 + $0x50] sm:$0xff] }
  0xa8   : > { %557 = vmatpush1.bf16.msra.mxu0 %v3397_v13  ;;  %v3448_v6 = vld [vmem:[#allocation7 + $0x8] ss:$16 sps:$4 sm:$0xff]   ;;  %v3456_v7 = vld [vmem:[#allocation7 + $0x1ec] ss:$16 sps:$4 sm:$0xff]   ;;  %v3475_v8 = vld [vmem:[#allocation7 + $0x180] ss:$16 sps:$4 sm:$0xff]   ;;  %v435_v11 = vpack.c.bf16 %v423_v5, %v422_v4 }
  0xa9   : > { %558 = vmatprep.subr.bf16.mxu0 %v3398_v16  ;;  %1122 = vmatpush1.bf16.msra.mxu1 %v3433_v32  ;;  %v3476_v9 = vld [vmem:[#allocation7 + $0x164] ss:$16 sps:$4 sm:$0xff]   ;;  %v3454_v10 = vld [vmem:[#allocation7 + $0x1e8] ss:$16 sps:$4 sm:$0xff]   ;;  %v3462_v12 = vld [vmem:[#allocation7 + $0x1cc] ss:$16 sps:$4 sm:$0xff]  }
  0xaa   : > { %1123 = vmatprep.subr.bf16.mxu1 %v3434_v33  ;;  %v3481_v13 = vld [vmem:[#allocation7 + $0x160] ss:$16 sps:$4 sm:$0xff]   ;;  %v425_v15 = vld [vmem:[%s4137_s17 + $0x58] sm:$0xff]  ;;  %v427_v22 = vld [vmem:[%s4137_s17 + $0x68] sm:$0xff] }
  0xab   : > { %v3460_v16 = vld [vmem:[#allocation7 + $0x1c8] ss:$16 sps:$4 sm:$0xff]   ;;  %v3468_v17 = vld [vmem:[#allocation7 + $0x1ac] ss:$16 sps:$4 sm:$0xff]   ;;  %v426_v21 = vld [vmem:[%s4137_s17 + $0x60] sm:$0xff] }
  0xac   : > { %559 = vmatpush1.bf16.msra.mxu0 %v3400_v19  ;;  %v3466_v18 = vld [vmem:[#allocation7 + $0x1a8] ss:$16 sps:$4 sm:$0xff]   ;;  %v436_v19 = vpack.c.bf16 %v425_v15, %v424_v14  ;;  %v3480_v24 = vld [vmem:[#allocation7 + $0x16c] ss:$16 sps:$4 sm:$0xff]   ;;  %v428_v27 = vld [vmem:[%s4137_s17 + $0x70] sm:$0xff] }
  0xad   : > { %560 = vmatprep.subr.bf16.mxu0 %v3401_v20  ;;  %1124 = vmatpush1.bf16.msra.mxu1 %v3439_v38  ;;  %v3474_v20 = vld [vmem:[#allocation7 + $0x18c] ss:$16 sps:$4 sm:$0xff]   ;;  %v3478_v25 = vld [vmem:[#allocation7 + $0x168] ss:$16 sps:$4 sm:$0xff]   ;;  %v3487_v33 = vld [vmem:[#allocation7 + $0x140] ss:$16 sps:$4 sm:$0xff]  }
  0xae   : > { %1125 = vmatprep.subr.bf16.mxu1 %v3440_v39  ;;  %v429_v28 = vld [vmem:[%s4137_s17 + $0x78] sm:$0xff]  ;;  %v3488_v34 = vld [vmem:[#allocation7 + $0x124] ss:$16 sps:$4 sm:$0xff]   ;;  %v3509_v14 = vld [vmem:[#allocation8 + $0x160] ss:$8 sps:$4 sm:$0xff]   ;;  %s4389_s17 = scalar_lea.vmem [#allocation14], %s2894_s2 }
  0xaf   : > { %v3484_v32 = vld [vmem:[#allocation7 + $0x148] ss:$16 sps:$4 sm:$0xff]   ;;  %v3492_v35 = vld [vmem:[#allocation7 + $0x12c] ss:$16 sps:$4 sm:$0xff]   ;;  %s3087_s2 = sshll.u32 %s3973_s11, 11  ;;  %s2751_s12 = sshll.u32 %s4389_s17, 4  ;;  %s4412_s12 = int_to_ptr.vmem [resolvable:$true] %s2751_s12 }
  0xb0   : > { %561 = vmatpush1.bf16.msra.mxu0 %v3403_v23  ;;  %v3472_v23 = vld [vmem:[#allocation7 + $0x188] ss:$16 sps:$4 sm:$0xff]   ;;  %v3498_v38 = vld [vmem:[#allocation7 + $0x10c] ss:$16 sps:$4 sm:$0xff]   ;;  %s4410_s25 = scalar_lea.hbm %s4465_s8, %s3087_s2  ;;  %s3812_s11 = scalar_lea.vmem %s4412_s12, 2048 }
  0xb1   : > { %1226 = vmatprep.subr.bf16.mxu0 %v3408_v26  ;;  %1126 = vmatpush1.bf16.msra.mxu1 %v3445_v43  ;;  %v437_v26 = vpack.c.bf16 %v427_v22, %v426_v21  ;;  %v3496_v39 = vld [vmem:[#allocation7 + $0x108] ss:$16 sps:$4 sm:$0xff]   ;;  %v456_v43 = vlaneseq  ;;  %p3813_p2 = scmp.ne.s32.totalorder %s4412_s12, %s3812_s11  ;;  %p3819_p4 = scmp.lt.s32.totalorder %s4412_s12, %s3817_s14 }
  0xb2   : > { %1127 = vmatprep.subr.bf16.mxu1 %v3446_v44  ;;  %p3820_p13 = scmp.lt.s32.totalorder %s3818_s13, %s3812_s11 }
  0xb3   : > { %579 = vmatmul.mubr.bf16.vlgmr.msra.gmra.mxu0 %v431_v29  ;;  %v438_v29 = vpack.c.bf16 %v429_v28, %v428_v27  ;;  %v4179_v44 = vshrl.u32 %v456_v43, 7  ;;  %v3520_v28 = vld [vmem:[#allocation8 + $0x44] ss:$8 sps:$4 sm:$0xff]   ;;  %p3814_p9 = pnand %p3813_p2, %p4494_p5 }
  0xb4   : > { %588 = vmatprep.mubr.bf16.mxu0 %v3903_v0  ;;  %1227 = vmatpush1.bf16.msra.mxu0 %v3406_v30  ;;  %v3482_v30 = vld [vmem:[#allocation7 + $0x144] ss:$16 sps:$4 sm:$0xff]   ;;  %p3821_p1 = por %p3820_p13, %p3819_p4 }
  0xb5   : > { %1228 = vmatprep.subr.bf16.mxu0 %v3414_v31  ;;  %1128 = vmatpush1.bf16.msra.mxu1 %v3451_v49  ;;  %v3486_v31 = vld [vmem:[#allocation7 + $0x14c] ss:$16 sps:$4 sm:$0xff]   ;;  %v4182_v45 = vsub.s32 1, %v4179_v44  ;;  %v4185_v46 = vsub.s32 0, %v4179_v44  ;;  %p3815_p8 = pneg %p3814_p9 }
  0xb6   : > { %1129 = vmatprep.subr.bf16.mxu1 %v3452_v50 }
  0xb7   : > { %p3822_p3 = pnand %p3821_p1, %p3815_p8 }
  0xb8   : > { %1229 = vmatpush1.bf16.msra.mxu0 %v3412_v36  ;;  %v3490_v36 = vld [vmem:[#allocation7 + $0x128] ss:$16 sps:$4 sm:$0xff]  }
  0xb9   : > { %1230 = vmatprep.subr.bf16.mxu0 %v3420_v37  ;;  %1130 = vmatpush2.bf16.msra.mxu1 %v3457_v54  ;;  %v3493_v37 = vld [vmem:[#allocation7 + $0x120] ss:$16 sps:$4 sm:$0xff]  }
  0xba   : > { %1131 = vmatprep.subr.bf16.mxu1 %v3458_v57 }
  0xbb   : > { %589 = vmatmul.mubr.bf16.gmra.mxu0 %v432_v40  ;;  %v3499_v40 = vld [vmem:[#allocation7 + $0x100] ss:$16 sps:$4 sm:$0xff]  }
  0xbc   : > { %598 = vmatprep.mubr.bf16.mxu0 %v3903_v0  ;;  %1231 = vmatpush1.bf16.msra.mxu0 %v3418_v41  ;;  %v3502_v41 = vld [vmem:[#allocation8 + $0x74] ss:$8 sps:$4 sm:$0xff]  }
  0xbd   : > { %1232 = vmatprep.subr.bf16.mxu0 %v3426_v42  ;;  %1132 = vmatpush2.bf16.msra.mxu1 %v3463_v60  ;;  %v3505_v42 = vld [vmem:[#allocation8 + $0x174] ss:$8 sps:$4 sm:$0xff]  }
  0xbe   : > { %1133 = vmatprep.subr.bf16.mxu1 %v3464_v61 }
  0xc0   : > { %1233 = vmatpush1.bf16.msra.mxu0 %v3424_v47  ;;  %v430_v47 = vld [vmem:[%s4464_s7] sm:$0x3] }
  0xc1   : > { %1234 = vmatprep.subr.bf16.mxu0 %v3432_v48  ;;  %1134 = vmatpush2.bf16.msra.mxu1 %v3469_v2  ;;  %v4191_v49 = vrot.slane %v430_v47, %v4182_v45  ;;  %v4194_v50 = vrot.slane %v430_v47, %v4185_v46  ;;  %v3500_v2 = vld [vmem:[#allocation8 + $0x70] ss:$8 sps:$4 sm:$0xff]  }
  0xc2   : > { %1135 = vmatprep.subr.bf16.mxu1 %v3470_v3  ;;  %v3503_v3 = vld [vmem:[#allocation8 + $0x170] ss:$8 sps:$4 sm:$0xff]  }
  0xc3   : > { %599 = vmatmul.mubr.bf16.gmra.mxu0 %v433_v51 }
  0xc4   : > { %608 = vmatprep.mubr.bf16.mxu0 %v3903_v0  ;;  %1235 = vmatpush1.bf16.msra.mxu0 %v3430_v52 }
  0xc5   : > { %1236 = vmatprep.subr.bf16.mxu0 %v3438_v53  ;;  %1136 = vmatpush2.bf16.msra.mxu1 %v3475_v8 }
  0xc6   : > { %1137 = vmatprep.subr.bf16.mxu1 %v3476_v9 }
  0xc8   : > { %1237 = vmatpush1.bf16.msra.mxu0 %v3436_v58 }
  0xc9   : > { %1238 = vmatprep.subr.bf16.mxu0 %v3444_v59  ;;  %1138 = vmatpush2.bf16.msra.mxu1 %v3481_v13  ;;  %v3506_v13 = vld [vmem:[#allocation8 + $0x60] ss:$8 sps:$4 sm:$0xff]  }
  0xca   : > { %1139 = vmatprep.subr.bf16.mxu1 %v3482_v30 }
  0xcb   : > { %609 = vmatmul.mubr.bf16.gmra.mxu0 %v434_v63 }
  0xcc   : > { %618 = vmatprep.mubr.bf16.mxu0 %v3903_v0  ;;  %1239 = vmatpush1.bf16.msra.mxu0 %v3442_v62 }
  0xcd   : > { %1240 = vmatprep.subr.bf16.mxu0 %v3450_v1  ;;  %1140 = vmatpush2.bf16.msra.mxu1 %v3487_v33 }
  0xce   : > { %1141 = vmatprep.subr.bf16.mxu1 %v3488_v34 }
  0xd0   : > { %1241 = vmatpush1.bf16.msra.mxu0 %v3448_v6  ;;  %v3508_v6 = vld [vmem:[#allocation8 + $0x64] ss:$8 sps:$4 sm:$0xff]  }
  0xd1   : > { %1242 = vmatprep.subr.bf16.mxu0 %v3456_v7  ;;  %1142 = vmatpush2.bf16.msra.mxu1 %v3493_v37  ;;  %v3511_v7 = vld [vmem:[#allocation8 + $0x164] ss:$8 sps:$4 sm:$0xff]  }
  0xd3   : > { %619 = vmatmul.mubr.bf16.gmra.mxu0 %v435_v11 }
  0xd4   : > { %628 = vmatprep.mubr.bf16.mxu0 %v3903_v0  ;;  %1243 = vmatpush2.bf16.msra.mxu0 %v3454_v10 }
  0xd5   : > { %1244 = vmatprep.subr.bf16.mxu0 %v3462_v12 }
  0xd8   : > { %1245 = vmatpush2.bf16.msra.mxu0 %v3460_v16 }
  0xd9   : > { %1246 = vmatprep.subr.bf16.mxu0 %v3468_v17  ;;  %v3514_v17 = vld [vmem:[#allocation8 + $0x54] ss:$8 sps:$4 sm:$0xff]  }
  0xdb   : > { %629 = vmatmul.mubr.bf16.gmra.mxu0 %v436_v19 }
  0xdc   : > { %638 = vmatprep.mubr.bf16.mxu0 %v3903_v0  ;;  %1247 = vmatpush2.bf16.msra.mxu0 %v3466_v18  ;;  %v3517_v18 = vld [vmem:[#allocation8 + $0x154] ss:$8 sps:$4 sm:$0xff]  }
  0xdd   : > { %1248 = vmatprep.subr.bf16.mxu0 %v3474_v20 }
  0xe0   : > { %1249 = vmatpush2.bf16.msra.mxu0 %v3472_v23 }
  0xe1   : > { %1250 = vmatprep.subr.bf16.mxu0 %v3480_v24  ;;  %v3512_v24 = vld [vmem:[#allocation8 + $0x50] ss:$8 sps:$4 sm:$0xff]  }
  0xe3   : > { %639 = vmatmul.mubr.bf16.gmra.mxu0 %v437_v26 }
  0xe4   : > { %648 = vmatprep.mubr.bf16.mxu0 %v3903_v0  ;;  %1251 = vmatpush2.bf16.msra.mxu0 %v3478_v25  ;;  %v3494_v0 = vld [vmem:[#allocation7 + $0x104] ss:$16 sps:$4 sm:$0xff]   ;;  %v3515_v25 = vld [vmem:[#allocation8 + $0x150] ss:$8 sps:$4 sm:$0xff]  }
  0xe5   : > { %1252 = vmatprep.subr.bf16.mxu0 %v3486_v31  ;;  %1143 = vmatprep.subr.bf16.mxu1 %v3494_v0 }
  0xe6   : > { %1144 = vmatpush2.bf16.msra.mxu1 %v3499_v40 }
  0xe7   : > { %1831 = vmatprep.subr.bf16.mxu1 %v3502_v41 }
  0xe8   : > { %1253 = vmatpush2.bf16.msra.mxu0 %v3484_v32 }
  0xe9   : > { %1254 = vmatprep.subr.bf16.mxu0 %v3492_v35  ;;  %v3518_v35 = vld [vmem:[#allocation8 + $0x40] ss:$8 sps:$4 sm:$0xff]  }
  0xeb   : > { %649 = vmatmul.mubr.bf16.gmra.mxu0 %v438_v29  ;;  %v3523_v29 = vld [vmem:[#allocation8 + $0x144] ss:$8 sps:$4 sm:$0xff]  }
  0xec   : > { %1255 = vmatpush2.bf16.msra.mxu0 %v3490_v36  ;;  %v3521_v36 = vld [vmem:[#allocation8 + $0x140] ss:$8 sps:$4 sm:$0xff]  }
  0xed   : > { %1256 = vmatprep.subr.bf16.mxu0 %v3498_v38  ;;  %v3526_v38 = vld [vmem:[#allocation8 + $0x34] ss:$8 sps:$4 sm:$0xff]  }
  0xf0   : > { %1257 = vmatpush2.bf16.msra.mxu0 %v3496_v39  ;;  %v3529_v39 = vld [vmem:[#allocation8 + $0x134] ss:$8 sps:$4 sm:$0xff]  }
  0xf1   : > { %1944 = vmatprep.subr.bf16.mxu0 %v3505_v42 }
 0x173   : > { %v580_v48 = vpop.f32.mrf.mxu0 }
 0x174   : > { %v581_v55 = vadd.f32 %v580_v48, %v4194_v50  ;;  %v3524_v48 = vld [vmem:[#allocation8 + $0x30] ss:$8 sps:$4 sm:$0xff]  }
 0x175   : > { %v582_v51 = vpop.f32.mrf.mxu0 }
 0x176   : > { %v583_v53 = vadd.f32 %v582_v51, %v4191_v49  ;;  %v659_v62 = vmax.f32 %v581_v55, 0.0  ;;  %v3527_v51 = vld [vmem:[#allocation8 + $0x130] ss:$8 sps:$4 sm:$0xff]   ;;  %v3535_v55 = vld [vmem:[#allocation8 + $0x124] ss:$8 sps:$4 sm:$0xff]  }
 0x177   : > { %v584_v52 = vpop.f32.mrf.mxu0 }
 0x178   : > { %v585_v54 = vadd.f32 %v584_v52, %v4194_v50  ;;  %v660_v60 = vmax.f32 %v583_v53, 0.0 }
 0x179   : > { %v586_v56 = vpop.f32.mrf.mxu0 }
 0x17a   : > { %v587_v57 = vadd.f32 %v586_v56, %v4191_v49  ;;  %v661_v58 = vmax.f32 %v585_v54, 0.0  ;;  %v3532_v54 = vld [vmem:[#allocation8 + $0x24] ss:$8 sps:$4 sm:$0xff]  }
 0x17b   : > { %v590_v59 = vpop.f32.mrf.mxu0 }
 0x17c   : > { %v662_v61 = vmax.f32 %v587_v57, 0.0  ;;  %v692_v4 = vpack.c.bf16 %v661_v58, %v659_v62  ;;  %v591_v10 = vadd.f32 %v590_v59, %v4194_v50  ;;  %v3533_v62 = vld [vmem:[#allocation8 + $0x120] ss:$8 sps:$4 sm:$0xff]  }
 0x17d   : > { %v592_v63 = vpop.f32.mrf.mxu0 }
 0x17e   : > { %v693_v1 = vpack.c.bf16 %v662_v61, %v660_v60  ;;  %v593_v8 = vadd.f32 %v592_v63, %v4191_v49  ;;  %v663_v21 = vmax.f32 %v591_v10, 0.0  ;;  %v3530_v61 = vld [vmem:[#allocation8 + $0x20] ss:$8 sps:$4 sm:$0xff]   ;;  %v3539_v10 = vld [vmem:[#allocation8 + $0x110] ss:$8 sps:$4 sm:$0xff]  }
 0x17f   : > { %v594_v5 = vpop.f32.mrf.mxu0 }
 0x180   : > { %v595_v9 = vadd.f32 %v594_v5, %v4194_v50  ;;  %1145 = vmatprep.mubr.bf16.mxu1 %v693_v1  ;;  %1258 = vmatprep.mubr.bf16.mxu0 %v693_v1  ;;  %v664_v19 = vmax.f32 %v593_v8, 0.0 }
 0x181   : > { %v596_v11 = vpop.f32.mrf.mxu0  ;;  %1146 = vmatmul.mubr.bf16.vlgmr.msra.gmra.mxu1 %v692_v4  ;;  %1259 = vmatmul.mubr.bf16.vlgmr.msra.gmra.mxu0 %v692_v4 }
 0x182   : > { %v597_v12 = vadd.f32 %v596_v11, %v4191_v49  ;;  %1832 = vmatpush1.bf16.msra.mxu1 %v3500_v2  ;;  %1945 = vmatpush1.bf16.msra.mxu0 %v3503_v3  ;;  %v665_v15 = vmax.f32 %v595_v9, 0.0  ;;  %v3538_v2 = vld [vmem:[#allocation8 + $0x14] ss:$8 sps:$4 sm:$0xff]   ;;  %v3536_v9 = vld [vmem:[#allocation8 + $0x10] ss:$8 sps:$4 sm:$0xff]  }
 0x183   : > { %v600_v16 = vpop.f32.mrf.mxu0  ;;  %1833 = vmatprep.subr.bf16.mxu1 %v3508_v6  ;;  %1946 = vmatprep.subr.bf16.mxu0 %v3511_v7  ;;  %v3541_v3 = vld [vmem:[#allocation8 + $0x114] ss:$8 sps:$4 sm:$0xff]  }
 0x184   : > { %v666_v20 = vmax.f32 %v597_v12, 0.0  ;;  %v694_v26 = vpack.c.bf16 %v665_v15, %v663_v21  ;;  %v601_v32 = vadd.f32 %v600_v16, %v4194_v50  ;;  %v3545_v21 = vld [vmem:[#allocation8 + $0x100] ss:$8 sps:$4 sm:$0xff]  }
 0x185   : > { %v602_v22 = vpop.f32.mrf.mxu0 }
 0x186   : > { %v695_v23 = vpack.c.bf16 %v666_v20, %v664_v19  ;;  %1834 = vmatpush1.bf16.msra.mxu1 %v3506_v13  ;;  %1947 = vmatpush1.bf16.msra.mxu0 %v3509_v14  ;;  %v603_v30 = vadd.f32 %v602_v22, %v4191_v49  ;;  %v667_v42 = vmax.f32 %v601_v32, 0.0  ;;  %v3544_v13 = vld [vmem:[#allocation8 + $0x4] ss:$8 sps:$4 sm:$0xff]   ;;  %v3542_v20 = vld [vmem:[#allocation8] ss:$8 sps:$4 sm:$0xff]  }
 0x187   : > { %v604_v27 = vpop.f32.mrf.mxu0  ;;  %1835 = vmatprep.subr.bf16.mxu1 %v3514_v17  ;;  %1948 = vmatprep.subr.bf16.mxu0 %v3517_v18  ;;  %v3547_v14 = vld [vmem:[#allocation8 + $0x104] ss:$8 sps:$4 sm:$0xff]   ;;  %v3551_v32 = vld [vmem:[#allocation8 + $0x1f0] ss:$8 sps:$4 sm:$0xff]  }
 0x188   : > { %v605_v31 = vadd.f32 %v604_v27, %v4194_v50  ;;  %1155 = vmatprep.mubr.bf16.mxu1 %v695_v23  ;;  %1268 = vmatprep.mubr.bf16.mxu0 %v695_v23  ;;  %v668_v40 = vmax.f32 %v603_v30, 0.0 }
 0x189   : > { %v606_v33 = vpop.f32.mrf.mxu0  ;;  %1156 = vmatmul.mubr.bf16.gmra.mxu1 %v694_v26  ;;  %1269 = vmatmul.mubr.bf16.gmra.mxu0 %v694_v26 }
 0x18a   : > { %v607_v34 = vadd.f32 %v606_v33, %v4191_v49  ;;  %1836 = vmatpush1.bf16.msra.mxu1 %v3512_v24  ;;  %1949 = vmatpush1.bf16.msra.mxu0 %v3515_v25  ;;  %v669_v37 = vmax.f32 %v605_v31, 0.0  ;;  %v3550_v24 = vld [vmem:[#allocation8 + $0xf4] ss:$8 sps:$4 sm:$0xff]   ;;  %v3548_v31 = vld [vmem:[#allocation8 + $0xf0] ss:$8 sps:$4 sm:$0xff]  }
 0x18b   : > { %v610_v0 = vpop.f32.mrf.mxu0  ;;  %1837 = vmatprep.subr.bf16.mxu1 %v3520_v28  ;;  %1950 = vmatprep.subr.bf16.mxu0 %v3523_v29  ;;  %v3553_v25 = vld [vmem:[#allocation8 + $0x1f4] ss:$8 sps:$4 sm:$0xff]  }
 0x18c   : > { %v670_v41 = vmax.f32 %v607_v34, 0.0  ;;  %v696_v52 = vpack.c.bf16 %v669_v37, %v667_v42  ;;  %v611_v58 = vadd.f32 %v610_v0, %v4194_v50  ;;  %v3557_v42 = vld [vmem:[#allocation8 + $0x1e0] ss:$8 sps:$4 sm:$0xff]  }
 0x18d   : > { %v612_v43 = vpop.f32.mrf.mxu0 }
 0x18e   : > { %v697_v47 = vpack.c.bf16 %v670_v41, %v668_v40  ;;  %1838 = vmatpush1.bf16.msra.mxu1 %v3518_v35  ;;  %1951 = vmatpush1.bf16.msra.mxu0 %v3521_v36  ;;  %v613_v56 = vadd.f32 %v612_v43, %v4191_v49  ;;  %v671_v6 = vmax.f32 %v611_v58, 0.0  ;;  %v3556_v35 = vld [vmem:[#allocation8 + $0xe4] ss:$8 sps:$4 sm:$0xff]   ;;  %v3554_v41 = vld [vmem:[#allocation8 + $0xe0] ss:$8 sps:$4 sm:$0xff]  }
 0x18f   : > { %v614_v53 = vpop.f32.mrf.mxu0  ;;  %1839 = vmatprep.subr.bf16.mxu1 %v3526_v38  ;;  %1952 = vmatprep.subr.bf16.mxu0 %v3529_v39  ;;  %v3559_v36 = vld [vmem:[#allocation8 + $0x1e4] ss:$8 sps:$4 sm:$0xff]   ;;  %v3563_v58 = vld [vmem:[#allocation8 + $0x1d0] ss:$8 sps:$4 sm:$0xff]  }
 0x190   : > { %v615_v57 = vadd.f32 %v614_v53, %v4194_v50  ;;  %1165 = vmatprep.mubr.bf16.mxu1 %v697_v47  ;;  %1278 = vmatprep.mubr.bf16.mxu0 %v697_v47  ;;  %v672_v4 = vmax.f32 %v613_v56, 0.0 }
 0x191   : > { %v616_v59 = vpop.f32.mrf.mxu0  ;;  %1166 = vmatmul.mubr.bf16.gmra.mxu1 %v696_v52  ;;  %1279 = vmatmul.mubr.bf16.gmra.mxu0 %v696_v52 }
 0x192   : > { %v617_v60 = vadd.f32 %v616_v59, %v4191_v49  ;;  %1840 = vmatpush1.bf16.msra.mxu1 %v3524_v48  ;;  %1953 = vmatpush1.bf16.msra.mxu0 %v3527_v51  ;;  %v673_v63 = vmax.f32 %v615_v57, 0.0  ;;  %v3562_v48 = vld [vmem:[#allocation8 + $0xd4] ss:$8 sps:$4 sm:$0xff]   ;;  %v3560_v57 = vld [vmem:[#allocation8 + $0xd0] ss:$8 sps:$4 sm:$0xff]  }
 0x193   : > { %v620_v1 = vpop.f32.mrf.mxu0  ;;  %1841 = vmatprep.subr.bf16.mxu1 %v3532_v54  ;;  %1954 = vmatprep.subr.bf16.mxu0 %v3535_v55  ;;  %v3565_v51 = vld [vmem:[#allocation8 + $0x1d4] ss:$8 sps:$4 sm:$0xff]  }
 0x194   : > { %v674_v5 = vmax.f32 %v617_v60, 0.0  ;;  %v698_v11 = vpack.c.bf16 %v673_v63, %v671_v6  ;;  %v621_v17 = vadd.f32 %v620_v1, %v4194_v50  ;;  %v3569_v6 = vld [vmem:[#allocation8 + $0x1c0] ss:$8 sps:$4 sm:$0xff]  }
 0x195   : > { %v622_v7 = vpop.f32.mrf.mxu0 }
 0x196   : > { %v699_v8 = vpack.c.bf16 %v674_v5, %v672_v4  ;;  %1842 = vmatpush1.bf16.msra.mxu1 %v3530_v61  ;;  %1955 = vmatpush1.bf16.msra.mxu0 %v3533_v62  ;;  %v623_v15 = vadd.f32 %v622_v7, %v4191_v49  ;;  %v675_v28 = vmax.f32 %v621_v17, 0.0  ;;  %v3568_v61 = vld [vmem:[#allocation8 + $0xc4] ss:$8 sps:$4 sm:$0xff]   ;;  %v3566_v5 = vld [vmem:[#allocation8 + $0xc0] ss:$8 sps:$4 sm:$0xff]  }
 0x197   : > { %v624_v12 = vpop.f32.mrf.mxu0  ;;  %1843 = vmatprep.subr.bf16.mxu1 %v3538_v2  ;;  %1956 = vmatprep.subr.bf16.mxu0 %v3541_v3  ;;  %v3571_v62 = vld [vmem:[#allocation8 + $0x1c4] ss:$8 sps:$4 sm:$0xff]   ;;  %v3575_v17 = vld [vmem:[#allocation8 + $0x1b0] ss:$8 sps:$4 sm:$0xff]  }
 0x198   : > { %v625_v16 = vadd.f32 %v624_v12, %v4194_v50  ;;  %1175 = vmatprep.mubr.bf16.mxu1 %v699_v8  ;;  %1288 = vmatprep.mubr.bf16.mxu0 %v699_v8  ;;  %v676_v26 = vmax.f32 %v623_v15, 0.0 }
 0x199   : > { %v626_v18 = vpop.f32.mrf.mxu0  ;;  %1176 = vmatmul.mubr.bf16.gmra.mxu1 %v698_v11  ;;  %1289 = vmatmul.mubr.bf16.gmra.mxu0 %v698_v11 }
 0x19a   : > { %v627_v19 = vadd.f32 %v626_v18, %v4191_v49  ;;  %1844 = vmatpush1.bf16.msra.mxu1 %v3536_v9  ;;  %1957 = vmatpush1.bf16.msra.mxu0 %v3539_v10  ;;  %v677_v22 = vmax.f32 %v625_v16, 0.0  ;;  %v3574_v9 = vld [vmem:[#allocation8 + $0xb4] ss:$8 sps:$4 sm:$0xff]   ;;  %v3572_v16 = vld [vmem:[#allocation8 + $0xb0] ss:$8 sps:$4 sm:$0xff]  }
 0x19b   : > { %v630_v23 = vpop.f32.mrf.mxu0  ;;  %1845 = vmatprep.subr.bf16.mxu1 %v3544_v13  ;;  %1958 = vmatprep.subr.bf16.mxu0 %v3547_v14  ;;  %v3577_v10 = vld [vmem:[#allocation8 + $0x1b4] ss:$8 sps:$4 sm:$0xff]  }
 0x19c   : > { %v678_v27 = vmax.f32 %v627_v19, 0.0  ;;  %v700_v33 = vpack.c.bf16 %v677_v22, %v675_v28  ;;  %v631_v38 = vadd.f32 %v630_v23, %v4194_v50 }
 0x19d   : > { %v632_v29 = vpop.f32.mrf.mxu0 }
 0x19e   : > { %v701_v30 = vpack.c.bf16 %v678_v27, %v676_v26  ;;  %1846 = vmatpush1.bf16.msra.mxu1 %v3542_v20  ;;  %1959 = vmatpush1.bf16.msra.mxu0 %v3545_v21  ;;  %v633_v37 = vadd.f32 %v632_v29, %v4191_v49  ;;  %v679_v54 = vmax.f32 %v631_v38, 0.0  ;;  %v3590_v38 = vld [vmem:[#allocation8 + $0x80] ss:$8 sps:$4 sm:$0xff]  }
 0x19f   : > { %v634_v34 = vpop.f32.mrf.mxu0  ;;  %1847 = vmatprep.subr.bf16.mxu1 %v3550_v24  ;;  %1960 = vmatprep.subr.bf16.mxu0 %v3553_v25 }
 0x1a0   : > { %v635_v0 = vadd.f32 %v634_v34, %v4194_v50  ;;  %1185 = vmatprep.mubr.bf16.mxu1 %v701_v30  ;;  %1298 = vmatprep.mubr.bf16.mxu0 %v701_v30  ;;  %v680_v52 = vmax.f32 %v633_v37, 0.0  ;;  %v3589_v34 = vld [vmem:[#allocation8 + $0x194] ss:$8 sps:$4 sm:$0xff]   ;;  %v3592_v37 = vld [vmem:[#allocation8 + $0x84] ss:$8 sps:$4 sm:$0xff]  }
 0x1a1   : > { %v636_v39 = vpop.f32.mrf.mxu0  ;;  %1186 = vmatmul.mubr.bf16.gmra.mxu1 %v700_v33  ;;  %1299 = vmatmul.mubr.bf16.gmra.mxu0 %v700_v33  ;;  %v3581_v33 = vld [vmem:[#allocation8 + $0x1a0] ss:$8 sps:$4 sm:$0xff]  }
 0x1a2   : > { %v637_v40 = vadd.f32 %v636_v39, %v4191_v49  ;;  %1848 = vmatpush2.bf16.msra.mxu1 %v3548_v31  ;;  %1961 = vmatpush2.bf16.msra.mxu0 %v3551_v32  ;;  %v681_v43 = vmax.f32 %v635_v0, 0.0  ;;  %v3580_v31 = vld [vmem:[#allocation8 + $0xa4] ss:$8 sps:$4 sm:$0xff]   ;;  %v3593_v39 = vld [vmem:[#allocation8 + $0x180] ss:$8 sps:$4 sm:$0xff]  }
 0x1a3   : > { %v640_v47 = vpop.f32.mrf.mxu0  ;;  %1849 = vmatprep.subr.bf16.mxu1 %v3556_v35  ;;  %1962 = vmatprep.subr.bf16.mxu0 %v3559_v36  ;;  %v3583_v32 = vld [vmem:[#allocation8 + $0x1a4] ss:$8 sps:$4 sm:$0xff]   ;;  %v3584_v35 = vld [vmem:[#allocation8 + $0x90] ss:$8 sps:$4 sm:$0xff]  }
 0x1a4   : > { %v682_v53 = vmax.f32 %v637_v40, 0.0  ;;  %v702_v59 = vpack.c.bf16 %v681_v43, %v679_v54  ;;  %v641_v2 = vadd.f32 %v640_v47, %v4194_v50  ;;  %v3587_v36 = vld [vmem:[#allocation8 + $0x190] ss:$8 sps:$4 sm:$0xff]   ;;  %v3595_v0 = vld [vmem:[#allocation8 + $0x184] ss:$8 sps:$4 sm:$0xff]  }
 0x1a5   : > { %v642_v55 = vpop.f32.mrf.mxu0  ;;  %v3596_v40 = vld [vmem:[#allocation10 + $0x78] sm:$0xff]   ;;  %v691_v43 = vld [vmem:[%s4464_s7 + $0x2] sm:$0xf] }
 0x1a6   : > { %v703_v56 = vpack.c.bf16 %v682_v53, %v680_v52  ;;  %1850 = vmatpush2.bf16.msra.mxu1 %v3554_v41  ;;  %1963 = vmatpush2.bf16.msra.mxu0 %v3557_v42  ;;  %v643_v63 = vadd.f32 %v642_v55, %v4191_v49  ;;  %v683_v13 = vmax.f32 %v641_v2, 0.0  ;;  %v787_v41 = vsub.s32 3, %v4179_v44 }
 0x1a7   : > { %v644_v60 = vpop.f32.mrf.mxu0  ;;  %1851 = vmatprep.subr.bf16.mxu1 %v3562_v48  ;;  %1964 = vmatprep.subr.bf16.mxu0 %v3565_v51  ;;  %v783_v42 = vsub.s32 2, %v4179_v44  ;;  %v4234_v51 = vrot.slane %v691_v43, %v4182_v45  ;;  %v4239_v53 = vrot.slane %v691_v43, %v4185_v46 }
 0x1a8   : > { %v645_v1 = vadd.f32 %v644_v60, %v4194_v50  ;;  %1195 = vmatprep.mubr.bf16.mxu1 %v703_v56  ;;  %1308 = vmatprep.mubr.bf16.mxu0 %v703_v56  ;;  %v684_v11 = vmax.f32 %v643_v63, 0.0  ;;  %v4236_v52 = vrot.slane %v691_v43, %v787_v41 }
 0x1a9   : > { %v646_v3 = vpop.f32.mrf.mxu0  ;;  %1196 = vmatmul.mubr.bf16.gmra.mxu1 %v702_v59  ;;  %1309 = vmatmul.mubr.bf16.gmra.mxu0 %v702_v59  ;;  %v4241_v54 = vrot.slane %v691_v43, %v783_v42 }
 0x1aa   : > { %v647_v4 = vadd.f32 %v646_v3, %v4191_v49  ;;  %1852 = vmatpush2.bf16.msra.mxu1 %v3560_v57  ;;  %1965 = vmatpush2.bf16.msra.mxu0 %v3563_v58  ;;  %v685_v7 = vmax.f32 %v645_v1, 0.0 }
 0x1ab   : > { %v650_v8 = vpop.f32.mrf.mxu0  ;;  %1853 = vmatprep.subr.bf16.mxu1 %v3568_v61  ;;  %1966 = vmatprep.subr.bf16.mxu0 %v3571_v62 }
 0x1ac   : > { %v686_v12 = vmax.f32 %v647_v4, 0.0  ;;  %v704_v18 = vpack.c.bf16 %v685_v7, %v683_v13  ;;  %v651_v22 = vadd.f32 %v650_v8, %v4194_v50 }
 0x1ad   : > { %v652_v14 = vpop.f32.mrf.mxu0 }
 0x1ae   : > { %v705_v15 = vpack.c.bf16 %v686_v12, %v684_v11  ;;  %1854 = vmatpush2.bf16.msra.mxu1 %v3566_v5  ;;  %1967 = vmatpush2.bf16.msra.mxu0 %v3569_v6  ;;  %v653_v20 = vadd.f32 %v652_v14, %v4191_v49  ;;  %v687_v28 = vmax.f32 %v651_v22, 0.0 }
 0x1af   : > { %v654_v19 = vpop.f32.mrf.mxu0  ;;  %1855 = vmatprep.subr.bf16.mxu1 %v3574_v9  ;;  %1968 = vmatprep.subr.bf16.mxu0 %v3577_v10 }
 0x1b0   : > { %v655_v21 = vadd.f32 %v654_v19, %v4194_v50  ;;  %1205 = vmatprep.mubr.bf16.mxu1 %v705_v15  ;;  %1318 = vmatprep.mubr.bf16.mxu0 %v705_v15  ;;  %v688_v26 = vmax.f32 %v653_v20, 0.0  ;;  %v3578_v50 = vld [vmem:[#allocation8 + $0xa0] ss:$8 sps:$4 sm:$0xff]   ;;  %v3597_v19 = vld [vmem:[#allocation10 + $0x38] sm:$0xff]  }
 0x1b1   : > { %v656_v23 = vpop.f32.mrf.mxu0  ;;  %1206 = vmatmul.mubr.bf16.gmra.mxu1 %v704_v18  ;;  %1319 = vmatmul.mubr.bf16.gmra.mxu0 %v704_v18 }
 0x1b2   : > { %v657_v24 = vadd.f32 %v656_v23, %v4191_v49  ;;  %1856 = vmatpush2.bf16.msra.mxu1 %v3572_v16  ;;  %1969 = vmatpush2.bf16.msra.mxu0 %v3575_v17  ;;  %v689_v25 = vmax.f32 %v655_v21, 0.0  ;;  %v3586_v49 = vld [vmem:[#allocation8 + $0x94] ss:$8 sps:$4 sm:$0xff]  }
 0x1b3   : > { %1857 = vmatprep.subr.bf16.mxu1 %v3580_v31  ;;  %1970 = vmatprep.subr.bf16.mxu0 %v3583_v32 }
 0x1b4   : > { %v690_v27 = vmax.f32 %v657_v24, 0.0  ;;  %v706_v30 = vpack.c.bf16 %v689_v25, %v687_v28  ;;  %v3598_v25 = vld [vmem:[#allocation10 + $0x70] sm:$0xff]  }
 0x1b6   : > { %v707_v29 = vpack.c.bf16 %v690_v27, %v688_v26  ;;  %1858 = vmatpush2.bf16.msra.mxu1 %v3578_v50  ;;  %1971 = vmatpush2.bf16.msra.mxu0 %v3581_v33 }
 0x1b7   : > { %1859 = vmatprep.subr.bf16.mxu1 %v3586_v49  ;;  %1972 = vmatprep.subr.bf16.mxu0 %v3589_v34  ;;  %v3599_v49 = vld [vmem:[#allocation10 + $0x30] sm:$0xff]  }
 0x1b8   : > { %1215 = vmatprep.mubr.bf16.mxu1 %v707_v29  ;;  %1328 = vmatprep.mubr.bf16.mxu0 %v707_v29 }
 0x1b9   : > { %1216 = vmatmul.mubr.bf16.gmra.mxu1 %v706_v30  ;;  %1329 = vmatmul.mubr.bf16.gmra.mxu0 %v706_v30 }
 0x1ba   : > { %1860 = vmatpush2.bf16.msra.mxu1 %v3584_v35  ;;  %1973 = vmatpush2.bf16.msra.mxu0 %v3587_v36 }
 0x1bb   : > { %1861 = vmatprep.subr.bf16.mxu1 %v3592_v37  ;;  %1974 = vmatprep.subr.bf16.mxu0 %v3595_v0  ;;  %v3600_v0 = vld [vmem:[#allocation10 + $0x68] sm:$0xff]  }
 0x1be   : > { %1862 = vmatpush2.bf16.msra.mxu1 %v3590_v38  ;;  %1975 = vmatpush2.bf16.msra.mxu0 %v3593_v39 }
 0x1bf   : > { %3088 = vmatprep.subr.bf16.mxu1 %v3596_v40 }
 0x241   : > { %v1147_v47 = vpop.f32.mrf.mxu1  ;;  %v1260_v48 = vpop.f32.mrf.mxu0 }
 0x242   : > { %v1148_v62 = vadd.f32 %v1147_v47, %v4239_v53  ;;  %v1261_v63 = vadd.f32 %v1260_v48, %v4241_v54 }
 0x243   : > { %v1149_v55 = vpop.f32.mrf.mxu1  ;;  %v1262_v56 = vpop.f32.mrf.mxu0 }
 0x244   : > { %v1150_v58 = vadd.f32 %v1149_v55, %v4234_v51  ;;  %v1263_v59 = vadd.f32 %v1262_v56, %v4236_v52  ;;  %v1339_v13 = vmax.f32 %v1148_v62, 0.0  ;;  %v1341_v14 = vmax.f32 %v1261_v63, 0.0  ;;  %v3602_v62 = vld [vmem:[#allocation10 + $0x60] sm:$0xff]  }
 0x245   : > { %v1151_v57 = vpop.f32.mrf.mxu1  ;;  %v1264_v44 = vpop.f32.mrf.mxu0 }
 0x246   : > { %v1152_v60 = vadd.f32 %v1151_v57, %v4239_v53  ;;  %v1265_v61 = vadd.f32 %v1264_v44, %v4241_v54  ;;  %v1340_v9 = vmax.f32 %v1150_v58, 0.0  ;;  %v1342_v10 = vmax.f32 %v1263_v59, 0.0  ;;  %v3601_v57 = vld [vmem:[#allocation10 + $0x28] sm:$0xff]  }
 0x247   : > { %v1153_v1 = vpop.f32.mrf.mxu1  ;;  %v1266_v2 = vpop.f32.mrf.mxu0 }
 0x248   : > { %v1154_v3 = vadd.f32 %v1153_v1, %v4234_v51  ;;  %v1267_v4 = vadd.f32 %v1266_v2, %v4236_v52  ;;  %v1343_v5 = vmax.f32 %v1152_v60, 0.0  ;;  %v1345_v6 = vmax.f32 %v1265_v61, 0.0 }
 0x249   : > { %v1157_v7 = vpop.f32.mrf.mxu1  ;;  %v1270_v8 = vpop.f32.mrf.mxu0 }
 0x24a   : > { %v1344_v11 = vmax.f32 %v1154_v3, 0.0  ;;  %v1346_v12 = vmax.f32 %v1267_v4, 0.0  ;;  %v1404_v20 = vpack.c.bf16 %v1343_v5, %v1339_v13  ;;  %v1406_v21 = vpack.c.bf16 %v1345_v6, %v1341_v14  ;;  %v3604_v14 = vld [vmem:[#allocation10 + $0x58] sm:$0xff]  }
 0x24b   : > { %v1159_v15 = vpop.f32.mrf.mxu1  ;;  %v1272_v16 = vpop.f32.mrf.mxu0  ;;  %v1158_v29 = vadd.f32 %v1157_v7, %v4239_v53  ;;  %v1271_v30 = vadd.f32 %v1270_v8, %v4241_v54 }
 0x24c   : > { %v1405_v17 = vpack.c.bf16 %v1344_v11, %v1340_v9  ;;  %v1407_v18 = vpack.c.bf16 %v1346_v12, %v1342_v10  ;;  %v1160_v22 = vadd.f32 %v1159_v15, %v4234_v51  ;;  %v1273_v26 = vadd.f32 %v1272_v16, %v4236_v52  ;;  %v3603_v9 = vld [vmem:[#allocation10 + $0x20] sm:$0xff]  }
 0x24d   : > { %v1161_v23 = vpop.f32.mrf.mxu1  ;;  %v1274_v24 = vpop.f32.mrf.mxu0  ;;  %v1347_v42 = vmax.f32 %v1158_v29, 0.0  ;;  %v1349_v43 = vmax.f32 %v1271_v30, 0.0 }
 0x24e   : > { %v1162_v27 = vadd.f32 %v1161_v23, %v4239_v53  ;;  %v1275_v28 = vadd.f32 %v1274_v24, %v4241_v54  ;;  %1863 = vmatprep.mubr.bf16.mxu1 %v1405_v17  ;;  %1976 = vmatprep.mubr.bf16.mxu0 %v1407_v18  ;;  %v1348_v38 = vmax.f32 %v1160_v22, 0.0  ;;  %v1350_v39 = vmax.f32 %v1273_v26, 0.0 }
 0x24f   : > { %v1163_v31 = vpop.f32.mrf.mxu1  ;;  %v1276_v32 = vpop.f32.mrf.mxu0  ;;  %1864 = vmatmul.mubr.bf16.vlgmr.msra.gmra.mxu1 %v1404_v20  ;;  %1977 = vmatmul.mubr.bf16.vlgmr.msra.gmra.mxu0 %v1406_v21 }
 0x250   : > { %v1164_v50 = vadd.f32 %v1163_v31, %v4234_v51  ;;  %v1277_v33 = vadd.f32 %v1276_v32, %v4236_v52  ;;  %3089 = vmatpush3.bf16.msra.mxu1 %v3597_v19  ;;  %v1351_v34 = vmax.f32 %v1162_v27, 0.0  ;;  %v1353_v35 = vmax.f32 %v1275_v28, 0.0  ;;  %v3606_v31 = vld [vmem:[#allocation10 + $0x50] sm:$0xff]  }
 0x251   : > { %v1167_v36 = vpop.f32.mrf.mxu1  ;;  %v1280_v37 = vpop.f32.mrf.mxu0  ;;  %3090 = vmatprep.subr.bf16.mxu1 %v3598_v25  ;;  %v3605_v25 = vld [vmem:[#allocation10 + $0x18] sm:$0xff]  }
 0x252   : > { %v1352_v40 = vmax.f32 %v1164_v50, 0.0  ;;  %v1354_v41 = vmax.f32 %v1277_v33, 0.0  ;;  %v1408_v44 = vpack.c.bf16 %v1351_v34, %v1347_v42  ;;  %v1410_v58 = vpack.c.bf16 %v1353_v35, %v1349_v43  ;;  %v3608_v43 = vld [vmem:[#allocation10 + $0x48] sm:$0xff]  }
 0x253   : > { %v1169_v47 = vpop.f32.mrf.mxu1  ;;  %v1282_v48 = vpop.f32.mrf.mxu0  ;;  %v1168_v3 = vadd.f32 %v1167_v36, %v4239_v53  ;;  %v1281_v4 = vadd.f32 %v1280_v37, %v4241_v54 }
 0x254   : > { %v1409_v55 = vpack.c.bf16 %v1352_v40, %v1348_v38  ;;  %v1411_v56 = vpack.c.bf16 %v1354_v41, %v1350_v39  ;;  %3091 = vmatpush3.bf16.msra.mxu1 %v3599_v49  ;;  %v1170_v59 = vadd.f32 %v1169_v47, %v4234_v51  ;;  %v1283_v63 = vadd.f32 %v1282_v48, %v4236_v52  ;;  %v3607_v38 = vld [vmem:[#allocation10 + $0x10] sm:$0xff]  }
 0x255   : > { %v1171_v60 = vpop.f32.mrf.mxu1  ;;  %v1284_v61 = vpop.f32.mrf.mxu0  ;;  %3092 = vmatprep.subr.bf16.mxu1 %v3600_v0  ;;  %v1355_v19 = vmax.f32 %v1168_v3, 0.0  ;;  %v1357_v20 = vmax.f32 %v1281_v4, 0.0 }
 0x256   : > { %v1172_v1 = vadd.f32 %v1171_v60, %v4239_v53  ;;  %v1285_v2 = vadd.f32 %v1284_v61, %v4241_v54  ;;  %1873 = vmatprep.mubr.bf16.mxu1 %v1409_v55  ;;  %1986 = vmatprep.mubr.bf16.mxu0 %v1411_v56  ;;  %v1356_v15 = vmax.f32 %v1170_v59, 0.0  ;;  %v1358_v16 = vmax.f32 %v1283_v63, 0.0 }
 0x257   : > { %v1173_v5 = vpop.f32.mrf.mxu1  ;;  %v1286_v6 = vpop.f32.mrf.mxu0  ;;  %1874 = vmatmul.mubr.bf16.gmra.mxu1 %v1408_v44  ;;  %1987 = vmatmul.mubr.bf16.gmra.mxu0 %v1410_v58 }
 0x258   : > { %v1174_v7 = vadd.f32 %v1173_v5, %v4234_v51  ;;  %v1287_v8 = vadd.f32 %v1286_v6, %v4236_v52  ;;  %3093 = vmatpush3.bf16.msra.mxu1 %v3601_v57  ;;  %v1359_v10 = vmax.f32 %v1172_v1, 0.0  ;;  %v1361_v11 = vmax.f32 %v1285_v2, 0.0 }
 0x259   : > { %v1177_v12 = vpop.f32.mrf.mxu1  ;;  %v1290_v13 = vpop.f32.mrf.mxu0  ;;  %3094 = vmatprep.subr.bf16.mxu1 %v3602_v62 }
 0x25a   : > { %v1360_v17 = vmax.f32 %v1174_v7, 0.0  ;;  %v1362_v18 = vmax.f32 %v1287_v8, 0.0  ;;  %v1412_v26 = vpack.c.bf16 %v1359_v10, %v1355_v19  ;;  %v1414_v27 = vpack.c.bf16 %v1361_v11, %v1357_v20 }
 0x25b   : > { %v1179_v21 = vpop.f32.mrf.mxu1  ;;  %v1292_v22 = vpop.f32.mrf.mxu0  ;;  %v1178_v49 = vadd.f32 %v1177_v12, %v4239_v53  ;;  %v1291_v34 = vadd.f32 %v1290_v13, %v4241_v54 }
 0x25c   : > { %v1413_v23 = vpack.c.bf16 %v1360_v17, %v1356_v15  ;;  %v1415_v24 = vpack.c.bf16 %v1362_v18, %v1358_v16  ;;  %3095 = vmatpush3.bf16.msra.mxu1 %v3603_v9  ;;  %v1180_v28 = vadd.f32 %v1179_v21, %v4234_v51  ;;  %v1293_v32 = vadd.f32 %v1292_v22, %v4236_v52 }
 0x25d   : > { %v1181_v29 = vpop.f32.mrf.mxu1  ;;  %v1294_v30 = vpop.f32.mrf.mxu0  ;;  %3096 = vmatprep.subr.bf16.mxu1 %v3604_v14  ;;  %v1363_v57 = vmax.f32 %v1178_v49, 0.0  ;;  %v1365_v44 = vmax.f32 %v1291_v34, 0.0 }
 0x25e   : > { %v1182_v50 = vadd.f32 %v1181_v29, %v4239_v53  ;;  %v1295_v33 = vadd.f32 %v1294_v30, %v4241_v54  ;;  %1883 = vmatprep.mubr.bf16.mxu1 %v1413_v23  ;;  %1996 = vmatprep.mubr.bf16.mxu0 %v1415_v24  ;;  %v1364_v47 = vmax.f32 %v1180_v28, 0.0  ;;  %v1366_v48 = vmax.f32 %v1293_v32, 0.0 }
 0x25f   : > { %v1183_v35 = vpop.f32.mrf.mxu1  ;;  %v1296_v36 = vpop.f32.mrf.mxu0  ;;  %1884 = vmatmul.mubr.bf16.gmra.mxu1 %v1412_v26  ;;  %1997 = vmatmul.mubr.bf16.gmra.mxu0 %v1414_v27 }
 0x260   : > { %v1184_v37 = vadd.f32 %v1183_v35, %v4234_v51  ;;  %v1297_v0 = vadd.f32 %v1296_v36, %v4236_v52  ;;  %3097 = vmatpush3.bf16.msra.mxu1 %v3605_v25  ;;  %v1367_v39 = vmax.f32 %v1182_v50, 0.0  ;;  %v1369_v40 = vmax.f32 %v1295_v33, 0.0 }
 0x261   : > { %v1187_v41 = vpop.f32.mrf.mxu1  ;;  %v1300_v42 = vpop.f32.mrf.mxu0  ;;  %3098 = vmatprep.subr.bf16.mxu1 %v3606_v31 }
 0x262   : > { %v1368_v55 = vmax.f32 %v1184_v37, 0.0  ;;  %v1370_v56 = vmax.f32 %v1297_v0, 0.0  ;;  %v1416_v62 = vpack.c.bf16 %v1367_v39, %v1363_v57  ;;  %v1418_v63 = vpack.c.bf16 %v1369_v40, %v1365_v44 }
 0x263   : > { %v1189_v58 = vpop.f32.mrf.mxu1  ;;  %v1302_v59 = vpop.f32.mrf.mxu0  ;;  %v1188_v7 = vadd.f32 %v1187_v41, %v4239_v53  ;;  %v1301_v8 = vadd.f32 %v1300_v42, %v4241_v54 }
 0x264   : > { %v1417_v60 = vpack.c.bf16 %v1368_v55, %v1364_v47  ;;  %v1419_v61 = vpack.c.bf16 %v1370_v56, %v1366_v48  ;;  %3099 = vmatpush3.bf16.msra.mxu1 %v3607_v38  ;;  %v1190_v1 = vadd.f32 %v1189_v58, %v4234_v51  ;;  %v1303_v4 = vadd.f32 %v1302_v59, %v4236_v52 }
 0x265   : > { %v1191_v2 = vpop.f32.mrf.mxu1  ;;  %v1304_v3 = vpop.f32.mrf.mxu0  ;;  %3100 = vmatprep.subr.bf16.mxu1 %v3608_v43  ;;  %v1371_v21 = vmax.f32 %v1188_v7, 0.0  ;;  %v1373_v22 = vmax.f32 %v1301_v8, 0.0 }
 0x266   : > { %v1192_v5 = vadd.f32 %v1191_v2, %v4239_v53  ;;  %v1305_v6 = vadd.f32 %v1304_v3, %v4241_v54  ;;  %1893 = vmatprep.mubr.bf16.mxu1 %v1417_v60  ;;  %2006 = vmatprep.mubr.bf16.mxu0 %v1419_v61  ;;  %v1372_v17 = vmax.f32 %v1190_v1, 0.0  ;;  %v1374_v18 = vmax.f32 %v1303_v4, 0.0 }
 0x267   : > { %v1193_v9 = vpop.f32.mrf.mxu1  ;;  %v1306_v10 = vpop.f32.mrf.mxu0  ;;  %1894 = vmatmul.mubr.bf16.gmra.mxu1 %v1416_v62  ;;  %2007 = vmatmul.mubr.bf16.gmra.mxu0 %v1418_v63 }
 0x268   : > { %v1194_v11 = vadd.f32 %v1193_v9, %v4234_v51  ;;  %v1307_v12 = vadd.f32 %v1306_v10, %v4236_v52  ;;  %v1375_v13 = vmax.f32 %v1192_v5, 0.0  ;;  %v1377_v14 = vmax.f32 %v1305_v6, 0.0 }
 0x269   : > { %v1197_v15 = vpop.f32.mrf.mxu1  ;;  %v1310_v16 = vpop.f32.mrf.mxu0 }
 0x26a   : > { %v1376_v19 = vmax.f32 %v1194_v11, 0.0  ;;  %v1378_v20 = vmax.f32 %v1307_v12, 0.0  ;;  %v1420_v27 = vpack.c.bf16 %v1375_v13, %v1371_v21  ;;  %v1422_v28 = vpack.c.bf16 %v1377_v14, %v1373_v22 }
 0x26b   : > { %v1199_v23 = vpop.f32.mrf.mxu1  ;;  %v1312_v24 = vpop.f32.mrf.mxu0  ;;  %v1198_v49 = vadd.f32 %v1197_v15, %v4239_v53  ;;  %v1311_v34 = vadd.f32 %v1310_v16, %v4241_v54 }
 0x26c   : > { %v1421_v25 = vpack.c.bf16 %v1376_v19, %v1372_v17  ;;  %v1423_v26 = vpack.c.bf16 %v1378_v20, %v1374_v18  ;;  %v1200_v29 = vadd.f32 %v1199_v23, %v4234_v51  ;;  %v1313_v32 = vadd.f32 %v1312_v24, %v4236_v52 }
 0x26d   : > { %v1201_v30 = vpop.f32.mrf.mxu1  ;;  %v1314_v31 = vpop.f32.mrf.mxu0  ;;  %v1379_v55 = vmax.f32 %v1198_v49, 0.0  ;;  %v1381_v56 = vmax.f32 %v1311_v34, 0.0 }
 0x26e   : > { %v1202_v50 = vadd.f32 %v1201_v30, %v4239_v53  ;;  %v1315_v33 = vadd.f32 %v1314_v31, %v4241_v54  ;;  %1903 = vmatprep.mubr.bf16.mxu1 %v1421_v25  ;;  %2016 = vmatprep.mubr.bf16.mxu0 %v1423_v26  ;;  %v1380_v42 = vmax.f32 %v1200_v29, 0.0  ;;  %v1382_v43 = vmax.f32 %v1313_v32, 0.0 }
 0x26f   : > { %v1203_v35 = vpop.f32.mrf.mxu1  ;;  %v1316_v36 = vpop.f32.mrf.mxu0  ;;  %1904 = vmatmul.mubr.bf16.gmra.mxu1 %v1420_v27  ;;  %2017 = vmatmul.mubr.bf16.gmra.mxu0 %v1422_v28 }
 0x270   : > { %v1204_v37 = vadd.f32 %v1203_v35, %v4234_v51  ;;  %v1317_v0 = vadd.f32 %v1316_v36, %v4236_v52  ;;  %v1383_v38 = vmax.f32 %v1202_v50, 0.0  ;;  %v1385_v39 = vmax.f32 %v1315_v33, 0.0 }
 0x271   : > { %v1207_v40 = vpop.f32.mrf.mxu1  ;;  %v1320_v41 = vpop.f32.mrf.mxu0 }
 0x272   : > { %v1384_v47 = vmax.f32 %v1204_v37, 0.0  ;;  %v1386_v48 = vmax.f32 %v1317_v0, 0.0  ;;  %v1424_v60 = vpack.c.bf16 %v1383_v38, %v1379_v55  ;;  %v1426_v61 = vpack.c.bf16 %v1385_v39, %v1381_v56  ;;  %v3609_v55 = vld [vmem:[#allocation10 + $0x8] sm:$0xff]   ;;  %v3612_v56 = vld [vmem:[#allocation11 + $0x38] sm:$0xff]  }
 0x273   : > { %v1209_v57 = vpop.f32.mrf.mxu1  ;;  %v1322_v44 = vpop.f32.mrf.mxu0  ;;  %v1208_v5 = vadd.f32 %v1207_v40, %v4239_v53  ;;  %v1321_v6 = vadd.f32 %v1320_v41, %v4241_v54  ;;  %3101 = vmatpush3.bf16.msra.mxu1 %v3609_v55  ;;  %3184 = vmatprep.subr.bf16.mxu0 %v3612_v56 }
 0x274   : > { %v1425_v58 = vpack.c.bf16 %v1384_v47, %v1380_v42  ;;  %v1427_v59 = vpack.c.bf16 %v1386_v48, %v1382_v43  ;;  %v1210_v62 = vadd.f32 %v1209_v57, %v4234_v51  ;;  %v1323_v2 = vadd.f32 %v1322_v44, %v4236_v52  ;;  %v3613_v57 = vld [vmem:[#allocation11 + $0x30] sm:$0xff]   ;;  %3185 = vmatpush3.bf16.msra.mxu0 %v3612_v56  ;;  %v3614_v44 = vld [vmem:[#allocation11 + $0x28] sm:$0xff]  }
 0x275   : > { %v1211_v63 = vpop.f32.mrf.mxu1  ;;  %v1324_v1 = vpop.f32.mrf.mxu0  ;;  %v1387_v19 = vmax.f32 %v1208_v5, 0.0  ;;  %v1389_v20 = vmax.f32 %v1321_v6, 0.0  ;;  %3186 = vmatprep.subr.bf16.mxu0 %v3613_v57 }
 0x276   : > { %v1212_v3 = vadd.f32 %v1211_v63, %v4239_v53  ;;  %v1325_v4 = vadd.f32 %v1324_v1, %v4241_v54  ;;  %1913 = vmatprep.mubr.bf16.mxu1 %v1425_v58  ;;  %2026 = vmatprep.mubr.bf16.mxu0 %v1427_v59  ;;  %v1388_v15 = vmax.f32 %v1210_v62, 0.0  ;;  %v1390_v16 = vmax.f32 %v1323_v2, 0.0  ;;  %v1403_v58 = vld [vmem:[%s4464_s7 + $0x6] sm:$0x3] }
 0x277   : > { %v1213_v7 = vpop.f32.mrf.mxu1  ;;  %v1326_v8 = vpop.f32.mrf.mxu0  ;;  %1914 = vmatmul.mubr.bf16.gmra.mxu1 %v1424_v60  ;;  %2027 = vmatmul.mubr.bf16.gmra.mxu0 %v1426_v61  ;;  %v4311_v59 = vrot.slane %v1403_v58, %v4182_v45  ;;  %v4314_v60 = vrot.slane %v1403_v58, %v4185_v46 }
 0x278   : > { %v1214_v9 = vadd.f32 %v1213_v7, %v4234_v51  ;;  %v1327_v10 = vadd.f32 %v1326_v8, %v4236_v52  ;;  %v1391_v11 = vmax.f32 %v1212_v3, 0.0  ;;  %v1393_v12 = vmax.f32 %v1325_v4, 0.0  ;;  %3187 = vmatpush3.bf16.msra.mxu0 %v3613_v57 }
 0x279   : > { %v1217_v13 = vpop.f32.mrf.mxu1  ;;  %v1330_v14 = vpop.f32.mrf.mxu0  ;;  %3188 = vmatprep.subr.bf16.mxu0 %v3614_v44 }
 0x27a   : > { %v1392_v17 = vmax.f32 %v1214_v9, 0.0  ;;  %v1394_v18 = vmax.f32 %v1327_v10, 0.0  ;;  %v1428_v25 = vpack.c.bf16 %v1391_v11, %v1387_v19  ;;  %v1430_v26 = vpack.c.bf16 %v1393_v12, %v1389_v20 }
 0x27b   : > { %v1219_v21 = vpop.f32.mrf.mxu1  ;;  %v1332_v22 = vpop.f32.mrf.mxu0  ;;  %v1218_v50 = vadd.f32 %v1217_v13, %v4239_v53  ;;  %v1331_v33 = vadd.f32 %v1330_v14, %v4241_v54 }
 0x27c   : > { %v1429_v23 = vpack.c.bf16 %v1392_v17, %v1388_v15  ;;  %v1431_v24 = vpack.c.bf16 %v1394_v18, %v1390_v16  ;;  %v1220_v27 = vadd.f32 %v1219_v21, %v4234_v51  ;;  %v1333_v30 = vadd.f32 %v1332_v22, %v4236_v52  ;;  %3189 = vmatpush3.bf16.msra.mxu0 %v3614_v44 }
 0x27d   : > { %v1221_v28 = vpop.f32.mrf.mxu1  ;;  %v1334_v29 = vpop.f32.mrf.mxu0  ;;  %v1395_v42 = vmax.f32 %v1218_v50, 0.0  ;;  %v1397_v43 = vmax.f32 %v1331_v33, 0.0 }
 0x27e   : > { %v1222_v31 = vadd.f32 %v1221_v28, %v4239_v53  ;;  %v1335_v32 = vadd.f32 %v1334_v29, %v4241_v54  ;;  %1923 = vmatprep.mubr.bf16.mxu1 %v1429_v23  ;;  %2036 = vmatprep.mubr.bf16.mxu0 %v1431_v24  ;;  %v1396_v38 = vmax.f32 %v1220_v27, 0.0  ;;  %v1398_v39 = vmax.f32 %v1333_v30, 0.0 }
 0x27f   : > { %v1223_v49 = vpop.f32.mrf.mxu1  ;;  %v1336_v34 = vpop.f32.mrf.mxu0  ;;  %1924 = vmatmul.mubr.bf16.gmra.mxu1 %v1428_v25  ;;  %2037 = vmatmul.mubr.bf16.gmra.mxu0 %v1430_v26 }
 0x280   : > { %v1224_v35 = vadd.f32 %v1223_v49, %v4234_v51  ;;  %v1337_v36 = vadd.f32 %v1336_v34, %v4236_v52  ;;  %v1399_v37 = vmax.f32 %v1222_v31, 0.0  ;;  %v1401_v0 = vmax.f32 %v1335_v32, 0.0  ;;  %v3610_v51 = vld [vmem:[#allocation10 + $0x40] sm:$0xff]  }
 0x281   : > { %v3611_v52 = vld [vmem:[#allocation10] sm:$0xff]   ;;  %3102 = vmatprep.subr.bf16.mxu1 %v3610_v51 }
 0x282   : > { %v1400_v40 = vmax.f32 %v1224_v35, 0.0  ;;  %v1402_v41 = vmax.f32 %v1337_v36, 0.0  ;;  %v1432_v48 = vpack.c.bf16 %v1399_v37, %v1395_v42  ;;  %v1434_v54 = vpack.c.bf16 %v1401_v0, %v1397_v43  ;;  %3103 = vmatpush3.bf16.msra.mxu1 %v3611_v52 }
 0x284   : > { %v1433_v47 = vpack.c.bf16 %v1400_v40, %v1396_v38  ;;  %v1435_v53 = vpack.c.bf16 %v1402_v41, %v1398_v39 }
 0x286   : > { %1933 = vmatprep.mubr.bf16.mxu1 %v1433_v47  ;;  %2046 = vmatprep.mubr.bf16.mxu0 %v1435_v53 }
 0x287   : > { %1934 = vmatmul.mubr.bf16.gmra.mxu1 %v1432_v48  ;;  %2047 = vmatmul.mubr.bf16.gmra.mxu0 %v1434_v54 }
 0x30f   : > { %v1865_v61 = vpop.f32.mrf.mxu1  ;;  %v1978_v62 = vpop.f32.mrf.mxu0 }
 0x310   : > { %v1866_v3 = vadd.f32 %v1865_v61, %v4314_v60 }
 0x311   : > { %v1867_v63 = vpop.f32.mrf.mxu1  ;;  %v1980_v1 = vpop.f32.mrf.mxu0 }
 0x312   : > { %v1868_v2 = vadd.f32 %v1867_v63, %v4311_v59  ;;  %v1979_v46 = vadd.f32 %v1978_v62, %v1866_v3 }
 0x313   : > { %v1869_v4 = vpop.f32.mrf.mxu1  ;;  %v1982_v5 = vpop.f32.mrf.mxu0 }
 0x314   : > { %v1870_v6 = vadd.f32 %v1869_v4, %v4314_v60  ;;  %v1981_v9 = vadd.f32 %v1980_v1, %v1868_v2  ;;  %v2057_v20 = vmax.f32 %v1979_v46, 0.0 }
 0x315   : > { %v1871_v7 = vpop.f32.mrf.mxu1  ;;  %v1984_v8 = vpop.f32.mrf.mxu0 }
 0x316   : > { %v1983_v45 = vadd.f32 %v1982_v5, %v1870_v6  ;;  %v1872_v10 = vadd.f32 %v1871_v7, %v4311_v59  ;;  %v2058_v17 = vmax.f32 %v1981_v9, 0.0 }
 0x317   : > { %v1875_v11 = vpop.f32.mrf.mxu1  ;;  %v1988_v12 = vpop.f32.mrf.mxu0 }
 0x318   : > { %v1985_v13 = vadd.f32 %v1984_v8, %v1872_v10  ;;  %v2059_v14 = vmax.f32 %v1983_v45, 0.0  ;;  %v1876_v21 = vadd.f32 %v1875_v11, %v4314_v60 }
 0x319   : > { %v1877_v15 = vpop.f32.mrf.mxu1  ;;  %v1990_v16 = vpop.f32.mrf.mxu0 }
 0x31a   : > { %v2060_v18 = vmax.f32 %v1985_v13, 0.0  ;;  %v1878_v19 = vadd.f32 %v1877_v15, %v4311_v59  ;;  %v2090_v26 = vpack.c.bf16 %v2059_v14, %v2057_v20  ;;  %v1989_v32 = vadd.f32 %v1988_v12, %v1876_v21 }
 0x31b   : > { %v1879_v22 = vpop.f32.mrf.mxu1  ;;  %v1992_v23 = vpop.f32.mrf.mxu0 }
 0x31c   : > { %v2091_v24 = vpack.c.bf16 %v2060_v18, %v2058_v17  ;;  %v1880_v25 = vadd.f32 %v1879_v22, %v4314_v60  ;;  %v1991_v29 = vadd.f32 %v1990_v16, %v1878_v19  ;;  %v2061_v39 = vmax.f32 %v1989_v32, 0.0 }
 0x31d   : > { %v1881_v27 = vpop.f32.mrf.mxu1  ;;  %v1994_v28 = vpop.f32.mrf.mxu0 }
 0x31e   : > { %v1993_v30 = vadd.f32 %v1992_v23, %v1880_v25  ;;  %v1882_v31 = vadd.f32 %v1881_v27, %v4311_v59  ;;  %2272 = vmatprep.mubr.bf16.mxu1 %v2091_v24  ;;  %v2062_v37 = vmax.f32 %v1991_v29, 0.0 }
 0x31f   : > { %v1885_v50 = vpop.f32.mrf.mxu1  ;;  %v1998_v33 = vpop.f32.mrf.mxu0  ;;  %2273 = vmatmul.mubr.bf16.vlgmr.msra.gmra.mxu1 %v2090_v26 }
 0x320   : > { %v1995_v49 = vadd.f32 %v1994_v28, %v1882_v31  ;;  %v2063_v34 = vmax.f32 %v1993_v30, 0.0  ;;  %v1886_v40 = vadd.f32 %v1885_v50, %v4314_v60 }
 0x321   : > { %v1887_v35 = vpop.f32.mrf.mxu1  ;;  %v2000_v36 = vpop.f32.mrf.mxu0 }
 0x322   : > { %v2064_v0 = vmax.f32 %v1995_v49, 0.0  ;;  %v1888_v38 = vadd.f32 %v1887_v35, %v4311_v59  ;;  %v2092_v53 = vpack.c.bf16 %v2063_v34, %v2061_v39  ;;  %v1999_v56 = vadd.f32 %v1998_v33, %v1886_v40 }
 0x323   : > { %v1889_v41 = vpop.f32.mrf.mxu1  ;;  %v2002_v42 = vpop.f32.mrf.mxu0 }
 0x324   : > { %v2093_v43 = vpack.c.bf16 %v2064_v0, %v2062_v37  ;;  %v1890_v47 = vadd.f32 %v1889_v41, %v4314_v60  ;;  %v2001_v55 = vadd.f32 %v2000_v36, %v1888_v38  ;;  %v2065_v4 = vmax.f32 %v1999_v56, 0.0 }
 0x325   : > { %v1891_v48 = vpop.f32.mrf.mxu1  ;;  %v2004_v54 = vpop.f32.mrf.mxu0 }
 0x326   : > { %v2003_v51 = vadd.f32 %v2002_v42, %v1890_v47  ;;  %v1892_v52 = vadd.f32 %v1891_v48, %v4311_v59  ;;  %2280 = vmatprep.mubr.bf16.mxu1 %v2093_v43  ;;  %v2066_v1 = vmax.f32 %v2001_v55, 0.0 }
 0x327   : > { %v1895_v57 = vpop.f32.mrf.mxu1  ;;  %v2008_v44 = vpop.f32.mrf.mxu0  ;;  %2281 = vmatmul.mubr.bf16.gmra.mxu1 %v2092_v53 }
 0x328   : > { %v2005_v58 = vadd.f32 %v2004_v54, %v1892_v52  ;;  %v2067_v61 = vmax.f32 %v2003_v51, 0.0  ;;  %v1896_v5 = vadd.f32 %v1895_v57, %v4314_v60 }
 0x329   : > { %v1897_v62 = vpop.f32.mrf.mxu1  ;;  %v2010_v63 = vpop.f32.mrf.mxu0 }
 0x32a   : > { %v2068_v2 = vmax.f32 %v2005_v58, 0.0  ;;  %v1898_v3 = vadd.f32 %v1897_v62, %v4311_v59  ;;  %v2094_v45 = vpack.c.bf16 %v2067_v61, %v2065_v4  ;;  %v2009_v14 = vadd.f32 %v2008_v44, %v1896_v5 }
 0x32b   : > { %v1899_v6 = vpop.f32.mrf.mxu1  ;;  %v2012_v7 = vpop.f32.mrf.mxu0 }
 0x32c   : > { %v2095_v8 = vpack.c.bf16 %v2068_v2, %v2066_v1  ;;  %v1900_v9 = vadd.f32 %v1899_v6, %v4314_v60  ;;  %v2011_v11 = vadd.f32 %v2010_v63, %v1898_v3  ;;  %v2069_v24 = vmax.f32 %v2009_v14, 0.0 }
 0x32d   : > { %v1901_v10 = vpop.f32.mrf.mxu1  ;;  %v2014_v46 = vpop.f32.mrf.mxu0 }
 0x32e   : > { %v2013_v12 = vadd.f32 %v2012_v7, %v1900_v9  ;;  %v1902_v13 = vadd.f32 %v1901_v10, %v4311_v59  ;;  %2288 = vmatprep.mubr.bf16.mxu1 %v2095_v8  ;;  %v2070_v21 = vmax.f32 %v2011_v11, 0.0 }
 0x32f   : > { %v1905_v15 = vpop.f32.mrf.mxu1  ;;  %v2018_v16 = vpop.f32.mrf.mxu0  ;;  %2289 = vmatmul.mubr.bf16.gmra.mxu1 %v2094_v45 }
 0x330   : > { %v2015_v17 = vadd.f32 %v2014_v46, %v1902_v13  ;;  %v2071_v18 = vmax.f32 %v2013_v12, 0.0  ;;  %v1906_v25 = vadd.f32 %v1905_v15, %v4314_v60 }
 0x331   : > { %v1907_v19 = vpop.f32.mrf.mxu1  ;;  %v2020_v20 = vpop.f32.mrf.mxu0 }
 0x332   : > { %v2072_v22 = vmax.f32 %v2015_v17, 0.0  ;;  %v1908_v23 = vadd.f32 %v1907_v19, %v4311_v59  ;;  %v2096_v30 = vpack.c.bf16 %v2071_v18, %v2069_v24  ;;  %v2019_v34 = vadd.f32 %v2018_v16, %v1906_v25 }
 0x333   : > { %v1909_v26 = vpop.f32.mrf.mxu1  ;;  %v2022_v27 = vpop.f32.mrf.mxu0 }
 0x334   : > { %v2097_v28 = vpack.c.bf16 %v2072_v22, %v2070_v21  ;;  %v1910_v29 = vadd.f32 %v1909_v26, %v4314_v60  ;;  %v2021_v50 = vadd.f32 %v2020_v20, %v1908_v23  ;;  %v2073_v43 = vmax.f32 %v2019_v34, 0.0 }
 0x335   : > { %v1911_v31 = vpop.f32.mrf.mxu1  ;;  %v2024_v32 = vpop.f32.mrf.mxu0 }
 0x336   : > { %v2023_v33 = vadd.f32 %v2022_v27, %v1910_v29  ;;  %v1912_v49 = vadd.f32 %v1911_v31, %v4311_v59  ;;  %2296 = vmatprep.mubr.bf16.mxu1 %v2097_v28  ;;  %v2074_v40 = vmax.f32 %v2021_v50, 0.0 }
 0x337   : > { %v1915_v35 = vpop.f32.mrf.mxu1  ;;  %v2028_v36 = vpop.f32.mrf.mxu0  ;;  %2297 = vmatmul.mubr.bf16.gmra.mxu1 %v2096_v30 }
 0x338   : > { %v2025_v37 = vadd.f32 %v2024_v32, %v1912_v49  ;;  %v2075_v0 = vmax.f32 %v2023_v33, 0.0  ;;  %v1916_v47 = vadd.f32 %v1915_v35, %v4314_v60 }
 0x339   : > { %v1917_v38 = vpop.f32.mrf.mxu1  ;;  %v2030_v39 = vpop.f32.mrf.mxu0 }
 0x33a   : > { %v2076_v41 = vmax.f32 %v2025_v37, 0.0  ;;  %v1918_v42 = vadd.f32 %v1917_v38, %v4311_v59  ;;  %v2098_v51 = vpack.c.bf16 %v2075_v0, %v2073_v43  ;;  %v2029_v61 = vadd.f32 %v2028_v36, %v1916_v47 }
 0x33b   : > { %v1919_v53 = vpop.f32.mrf.mxu1  ;;  %v2032_v48 = vpop.f32.mrf.mxu0 }
 0x33c   : > { %v2099_v54 = vpack.c.bf16 %v2076_v41, %v2074_v40  ;;  %v1920_v55 = vadd.f32 %v1919_v53, %v4314_v60  ;;  %v2031_v57 = vadd.f32 %v2030_v39, %v1918_v42  ;;  %v2077_v8 = vmax.f32 %v2029_v61, 0.0  ;;  %v3616_v53 = vld [vmem:[#allocation11 + $0x18] sm:$0xff]  }
 0x33d   : > { %v1921_v52 = vpop.f32.mrf.mxu1  ;;  %v2034_v56 = vpop.f32.mrf.mxu0 }
 0x33e   : > { %v2033_v44 = vadd.f32 %v2032_v48, %v1920_v55  ;;  %v1922_v58 = vadd.f32 %v1921_v52, %v4311_v59  ;;  %2304 = vmatprep.mubr.bf16.mxu1 %v2099_v54  ;;  %v2078_v5 = vmax.f32 %v2031_v57, 0.0  ;;  %v3618_v48 = vld [vmem:[#allocation11 + $0x8] sm:$0xff]   ;;  %v3619_v54 = vld [vmem:[#allocation11] sm:$0xff]   ;;  %v3620_v55 = vld [vmem:[#allocation13 + $0x38] sm:$0xff]  }
 0x33f   : > { %v1925_v62 = vpop.f32.mrf.mxu1  ;;  %v2038_v63 = vpop.f32.mrf.mxu0  ;;  %2305 = vmatmul.mubr.bf16.gmra.mxu1 %v2098_v51  ;;  %v3621_v51 = vld [vmem:[#allocation13 + $0x30] sm:$0xff]   ;;  %3248 = vmatprep.subr.bf16.mxu1 %v3620_v55  ;;  %v3622_v52 = vld [vmem:[#allocation13 + $0x28] sm:$0xff]   ;;  %v4351_v57 = vld [vmem:[#allocation13 + $0x18] sm:$0xff]  }
 0x340   : > { %v2035_v1 = vadd.f32 %v2034_v56, %v1922_v58  ;;  %v2079_v2 = vmax.f32 %v2033_v44, 0.0  ;;  %v1926_v9 = vadd.f32 %v1925_v62, %v4314_v60  ;;  %3256 = vmatpush3.bf16.msra.mxu1 %v3620_v55  ;;  %v4348_v56 = vld [vmem:[#allocation13 + $0x20] sm:$0xff]   ;;  %v4359_v62 = vld [vmem:[%s4464_s7 + $0x8] ss:$0 sm:$0xff] }
 0x341   : > { %v1927_v3 = vpop.f32.mrf.mxu1  ;;  %v2040_v4 = vpop.f32.mrf.mxu0  ;;  %3249 = vmatprep.subr.bf16.mxu1 %v3621_v51 }
 0x342   : > { %v2080_v6 = vmax.f32 %v2035_v1, 0.0  ;;  %v1928_v7 = vadd.f32 %v1927_v3, %v4311_v59  ;;  %v2100_v12 = vpack.c.bf16 %v2079_v2, %v2077_v8  ;;  %v2039_v18 = vadd.f32 %v2038_v63, %v1926_v9 }
 0x343   : > { %v1929_v45 = vpop.f32.mrf.mxu1  ;;  %v2042_v10 = vpop.f32.mrf.mxu0 }
 0x344   : > { %v2101_v46 = vpack.c.bf16 %v2080_v6, %v2078_v5  ;;  %v1930_v11 = vadd.f32 %v1929_v45, %v4314_v60  ;;  %v2041_v15 = vadd.f32 %v2040_v4, %v1928_v7  ;;  %v2081_v28 = vmax.f32 %v2039_v18, 0.0  ;;  %3257 = vmatpush3.bf16.msra.mxu1 %v3621_v51 }
 0x345   : > { %v1931_v13 = vpop.f32.mrf.mxu1  ;;  %v2044_v14 = vpop.f32.mrf.mxu0  ;;  %3250 = vmatprep.subr.bf16.mxu1 %v3622_v52 }
 0x346   : > { %v2043_v16 = vadd.f32 %v2042_v10, %v1930_v11  ;;  %v1932_v17 = vadd.f32 %v1931_v13, %v4311_v59  ;;  %2312 = vmatprep.mubr.bf16.mxu1 %v2101_v46  ;;  %v2082_v25 = vmax.f32 %v2041_v15, 0.0 }
 0x347   : > { %v1935_v19 = vpop.f32.mrf.mxu1  ;;  %v2048_v20 = vpop.f32.mrf.mxu0  ;;  %2313 = vmatmul.mubr.bf16.gmra.mxu1 %v2100_v12 }
 0x348   : > { %v2045_v21 = vadd.f32 %v2044_v14, %v1932_v17  ;;  %v2083_v22 = vmax.f32 %v2043_v16, 0.0  ;;  %v1936_v29 = vadd.f32 %v1935_v19, %v4314_v60  ;;  %3258 = vmatpush3.bf16.msra.mxu1 %v3622_v52 }
 0x349   : > { %v1937_v23 = vpop.f32.mrf.mxu1  ;;  %v2050_v24 = vpop.f32.mrf.mxu0  ;;  %3251 = vmatprep.subr.bf16.mxu1 %v4348_v56 }
 0x34a   : > { %v2084_v26 = vmax.f32 %v2045_v21, 0.0  ;;  %v1938_v27 = vadd.f32 %v1937_v23, %v4311_v59  ;;  %v2102_v33 = vpack.c.bf16 %v2083_v22, %v2081_v28  ;;  %v2049_v37 = vadd.f32 %v2048_v20, %v1936_v29 }
 0x34b   : > { %v1939_v30 = vpop.f32.mrf.mxu1  ;;  %v2052_v31 = vpop.f32.mrf.mxu0 }
 0x34c   : > { %v2103_v32 = vpack.c.bf16 %v2084_v26, %v2082_v25  ;;  %v1940_v50 = vadd.f32 %v1939_v30, %v4314_v60  ;;  %v2051_v34 = vadd.f32 %v2050_v24, %v1938_v27  ;;  %v2085_v42 = vmax.f32 %v2049_v37, 0.0  ;;  %v3615_v60 = vld [vmem:[#allocation11 + $0x20] sm:$0xff]   ;;  %3259 = vmatpush3.bf16.msra.mxu1 %v4348_v56 }
 0x34d   : > { %v1941_v49 = vpop.f32.mrf.mxu1  ;;  %v2054_v0 = vpop.f32.mrf.mxu0  ;;  %3190 = vmatprep.subr.bf16.mxu0 %v3615_v60  ;;  %3252 = vmatprep.subr.bf16.mxu1 %v4351_v57 }
 0x34e   : > { %v2053_v35 = vadd.f32 %v2052_v31, %v1940_v50  ;;  %v1942_v36 = vadd.f32 %v1941_v49, %v4311_v59  ;;  %2320 = vmatprep.mubr.bf16.mxu1 %v2103_v32  ;;  %v2086_v40 = vmax.f32 %v2051_v34, 0.0  ;;  %3191 = vmatpush3.bf16.msra.mxu0 %v3615_v60  ;;  %v3617_v59 = vld [vmem:[#allocation11 + $0x10] sm:$0xff]  }
 0x34f   : > { %2321 = vmatmul.mubr.bf16.gmra.mxu1 %v2102_v33  ;;  %3192 = vmatprep.subr.bf16.mxu0 %v3616_v53 }
 0x350   : > { %v2055_v38 = vadd.f32 %v2054_v0, %v1942_v36  ;;  %v2087_v39 = vmax.f32 %v2053_v35, 0.0  ;;  %3260 = vmatpush3.bf16.msra.mxu1 %v4351_v57 }
 0x352   : > { %v2088_v41 = vmax.f32 %v2055_v38, 0.0  ;;  %v2104_v47 = vpack.c.bf16 %v2087_v39, %v2085_v42  ;;  %3193 = vmatpush3.bf16.msra.mxu0 %v3616_v53 }
 0x353   : > { %3194 = vmatprep.subr.bf16.mxu0 %v3617_v59 }
 0x354   : > { %v2105_v43 = vpack.c.bf16 %v2088_v41, %v2086_v40 }
 0x356   : > { %2328 = vmatprep.mubr.bf16.mxu1 %v2105_v43  ;;  %3195 = vmatpush3.bf16.msra.mxu0 %v3617_v59 }
 0x357   : > { %2329 = vmatmul.mubr.bf16.gmra.mxu1 %v2104_v47  ;;  %3196 = vmatprep.subr.bf16.mxu0 %v3618_v48 }
 0x35a   : > { %3197 = vmatpush3.bf16.msra.mxu0 %v3618_v48 }
 0x35b   : > { %3198 = vmatprep.subr.bf16.mxu0 %v3619_v54 }
 0x35e   : > { %3199 = vmatpush3.bf16.msra.mxu0 %v3619_v54 }
 0x35f   : > { %3216 = vmatprep.subr.bf16.mxu0 %v3620_v55 }
 0x3df   : > { %v3104_v44 = vpop.f32.mrf.mxu1 }
 0x3e1   : > { %v3105_v58 = vpop.f32.mrf.mxu1 }
 0x3e2   : > { %v3106_v61 = vadd.f32 %v3105_v58, %v3104_v44 }
 0x3e3   : > { %v3107_v63 = vpop.f32.mrf.mxu1 }
 0x3e4   : > { %v2275_v2 = vadd.f32 %v3106_v61, %v4359_v62 }
 0x3e5   : > { %v3108_v1 = vpop.f32.mrf.mxu1 }
 0x3e6   : > { %v3109_v3 = vadd.f32 %v3108_v1, %v3107_v63  ;;  %v2337_v7 = vmax.f32 %v2275_v2, 0.0 }
 0x3e7   : > { %v3110_v4 = vpop.f32.mrf.mxu1 }
 0x3e8   : > { %v2278_v5 = vadd.f32 %v3109_v3, %v4359_v62 }
 0x3e9   : > { %v3111_v6 = vpop.f32.mrf.mxu1 }
 0x3ea   : > { %v2338_v8 = vmax.f32 %v2278_v5, 0.0  ;;  %v3112_v9 = vadd.f32 %v3111_v6, %v3110_v4 }
 0x3eb   : > { %v3113_v45 = vpop.f32.mrf.mxu1 }
 0x3ec   : > { %v2354_v10 = vpack.c.bf16 %v2338_v8, %v2337_v7  ;;  %v2283_v11 = vadd.f32 %v3112_v9, %v4359_v62 }
 0x3ed   : > { %v3114_v46 = vpop.f32.mrf.mxu1 }
 0x3ee   : > { %v3115_v12 = vadd.f32 %v3114_v46, %v3113_v45  ;;  %3200 = vmatprep.mubr.bf16.mxu0 %v2354_v10  ;;  %v2339_v16 = vmax.f32 %v2283_v11, 0.0 }
 0x3ef   : > { %v3116_v13 = vpop.f32.mrf.mxu1 }
 0x3f0   : > { %v2286_v14 = vadd.f32 %v3115_v12, %v4359_v62 }
 0x3f1   : > { %v3117_v15 = vpop.f32.mrf.mxu1 }
 0x3f2   : > { %v2340_v17 = vmax.f32 %v2286_v14, 0.0  ;;  %v3118_v18 = vadd.f32 %v3117_v15, %v3116_v13 }
 0x3f3   : > { %v3119_v19 = vpop.f32.mrf.mxu1 }
 0x3f4   : > { %v2355_v20 = vpack.c.bf16 %v2340_v17, %v2339_v16  ;;  %v2291_v22 = vadd.f32 %v3118_v18, %v4359_v62 }
 0x3f5   : > { %v3120_v21 = vpop.f32.mrf.mxu1 }
 0x3f6   : > { %v3121_v23 = vadd.f32 %v3120_v21, %v3119_v19  ;;  %3201 = vmatmul.mubr.bf16.vlgmr.msra.gmra.mxu0 %v2355_v20  ;;  %v2341_v27 = vmax.f32 %v2291_v22, 0.0  ;;  %v3625_v20 = vld [vmem:[#allocation13 + $0x10] sm:$0xff]   ;;  %v3626_v21 = vld [vmem:[#allocation13 + $0x8] sm:$0xff]   ;;  %v3627_v22 = vld [vmem:[#allocation13] sm:$0xff]  }
 0x3f7   : > { %v3122_v24 = vpop.f32.mrf.mxu1  ;;  %3217 = vmatpush3.bf16.msra.mxu0 %v3620_v55  ;;  %3253 = vmatprep.subr.bf16.mxu1 %v3625_v20 }
 0x3f8   : > { %v2294_v25 = vadd.f32 %v3121_v23, %v4359_v62  ;;  %3218 = vmatprep.subr.bf16.mxu0 %v3621_v51  ;;  %3261 = vmatpush3.bf16.msra.mxu1 %v3625_v20 }
 0x3f9   : > { %v3123_v26 = vpop.f32.mrf.mxu1  ;;  %3254 = vmatprep.subr.bf16.mxu1 %v3626_v21 }
 0x3fa   : > { %v2342_v28 = vmax.f32 %v2294_v25, 0.0  ;;  %v3124_v29 = vadd.f32 %v3123_v26, %v3122_v24  ;;  %v3063_v24 = vld [vmem:[%s4464_s7 + $0x9] ss:$0 sm:$0xff] }
 0x3fb   : > { %v3125_v30 = vpop.f32.mrf.mxu1  ;;  %3219 = vmatpush3.bf16.msra.mxu0 %v3621_v51 }
 0x3fc   : > { %v2356_v31 = vpack.c.bf16 %v2342_v28, %v2341_v27  ;;  %3220 = vmatprep.subr.bf16.mxu0 %v3622_v52  ;;  %v2299_v50 = vadd.f32 %v3124_v29, %v4359_v62  ;;  %3262 = vmatpush3.bf16.msra.mxu1 %v3626_v21 }
 0x3fd   : > { %v3126_v32 = vpop.f32.mrf.mxu1  ;;  %3255 = vmatprep.subr.bf16.mxu1 %v3627_v22 }
 0x3fe   : > { %v3127_v33 = vadd.f32 %v3126_v32, %v3125_v30  ;;  %3204 = vmatprep.mubr.bf16.mxu0 %v2356_v31  ;;  %v2343_v36 = vmax.f32 %v2299_v50, 0.0 }
 0x3ff   : > { %v3128_v49 = vpop.f32.mrf.mxu1  ;;  %3221 = vmatpush3.bf16.msra.mxu0 %v3622_v52 }
 0x400   : > { %v2302_v34 = vadd.f32 %v3127_v33, %v4359_v62  ;;  %3222 = vmatprep.subr.bf16.mxu0 %v4348_v56  ;;  %3263 = vmatpush3.bf16.msra.mxu1 %v3627_v22 }
 0x401   : > { %v3129_v35 = vpop.f32.mrf.mxu1 }
 0x402   : > { %v2344_v37 = vmax.f32 %v2302_v34, 0.0  ;;  %v3130_v0 = vadd.f32 %v3129_v35, %v3128_v49 }
 0x403   : > { %v3131_v38 = vpop.f32.mrf.mxu1  ;;  %3223 = vmatpush3.bf16.msra.mxu0 %v4348_v56 }
 0x404   : > { %v2357_v39 = vpack.c.bf16 %v2344_v37, %v2343_v36  ;;  %3224 = vmatprep.subr.bf16.mxu0 %v4351_v57  ;;  %v2307_v41 = vadd.f32 %v3130_v0, %v4359_v62 }
 0x405   : > { %v3132_v40 = vpop.f32.mrf.mxu1 }
 0x406   : > { %v3133_v42 = vadd.f32 %v3132_v40, %v3131_v38  ;;  %3205 = vmatmul.mubr.bf16.gmra.mxu0 %v2357_v39  ;;  %v2345_v53 = vmax.f32 %v2307_v41, 0.0 }
 0x407   : > { %v3134_v43 = vpop.f32.mrf.mxu1  ;;  %3225 = vmatpush3.bf16.msra.mxu0 %v4351_v57 }
 0x408   : > { %v2310_v47 = vadd.f32 %v3133_v42, %v4359_v62  ;;  %3226 = vmatprep.subr.bf16.mxu0 %v3625_v20 }
 0x409   : > { %v3135_v60 = vpop.f32.mrf.mxu1 }
 0x40a   : > { %v2346_v59 = vmax.f32 %v2310_v47, 0.0  ;;  %v3136_v48 = vadd.f32 %v3135_v60, %v3134_v43 }
 0x40b   : > { %v3137_v54 = vpop.f32.mrf.mxu1  ;;  %3227 = vmatpush3.bf16.msra.mxu0 %v3625_v20 }
 0x40c   : > { %v2358_v55 = vpack.c.bf16 %v2346_v59, %v2345_v53  ;;  %v2315_v52 = vadd.f32 %v3136_v48, %v4359_v62  ;;  %3228 = vmatprep.subr.bf16.mxu0 %v3626_v21 }
 0x40d   : > { %v3138_v51 = vpop.f32.mrf.mxu1 }
 0x40e   : > { %v3139_v56 = vadd.f32 %v3138_v51, %v3137_v54  ;;  %3208 = vmatprep.mubr.bf16.mxu0 %v2358_v55  ;;  %v2347_v63 = vmax.f32 %v2315_v52, 0.0 }
 0x40f   : > { %v3140_v44 = vpop.f32.mrf.mxu1  ;;  %3229 = vmatpush3.bf16.msra.mxu0 %v3626_v21 }
 0x410   : > { %v2318_v58 = vadd.f32 %v3139_v56, %v4359_v62  ;;  %3230 = vmatprep.subr.bf16.mxu0 %v3627_v22 }
 0x411   : > { %v3141_v61 = vpop.f32.mrf.mxu1 }
 0x412   : > { %v2348_v1 = vmax.f32 %v2318_v58, 0.0  ;;  %v3142_v57 = vadd.f32 %v3141_v61, %v3140_v44 }
 0x413   : > { %v3143_v2 = vpop.f32.mrf.mxu1  ;;  %3231 = vmatpush3.bf16.msra.mxu0 %v3627_v22 }
 0x414   : > { %v2359_v3 = vpack.c.bf16 %v2348_v1, %v2347_v63  ;;  %v2323_v5 = vadd.f32 %v3142_v57, %v4359_v62 }
 0x415   : > { %v3144_v4 = vpop.f32.mrf.mxu1 }
 0x416   : > { %v3145_v6 = vadd.f32 %v3144_v4, %v3143_v2  ;;  %3209 = vmatmul.mubr.bf16.gmra.mxu0 %v2359_v3  ;;  %v2349_v45 = vmax.f32 %v2323_v5, 0.0 }
 0x417   : > { %v3146_v7 = vpop.f32.mrf.mxu1 }
 0x418   : > { %v2326_v8 = vadd.f32 %v3145_v6, %v4359_v62 }
 0x419   : > { %v3147_v9 = vpop.f32.mrf.mxu1 }
 0x41a   : > { %v2350_v10 = vmax.f32 %v2326_v8, 0.0  ;;  %v3148_v46 = vadd.f32 %v3147_v9, %v3146_v7 }
 0x41b   : > { %v3149_v11 = vpop.f32.mrf.mxu1 }
 0x41c   : > { %v2360_v12 = vpack.c.bf16 %v2350_v10, %v2349_v45  ;;  %v2331_v14 = vadd.f32 %v3148_v46, %v4359_v62 }
 0x41d   : > { %v3150_v13 = vpop.f32.mrf.mxu1 }
 0x41e   : > { %v3151_v15 = vadd.f32 %v3150_v13, %v3149_v11  ;;  %3212 = vmatprep.mubr.bf16.mxu0 %v2360_v12  ;;  %v2351_v17 = vmax.f32 %v2331_v14, 0.0 }
 0x420   : > { %v2334_v16 = vadd.f32 %v3151_v15, %v4359_v62 }
 0x422   : > { %v2352_v18 = vmax.f32 %v2334_v16, 0.0  ;;  %v3072_v16 = vld [vmem:[%s4464_s7 + $0xa] ss:$0 sm:$0xff] }
 0x424   : > { %v2361_v19 = vpack.c.bf16 %v2352_v18, %v2351_v17 }
 0x426   : > { %3213 = vmatmul.mubr.bf16.gmra.mxu0 %v2361_v19 }
 0x4b6   : > { %v3202_v62 = vpop.f32.mrf.mxu0 }
 0x4b7   : > { %v2475_v28 = vadd.f32 %v3202_v62, %v3063_v24 }
 0x4b8   : > { %v2466_v23 = vpop.f32.mrf.mxu0 }
 0x4b9   : > { %v2467_v26 = vadd.f32 %v3063_v24, %v2466_v23  ;;  %v2531_v33 = vmax.f32 %v2475_v28, 0.0 }
 0x4ba   : > { %v3203_v25 = vpop.f32.mrf.mxu0 }
 0x4bb   : > { %v2478_v27 = vadd.f32 %v3203_v25, %v3063_v24  ;;  %v2529_v32 = vmax.f32 %v2467_v26, 0.0 }
 0x4bc   : > { %v2469_v29 = vpop.f32.mrf.mxu0 }
 0x4bd   : > { %v2470_v30 = vadd.f32 %v3063_v24, %v2469_v29  ;;  %v2532_v31 = vmax.f32 %v2478_v27, 0.0 }
 0x4bf   : > { %v2530_v50 = vmax.f32 %v2470_v30, 0.0  ;;  %v2547_v34 = vpack.c.bf16 %v2532_v31, %v2531_v33 }
 0x4c1   : > { %v2546_v49 = vpack.c.bf16 %v2530_v50, %v2529_v32 }
 0x4c3   : > { %3232 = vmatprep.mubr.bf16.mxu0 %v2546_v49 }
 0x4c4   : > { %3233 = vmatmul.mubr.bf16.vlgmr.msra.gmra.mxu0 %v2547_v34 }
 0x4c6   : > { %v3206_v35 = vpop.f32.mrf.mxu0 }
 0x4c7   : > { %v2491_v39 = vadd.f32 %v3206_v35, %v3063_v24 }
 0x4c8   : > { %v2482_v36 = vpop.f32.mrf.mxu0 }
 0x4c9   : > { %v2483_v0 = vadd.f32 %v3063_v24, %v2482_v36  ;;  %v2535_v60 = vmax.f32 %v2491_v39, 0.0 }
 0x4ca   : > { %v3207_v37 = vpop.f32.mrf.mxu0 }
 0x4cb   : > { %v2494_v38 = vadd.f32 %v3207_v37, %v3063_v24  ;;  %v2533_v43 = vmax.f32 %v2483_v0, 0.0 }
 0x4cc   : > { %v2485_v40 = vpop.f32.mrf.mxu0 }
 0x4cd   : > { %v2486_v41 = vadd.f32 %v3063_v24, %v2485_v40  ;;  %v2536_v42 = vmax.f32 %v2494_v38, 0.0 }
 0x4cf   : > { %v2534_v47 = vmax.f32 %v2486_v41, 0.0  ;;  %v2549_v59 = vpack.c.bf16 %v2536_v42, %v2535_v60 }
 0x4d1   : > { %v2548_v53 = vpack.c.bf16 %v2534_v47, %v2533_v43 }
 0x4d3   : > { %3236 = vmatprep.mubr.bf16.mxu0 %v2548_v53 }
 0x4d4   : > { %3237 = vmatmul.mubr.bf16.gmra.mxu0 %v2549_v59 }
 0x4d6   : > { %v3210_v48 = vpop.f32.mrf.mxu0 }
 0x4d7   : > { %v2507_v56 = vadd.f32 %v3210_v48, %v3063_v24 }
 0x4d8   : > { %v2498_v54 = vpop.f32.mrf.mxu0 }
 0x4d9   : > { %v2499_v51 = vadd.f32 %v3063_v24, %v2498_v54  ;;  %v2539_v57 = vmax.f32 %v2507_v56, 0.0 }
 0x4da   : > { %v3211_v55 = vpop.f32.mrf.mxu0 }
 0x4db   : > { %v2510_v52 = vadd.f32 %v3211_v55, %v3063_v24  ;;  %v2537_v63 = vmax.f32 %v2499_v51, 0.0 }
 0x4dc   : > { %v2501_v44 = vpop.f32.mrf.mxu0 }
 0x4dd   : > { %v2502_v58 = vadd.f32 %v3063_v24, %v2501_v44  ;;  %v2540_v61 = vmax.f32 %v2510_v52, 0.0 }
 0x4df   : > { %v2538_v1 = vmax.f32 %v2502_v58, 0.0  ;;  %v2551_v3 = vpack.c.bf16 %v2540_v61, %v2539_v57 }
 0x4e1   : > { %v2550_v2 = vpack.c.bf16 %v2538_v1, %v2537_v63 }
 0x4e3   : > { %3240 = vmatprep.mubr.bf16.mxu1 %v2550_v2 }
 0x4e4   : > { %3241 = vmatmul.mubr.bf16.vlgmr.msra.gmra.mxu1 %v2551_v3 }
 0x4e6   : > { %v3214_v4 = vpop.f32.mrf.mxu0 }
 0x4e7   : > { %v2523_v9 = vadd.f32 %v3214_v4, %v3063_v24 }
 0x4e8   : > { %v2514_v5 = vpop.f32.mrf.mxu0 }
 0x4e9   : > { %v2515_v7 = vadd.f32 %v3063_v24, %v2514_v5  ;;  %v2543_v13 = vmax.f32 %v2523_v9, 0.0 }
 0x4ea   : > { %v3215_v6 = vpop.f32.mrf.mxu0 }
 0x4eb   : > { %v2526_v8 = vadd.f32 %v3215_v6, %v3063_v24  ;;  %v2541_v11 = vmax.f32 %v2515_v7, 0.0 }
 0x4ec   : > { %v2517_v45 = vpop.f32.mrf.mxu0 }
 0x4ed   : > { %v2518_v10 = vadd.f32 %v3063_v24, %v2517_v45  ;;  %v2544_v46 = vmax.f32 %v2526_v8, 0.0 }
 0x4ef   : > { %v2542_v12 = vmax.f32 %v2518_v10, 0.0  ;;  %v2553_v15 = vpack.c.bf16 %v2544_v46, %v2543_v13 }
 0x4f1   : > { %v2552_v14 = vpack.c.bf16 %v2542_v12, %v2541_v11 }
 0x4f3   : > { %3244 = vmatprep.mubr.bf16.mxu1 %v2552_v14 }
 0x4f4   : > { %3245 = vmatmul.mubr.bf16.gmra.mxu1 %v2553_v15 }
 0x584   : > { %v3234_v17 = vpop.f32.mrf.mxu0 }
 0x585   : > { %v2667_v18 = vadd.f32 %v3234_v17, %v3072_v16 }
 0x586   : > { %v2658_v19 = vpop.f32.mrf.mxu0 }
 0x587   : > { %2723 = vst [vmem:[%s4389_s17 + $0x10] sm:$0xff] %v2667_v18  ;;  %v2659_v20 = vadd.f32 %v3072_v16, %v2658_v19 }
 0x588   : > { %v3235_v21 = vpop.f32.mrf.mxu0 }
 0x589   : > { %2721 = vst [vmem:[%s4389_s17] sm:$0xff] %v2659_v20  ;;  %v2670_v22 = vadd.f32 %v3235_v21, %v3072_v16 }
 0x58a   : > { %v2661_v62 = vpop.f32.mrf.mxu0 }
 0x58b   : > { %2724 = vst [vmem:[%s4389_s17 + $0x18] sm:$0xff] %v2670_v22  ;;  %v2662_v23 = vadd.f32 %v3072_v16, %v2661_v62 }
 0x58d   : > { %2722 = vst [vmem:[%s4389_s17 + $0x8] sm:$0xff] %v2662_v23 }
 0x594   : > { %v3238_v24 = vpop.f32.mrf.mxu0 }
 0x595   : > { %v2683_v25 = vadd.f32 %v3238_v24, %v3072_v16 }
 0x596   : > { %v2674_v26 = vpop.f32.mrf.mxu0 }
 0x597   : > { %2727 = vst [vmem:[%s4389_s17 + $0x30] sm:$0xff] %v2683_v25  ;;  %v2675_v27 = vadd.f32 %v3072_v16, %v2674_v26 }
 0x598   : > { %v3239_v28 = vpop.f32.mrf.mxu0 }
 0x599   : > { %2725 = vst [vmem:[%s4389_s17 + $0x20] sm:$0xff] %v2675_v27  ;;  %v2686_v29 = vadd.f32 %v3239_v28, %v3072_v16 }
 0x59a   : > { %v2677_v30 = vpop.f32.mrf.mxu0 }
 0x59b   : > { %2728 = vst [vmem:[%s4389_s17 + $0x38] sm:$0xff] %v2686_v29  ;;  %v2678_v31 = vadd.f32 %v3072_v16, %v2677_v30 }
 0x59d   : > { %2726 = vst [vmem:[%s4389_s17 + $0x28] sm:$0xff] %v2678_v31 }
 0x5a4   : > { %v3242_v32 = vpop.f32.mrf.mxu1 }
 0x5a5   : > { %v2699_v50 = vadd.f32 %v3242_v32, %v3072_v16 }
 0x5a6   : > { %v2690_v33 = vpop.f32.mrf.mxu1 }
 0x5a7   : > { %2731 = vst [vmem:[%s4389_s17 + $0x50] sm:$0xff] %v2699_v50  ;;  %v2691_v49 = vadd.f32 %v3072_v16, %v2690_v33 }
 0x5a8   : > { %v3243_v34 = vpop.f32.mrf.mxu1 }
 0x5a9   : > { %2729 = vst [vmem:[%s4389_s17 + $0x40] sm:$0xff] %v2691_v49  ;;  %v2702_v35 = vadd.f32 %v3243_v34, %v3072_v16 }
 0x5aa   : > { %v2693_v36 = vpop.f32.mrf.mxu1 }
 0x5ab   : > { %2732 = vst [vmem:[%s4389_s17 + $0x58] sm:$0xff] %v2702_v35  ;;  %v2694_v37 = vadd.f32 %v3072_v16, %v2693_v36 }
 0x5ad   : > { %2730 = vst [vmem:[%s4389_s17 + $0x48] sm:$0xff] %v2694_v37 }
 0x5b4   : > { %v3246_v0 = vpop.f32.mrf.mxu1 }
 0x5b5   : > { %v2715_v38 = vadd.f32 %v3246_v0, %v3072_v16 }
 0x5b6   : > { %v2706_v39 = vpop.f32.mrf.mxu1 }
 0x5b7   : > { %2735 = vst [vmem:[%s4389_s17 + $0x70] sm:$0xff] %v2715_v38  ;;  %v2707_v40 = vadd.f32 %v3072_v16, %v2706_v39 }
 0x5b8   : > { %v3247_v41 = vpop.f32.mrf.mxu1 }
 0x5b9   : > { %2733 = vst [vmem:[%s4389_s17 + $0x60] sm:$0xff] %v2707_v40  ;;  %v2718_v42 = vadd.f32 %v3247_v41, %v3072_v16 }
 0x5ba   : > { %v2709_v43 = vpop.f32.mrf.mxu1 }
 0x5bb   : > { %2736 = vst [vmem:[%s4389_s17 + $0x78] sm:$0xff] %v2718_v42  ;;  %v2710_v47 = vadd.f32 %v3072_v16, %v2709_v43 }
 0x5bd   : > { %2734 = vst [vmem:[%s4389_s17 + $0x68] sm:$0xff] %v2710_v47 }
 0x5be   : > { %3825 = shalt.err (!%p3822_p3)
}
 0x5bf   : > { %s3826_s23 = scalar_lea.hbm %s4410_s25, 2048  ;;  %s3830_s20 = scalar_lea.hbm %s4465_s8, 4096 }
 0x5c0   : > { %p3827_p6 = scmp.ne.s32.totalorder %s4410_s25, %s3826_s23  ;;  %p3831_p11 = scmp.lt.s32.totalorder %s4410_s25, %s4465_s8 }
 0x5c1   : > { %p3832_p7 = scmp.lt.s32.totalorder %s3830_s20, %s3826_s23 }
 0x5c2   : > { %p3828_p10 = pnand %p3827_p6, %p4494_p5 }
 0x5c3   : > { %p3833_p0 = por %p3832_p7, %p3831_p11 }
 0x5c4   : > { %p3829_p12 = pneg %p3828_p10 }
 0x5c6   : > { %p3834_p2 = pnand %p3833_p0, %p3829_p12 }
 0x5c8   : > { %3837 = shalt.err (!%p3834_p2)
}
 0x5c9   : > { %s3905_s21 = smov 128   ;;  %s3906_s10 = smov 8  }
 0x5ca   : > { %3290 = dma.vmem_to_hbm [thread:$0]  (%p4494_p5), %s4412_s12, 2048, %s4410_s25, %s2738_s26, %s3905_s21, %s3905_s21, %s3906_s10  }
 0x5cb PF: > { %s2766_s11 = sand.u32 1, %s3876_s27   ;;  %p4495_p9 = scmp.ne.s32.totalorder %s4482_s19, 0 }
 0x5cc   : > { %p4496_p8 = scmp.ge.s32.totalorder %s3888_s30, 2  ;;  %s2767_s15 = scalar_lea.sflag [#allocation4], %s2766_s11 }
 0x5ce   : > { %p3316_p4 = pnand %p4496_p8, %p4495_p9 }
 0x5d0   : > { %p3317_p13 = pneg %p3316_p4 }
 0x5d2   : > { %3871 = dma.done.wait (%p3317_p13), %s2767_s15, 2048  }
 0x5d3   : > { %3873 = vsyncadd (%p3317_p13), %s2767_s15, 4294965248  ;;  %p24_p1 = scmp.ge.s32.totalorder %s4056_s18, 4   ;;  %s4497_s27 = smov %s3880_s28 }
 0x5d4   : > { %s4498_s28 = smov %s3884_s29  ;;  %s4499_s29 = smov %s4067_s9 }
 0x5d5   : > { %s4500_s30 = smov %s4056_s18  ;;  %26 = sbr.rel (!%p24_p1) target bundleno = 11 (0xb), region = 121 }
 0x5da   :  { %2772 = vsyncpa [#allocation3], 1 }
 0x5db   :  { %2774 = vsyncpa [#allocation3 + $0x1], 1 }
 0x5dc   :  { %2775 = vsyncpa [#allocation6], 1 }
 0x5dd   :  { %2776 = vsyncpa [#allocation9], 1 }
 0x5de   :  { %2777 = vsyncpa [#allocation12], 1 }
 0x5df   :  { %2778 = vsyncpa [#allocation4], 1 }
 0x5e0   :  { %2780 = vsyncpa [#allocation4 + $0x1], 1 }

// kernel: tpu_custom_call.1
= control target key start
LH: loop header
LB: loop body
LE: loop exit
PB: predicated region body
PF: predicated region fallthrough
CT: control target
= control target key end

     0   :  { %s4457_s0 = inlined_call_operand.hbm [shape: f32[256,128], index: 0, kind: input, shape index: {}]   ;;  %s4458_s1 = inlined_call_operand.hbm [shape: bf16[128,256], index: 1, kind: input, shape index: {}]   ;;  %s4459_s2 = inlined_call_operand.hbm [shape: bf16[256,512], index: 2, kind: input, shape index: {}]   ;;  %s4460_s3 = inlined_call_operand.hbm [shape: bf16[512,256], index: 3, kind: input, shape index: {}]   ;;  %s4461_s4 = inlined_call_operand.hbm [shape: bf16[256,128], index: 4, kind: input, shape index: {}]   ;;  %s4462_s5 = inlined_call_operand.hbm [shape: bf16[128,128], index: 5, kind: input, shape index: {}]   ;;  %s4463_s6 = inlined_call_operand.hbm [shape: bf16[128,128], index: 6, kind: input, shape index: {}]   ;;  %s4464_s7 = inlined_call_operand.vmem [shape: f32[1,1408], index: 7, kind: input, shape index: {}]   ;;  %s4465_s8 = inlined_call_operand.hbm [shape: f32[256,128], index: 8, kind: output, shape index: {}]  }
   0x1   :  { %4472 = sst [smem:[#allocation20_spill]] %s4458_s1 }
   0x2   :  { %4473 = sst [smem:[#allocation21_spill]] %s4459_s2 }
   0x3   :  { %13 = vsyncpa [#allocation3], 0 }
   0x4   :  { %15 = vsyncpa [#allocation3 + $0x1], 0 }
   0x5   :  { %16 = vsyncpa [#allocation6], 0 }
   0x6   :  { %17 = vsyncpa [#allocation9], 0 }
   0x7   :  { %18 = vsyncpa [#allocation12], 0 }
   0x8   :  { %19 = vsyncpa [#allocation4], 0 }
   0x9   :  { %21 = vsyncpa [#allocation4 + $0x1], 0  ;;  %s3952_s27 = smov 0   ;;  %s3954_s28 = smov 0  }
   0xa   :  { %s3956_s29 = smov 0   ;;  %s3958_s30 = smov 0  }
   0xb LB: > { %s3890_s9 = smov [#allocation5]   ;;  %s3973_s11 = sadd.s32 4294967295, %s3888_s30   ;;  %s3888_s30 = sphi %s3958_s30, %s4500_s30   ;;  %s3884_s29 = sphi %s3956_s29, %s4499_s29   ;;  %s3880_s28 = sphi %s3954_s28, %s4498_s28   ;;  %s3876_s27 = sphi %s3952_s27, %s4497_s27  }
   0xc   : > { %s243_s10 = sshll.u32 %s3890_s9, 4  ;;  %p2882_p0 = scmp.ge.s32.totalorder %s3888_s30, 1  ;;  %s244_s10 = int_to_ptr.vmem [resolvable:$true] %s243_s10 }
   0xd   : > { %p4468_p1 = scmp.eq.s32.totalorder %s3973_s11, 0  ;;  %p231_p2 = scmp.lt.s32.totalorder %s3888_s30, 3 }
   0xe   : > { %s3891_s13 = smov [#allocation8]   ;;  %s3892_s16 = smov [#allocation11]  }
   0xf   : > { %p3978_p3 = pnand %p2882_p0, %p231_p2  ;;  %s269_s14 = sshll.u32 %s3891_s13, 4  ;;  %s270_s14 = int_to_ptr.vmem [resolvable:$true] %s269_s14 }
  0x10   : > { %s295_s17 = sshll.u32 %s3892_s16, 4  ;;  %s3639_s19 = scalar_lea.vmem %s244_s10, 2048  ;;  %s296_s17 = int_to_ptr.vmem [resolvable:$true] %s295_s17 }
  0x11   : > { %s4474_s12 = scalar_select %p3978_p3, 1, 0 }
  0x12   : > { %p3292_p5 = pneg %p3978_p3  ;;  %p3640_p8 = scmp.ne.s32.totalorder %s244_s10, %s3639_s19 }
  0x13   : > { %p3647_p11 = scmp.lt.s32.totalorder %s244_s10, %s244_s10  ;;  %p3648_p12 = scmp.lt.s32.totalorder %s3639_s19, %s3639_s19 }
  0x14   : > { %p3987_p6 = pnand %p3292_p5, %p4468_p1 }
  0x15   : > { %p3649_p13 = por %p3648_p12, %p3647_p11 }
  0x16   : > { %p3993_p7 = pneg %p3987_p6 }
  0x18   : > { %p3642_p9 = pnand %p3640_p8, %p3993_p7 }
  0x1a   : > { %p3643_p10 = pneg %p3642_p9 }
  0x1c   : > { %p3650_p0 = pnand %p3649_p13, %p3643_p10 }
  0x1e   : > { %3653 = shalt.err (!%p3650_p0)
}
  0x1f   : > { %s4466_s20 = smov 128   ;;  %s4467_s21 = smov 8  }
  0x20   : > { %s4477_s1 = sld [smem:[#allocation20_spill]]  ;;  %s3665_s24 = scalar_lea.vmem %s270_s14, 8192 }
  0x21   : > { %p3666_p2 = scmp.ne.s32.totalorder %s270_s14, %s3665_s24  ;;  %p3673_p9 = scmp.lt.s32.totalorder %s270_s14, %s270_s14 }
  0x22   : > { %p3674_p10 = scmp.lt.s32.totalorder %s3665_s24, %s3665_s24 }
  0x23   : > { %p3668_p5 = pnand %p3666_p2, %p3993_p7 }
  0x24   : > { %p3675_p11 = por %p3674_p10, %p3673_p9 }
  0x25   : > { %p3669_p8 = pneg %p3668_p5 }
  0x26   : > { %3295 = dma.hbm_to_vmem [thread:$0]  (!%p3987_p6), %s4477_s1, 2048, %s244_s10, [#allocation6], %s4466_s20, %s4466_s20, %s4467_s21  }
  0x27   : > { %p3676_p12 = pnand %p3675_p11, %p3669_p8 }
  0x29   : > { %3679 = shalt.err (!%p3676_p12)
}
  0x2a   : > { %3301 = dma.hbm_to_vmem [thread:$0]  (!%p3987_p6), %s4460_s3, 8192, %s270_s14, [#allocation9], %s4466_s20, %s4466_s20, %s4467_s21  }
  0x2b   : > { %s3691_s9 = scalar_lea.vmem %s296_s17, 1024  ;;  %p3699_p5 = scmp.lt.s32.totalorder %s296_s17, %s296_s17 }
  0x2c   : > { %p3692_p13 = scmp.ne.s32.totalorder %s296_s17, %s3691_s9  ;;  %p3700_p9 = scmp.lt.s32.totalorder %s3691_s9, %s3691_s9 }
  0x2e   : > { %p3694_p0 = pnand %p3692_p13, %p3993_p7  ;;  %p3701_p8 = por %p3700_p9, %p3699_p5 }
  0x30   : > { %p3695_p2 = pneg %p3694_p0 }
  0x32   : > { %p3702_p10 = pnand %p3701_p8, %p3695_p2 }
  0x34   : > { %3705 = shalt.err (!%p3702_p10)
}
  0x35   : > { %s3895_s10 = smov 64   ;;  %s3896_s13 = smov 4  }
  0x36   : > { %3307 = dma.hbm_to_vmem [thread:$0]  (!%p3987_p6), %s4462_s5, 1024, %s296_s17, [#allocation12], %s3895_s10, %s3895_s10, %s3896_s13  }
  0x37   : > { %s3897_s19 = smov [#allocation7]  }
  0x38   : > { %s256_s22 = sshll.u32 %s3897_s19, 4  ;;  %s257_s22 = int_to_ptr.vmem [resolvable:$true] %s256_s22 }
  0x39   : > { %s3717_s23 = scalar_lea.vmem %s257_s22, 8192  ;;  %p3725_p0 = scmp.lt.s32.totalorder %s257_s22, %s257_s22 }
  0x3a   : > { %p3718_p11 = scmp.ne.s32.totalorder %s257_s22, %s3717_s23  ;;  %p3726_p2 = scmp.lt.s32.totalorder %s3717_s23, %s3717_s23 }
  0x3c   : > { %p3720_p12 = pnand %p3718_p11, %p3993_p7  ;;  %p3727_p5 = por %p3726_p2, %p3725_p0 }
  0x3e   : > { %p3721_p13 = pneg %p3720_p12 }
  0x40   : > { %p3728_p9 = pnand %p3727_p5, %p3721_p13 }
  0x42   : > { %3731 = shalt.err (!%p3728_p9)
}
  0x43   : > { %s3898_s24 = smov 256   ;;  %s3899_s25 = smov 16  }
  0x44   : > { %s4478_s2 = sld [smem:[#allocation21_spill]]  ;;  %s3900_s9 = smov [#allocation10]  }
  0x45   : > { %s282_s14 = sshll.u32 %s3900_s9, 4  ;;  %s3901_s16 = smov [#allocation13]   ;;  %s283_s14 = int_to_ptr.vmem [resolvable:$true] %s282_s14 }
  0x46   : > { %s308_s19 = sshll.u32 %s3901_s16, 4  ;;  %s3743_s20 = scalar_lea.vmem %s283_s14, 2048  ;;  %s309_s19 = int_to_ptr.vmem [resolvable:$true] %s308_s19 }
  0x47   : > { %p3744_p8 = scmp.ne.s32.totalorder %s283_s14, %s3743_s20  ;;  %p3751_p12 = scmp.lt.s32.totalorder %s283_s14, %s283_s14 }
  0x48   : > { %p3752_p13 = scmp.lt.s32.totalorder %s3743_s20, %s3743_s20 }
  0x49   : > { %p3746_p10 = pnand %p3744_p8, %p3993_p7 }
  0x4a   : > { %3298 = dma.hbm_to_vmem [thread:$0]  (!%p3987_p6), %s4478_s2, 8192, %s257_s22, [#allocation6], %s3898_s24, %s3898_s24, %s3899_s25  }
  0x4b   : > { %p3747_p11 = pneg %p3746_p10  ;;  %p3753_p0 = por %p3752_p13, %p3751_p12 }
  0x4d   : > { %p3754_p2 = pnand %p3753_p0, %p3747_p11 }
  0x4f   : > { %3757 = shalt.err (!%p3754_p2)
}
  0x50   : > { %3304 = dma.hbm_to_vmem [thread:$0]  (!%p3987_p6), %s4461_s4, 2048, %s283_s14, [#allocation9], %s3895_s10, %s3895_s10, %s3896_s13  }
  0x51   : > { %s3769_s24 = scalar_lea.vmem %s309_s19, 1024  ;;  %p3777_p10 = scmp.lt.s32.totalorder %s309_s19, %s309_s19 }
  0x52   : > { %p3770_p5 = scmp.ne.s32.totalorder %s309_s19, %s3769_s24  ;;  %p3778_p4 = scmp.lt.s32.totalorder %s3769_s24, %s3769_s24 }
  0x54   : > { %p3772_p9 = pnand %p3770_p5, %p3993_p7  ;;  %p3779_p12 = por %p3778_p4, %p3777_p10 }
  0x56   : > { %p3773_p8 = pneg %p3772_p9 }
  0x58   : > { %p3780_p11 = pnand %p3779_p12, %p3773_p8 }
  0x5a   : > { %3783 = shalt.err (!%p3780_p11)
}
  0x5b   : > { %3310 = dma.hbm_to_vmem [thread:$0]  (!%p3987_p6), %s4463_s6, 1024, %s309_s19, [#allocation12], %s3895_s10, %s3895_s10, %s3896_s13  }
  0x5c   : > { %s2881_s15 = sadd.s32 4294967294, %s3888_s30   ;;  %s4056_s18 = sadd.s32 1, %s3888_s30  }
  0x5d   : > { %s31_s26 = ssub.s32 %s3888_s30, %s4056_s18  ;;  %s34_s17 = sadd.s32 1, %s3884_s29 }
  0x5e   : > { %p32_p4 = scmp.eq.s32.totalorder %s31_s26, 0  ;;  %p41_p7 = scmp.ne.s32.totalorder %s3884_s29, %s3880_s28 }
  0x5f   : > { %p42_p13 = scmp.eq.s32.totalorder %s3888_s30, 0  ;;  %p47_p0 = scmp.ne.s32.totalorder %s3880_s28, %s3876_s27 }
  0x60   : > { %s4067_s9 = scalar_select %p32_p4, %s3884_s29, %s34_s17  }
  0x61   : > { %p4069_p2 = por %p42_p13, %p41_p7  ;;  %p4075_p6 = por %p4468_p1, %p47_p0 }
  0x62   : > { %p218_p5 = scmp.eq.s32.totalorder %s3973_s11, 1  ;;  %p224_p9 = scmp.eq.s32.totalorder %s2881_s15, 1 }
  0x63   : > { %s4480_s10 = scalar_select %p4075_p6, 1, 0 }
  0x64   : > { %p3325_p8 = scmp.lt.s32.totalorder %s3888_s30, 2  ;;  %s325_s13 = sand.u32 1, %s3884_s29  }
  0x65   : > { %p4082_p10 = por %p218_p5, %p41_p7  ;;  %p4086_p12 = por %p224_p9, %p47_p0 }
  0x66   : > { %s2890_s22 = sshll.u32 %s325_s13, 7  ;;  %s3086_s23 = sshll.u32 %s3888_s30, 11 }
  0x67   : > { %s4481_s16 = scalar_select %p4082_p10, 1, 0 }
  0x68   : > { %s4482_s19 = scalar_select %p4086_p12, 1, 0 }
  0x69   : > { %s4094_s25 = scalar_lea.hbm %s4457_s0, %s3086_s23  ;;  %s329_s15 = scalar_lea.vmem [#allocation2], %s2890_s22 }
  0x6a   : > { %s336_s26 = sshll.u32 %s329_s15, 4  ;;  %p4100_p11 = pnand %p3325_p8, %p4069_p2  ;;  %s4096_s26 = int_to_ptr.vmem [resolvable:$true] %s336_s26 }
  0x6b   : > { %s4104_s21 = scalar_lea.sflag [#allocation3], %s325_s13  ;;  %s3784_s1 = scalar_lea.hbm %s4094_s25, 2048 }
  0x6c   : > { %p3785_p4 = scmp.ne.s32.totalorder %s4094_s25, %s3784_s1  ;;  %p3786_p7 = pneg %p4100_p11 }
  0x6d   : > { %s3789_s22 = scalar_lea.hbm %s4457_s0, 4096  ;;  %p3790_p2 = scmp.lt.s32.totalorder %s4094_s25, %s4457_s0 }
  0x6e   : > { %p3787_p13 = pnand %p3786_p7, %p3785_p4  ;;  %p3791_p5 = scmp.lt.s32.totalorder %s3789_s22, %s3784_s1 }
  0x70   : > { %p3788_p0 = pneg %p3787_p13  ;;  %p3792_p9 = por %p3791_p5, %p3790_p2 }
  0x72   : > { %p3793_p8 = pnand %p3792_p9, %p3788_p0 }
  0x74   : > { %3796 = shalt.err (!%p3793_p8)
}
  0x75   : > { %s3797_s14 = scalar_lea.vmem %s4096_s26, 2048  ;;  %s3902_s13 = smov [#allocation2]  }
  0x76   : > { %p3798_p1 = scmp.ne.s32.totalorder %s4096_s26, %s3797_s14  ;;  %s3802_s2 = sshll.u32 %s3902_s13, 4  ;;  %s3803_s2 = int_to_ptr.vmem [resolvable:$false] %s3802_s2 }
  0x77   : > { %s3804_s23 = scalar_lea.vmem %s3803_s2, 4096  ;;  %p3805_p13 = scmp.lt.s32.totalorder %s4096_s26, %s3803_s2 }
  0x78   : > { %p3800_p12 = pnand %p3798_p1, %p3786_p7  ;;  %p3806_p10 = scmp.lt.s32.totalorder %s3804_s23, %s3797_s14 }
  0x7a   : > { %p3801_p4 = pneg %p3800_p12  ;;  %p3807_p6 = por %p3806_p10, %p3805_p13 }
  0x7c   : > { %p3808_p3 = pnand %p3807_p6, %p3801_p4 }
  0x7e   : > { %3811 = shalt.err (!%p3808_p3)
}
  0x7f   : > { %s4484_s1 = smov 8   ;;  %s4485_s24 = smov 128  }
  0x80   : > { %3314 = dma.hbm_to_vmem [thread:$0]  (!%p4100_p11), %s4094_s25, 2048, %s4096_s26, %s4104_s21, %s4485_s24, %s4485_s24, %s4484_s1  }
  0x81   : > { %p4486_p1 = scmp.ne.s32.totalorder %s4474_s12, 0 }
  0x82   : > { %s4131_s22 = sand.u32 (!%p4486_p1), 1, %s3880_s28   ;;  %p4487_p3 = scmp.ne.s32.totalorder (!%p4486_p1), %s4480_s10, 0 }
  0x83   : > { %348 = sbr.rel (%p4486_p1) target bundleno = 1483 (0x5cb), region = 52  ;;  %s2894_s2 = sshll.u32 (!%p4486_p1), %s4131_s22, 7 }
  0x84   : > { %s351_s20 = scalar_lea.sflag (!%p4486_p1), [#allocation3], %s4131_s22  ;;  %s4137_s17 = scalar_lea.vmem (!%p4486_p1), [#allocation2], %s2894_s2 }
  0x88   : > { %3855 = dma.done.wait (%p4487_p3), %s351_s20, 2048  }
  0x89   : > { %3857 = vsyncadd (%p4487_p3), %s351_s20, 4294965248  ;;  %p4488_p6 = scmp.eq.s32.totalorder %s3973_s11, 0 }
  0x8b   : > { %3859 = dma.done.wait (%p4488_p6), [#allocation6], 10240   ;;  %p4489_p10 = pmov %p4488_p6 }
  0x8c   : > { %p4490_p12 = pmov %p4488_p6 }
  0x8d   : > { %3861 = vsyncadd (%p4489_p10), [#allocation6], 4294957056 }
  0x8e   : > { %3863 = dma.done.wait (%p4490_p12), [#allocation9], 10240   ;;  %p4491_p11 = pmov %p4488_p6 }
  0x8f   : > { %p4492_p7 = pmov %p4488_p6 }
  0x90   : > { %3865 = vsyncadd (%p4491_p11), [#allocation9], 4294957056 }
  0x91   : > { %3867 = dma.done.wait (%p4492_p7), [#allocation12], 2048   ;;  %p4493_p0 = pmov %p4488_p6 }
  0x92   : > { %v3903_v0 = vmov 0   ;;  %v3380_v1 = vld [vmem:[#allocation5 + $0x74] ss:$8 sps:$4 sm:$0xff]   ;;  %v3382_v2 = vld [vmem:[#allocation5 + $0x70] ss:$8 sps:$4 sm:$0xff]   ;;  %v414_v24 = vld [vmem:[%s4137_s17] sm:$0xff] }
  0x93   : > { %3869 = vsyncadd (%p4493_p0), [#allocation12], 4294965248  ;;  %578 = vmatprep.mubr.bf16.mxu0 %v3903_v0  ;;  %546 = vmatprep.subr.bf16.mxu0 %v3380_v1  ;;  %v3383_v3 = vld [vmem:[#allocation5 + $0x64] ss:$8 sps:$4 sm:$0xff]   ;;  %v3385_v4 = vld [vmem:[#allocation5 + $0x60] ss:$8 sps:$4 sm:$0xff]  }
  0x94   : > { %547 = vmatpush1.bf16.msra.mxu0 %v3382_v2  ;;  %v3386_v5 = vld [vmem:[#allocation5 + $0x54] ss:$8 sps:$4 sm:$0xff]   ;;  %v3388_v6 = vld [vmem:[#allocation5 + $0x50] ss:$8 sps:$4 sm:$0xff]   ;;  %v3389_v7 = vld [vmem:[#allocation5 + $0x44] ss:$8 sps:$4 sm:$0xff]  }
  0x95   : > { %548 = vmatprep.subr.bf16.mxu0 %v3383_v3  ;;  %v3391_v8 = vld [vmem:[#allocation5 + $0x40] ss:$8 sps:$4 sm:$0xff]   ;;  %v3392_v9 = vld [vmem:[#allocation5 + $0x34] ss:$8 sps:$4 sm:$0xff]   ;;  %v3394_v10 = vld [vmem:[#allocation5 + $0x30] ss:$8 sps:$4 sm:$0xff]  }
  0x96   : > { %v3395_v11 = vld [vmem:[#allocation5 + $0x24] ss:$8 sps:$4 sm:$0xff]   ;;  %v3397_v13 = vld [vmem:[#allocation5 + $0x20] ss:$8 sps:$4 sm:$0xff]   ;;  %v3398_v16 = vld [vmem:[#allocation5 + $0x14] ss:$8 sps:$4 sm:$0xff]  }
  0x97   : > { %v3404_v12 = vld [vmem:[#allocation7 + $0xe4] ss:$16 sps:$4 sm:$0xff]   ;;  %v3409_v14 = vld [vmem:[#allocation7 + $0xe0] ss:$16 sps:$4 sm:$0xff]   ;;  %v415_v25 = vld [vmem:[%s4137_s17 + $0x8] sm:$0xff]  ;;  %s2738_s26 = scalar_lea.sflag [#allocation4], %s4131_s22 }
  0x98   : > { %549 = vmatpush1.bf16.msra.mxu0 %v3385_v4  ;;  %1113 = vmatprep.subr.bf16.mxu1 %v3404_v12  ;;  %v3410_v15 = vld [vmem:[#allocation7 + $0xc4] ss:$16 sps:$4 sm:$0xff]   ;;  %v3415_v17 = vld [vmem:[#allocation7 + $0xc0] ss:$16 sps:$4 sm:$0xff]   ;;  %v3408_v26 = vld [vmem:[#allocation7 + $0xec] ss:$16 sps:$4 sm:$0xff]   ;;  %v431_v29 = vpack.c.bf16 %v415_v25, %v414_v24 }
  0x99   : > { %550 = vmatprep.subr.bf16.mxu0 %v3386_v5  ;;  %1114 = vmatpush1.bf16.msra.mxu1 %v3409_v14  ;;  %v3416_v18 = vld [vmem:[#allocation7 + $0xa4] ss:$16 sps:$4 sm:$0xff]   ;;  %v3400_v19 = vld [vmem:[#allocation5 + $0x10] ss:$8 sps:$4 sm:$0xff]   ;;  %v3403_v23 = vld [vmem:[#allocation5] ss:$8 sps:$4 sm:$0xff]  }
  0x9a   : > { %1115 = vmatprep.subr.bf16.mxu1 %v3410_v15  ;;  %v3401_v20 = vld [vmem:[#allocation5 + $0x4] ss:$8 sps:$4 sm:$0xff]   ;;  %v3421_v21 = vld [vmem:[#allocation7 + $0xa0] ss:$16 sps:$4 sm:$0xff]   ;;  %v3406_v30 = vld [vmem:[#allocation7 + $0xe8] ss:$16 sps:$4 sm:$0xff]  }
  0x9b   : > { %v3422_v22 = vld [vmem:[#allocation7 + $0x84] ss:$16 sps:$4 sm:$0xff]   ;;  %v3427_v27 = vld [vmem:[#allocation7 + $0x80] ss:$16 sps:$4 sm:$0xff]   ;;  %v3414_v31 = vld [vmem:[#allocation7 + $0xcc] ss:$16 sps:$4 sm:$0xff]  }
  0x9c   : > { %551 = vmatpush1.bf16.msra.mxu0 %v3388_v6  ;;  %v3428_v28 = vld [vmem:[#allocation7 + $0x64] ss:$16 sps:$4 sm:$0xff]   ;;  %v3433_v32 = vld [vmem:[#allocation7 + $0x60] ss:$16 sps:$4 sm:$0xff]   ;;  %v417_v35 = vld [vmem:[%s4137_s17 + $0x18] sm:$0xff]  ;;  %p4494_p5 = scmp.ne.s32.totalorder %s4481_s16, 0 }
  0x9d   : > { %552 = vmatprep.subr.bf16.mxu0 %v3389_v7  ;;  %1116 = vmatpush1.bf16.msra.mxu1 %v3415_v17  ;;  %v3434_v33 = vld [vmem:[#allocation7 + $0x44] ss:$16 sps:$4 sm:$0xff]   ;;  %v3412_v36 = vld [vmem:[#allocation7 + $0xc8] ss:$16 sps:$4 sm:$0xff]   ;;  %v3420_v37 = vld [vmem:[#allocation7 + $0xac] ss:$16 sps:$4 sm:$0xff]  }
  0x9e   : > { %1117 = vmatprep.subr.bf16.mxu1 %v3416_v18  ;;  %v416_v34 = vld [vmem:[%s4137_s17 + $0x10] sm:$0xff]  ;;  %v3418_v41 = vld [vmem:[#allocation7 + $0xa8] ss:$16 sps:$4 sm:$0xff]   ;;  %v3426_v42 = vld [vmem:[#allocation7 + $0x8c] ss:$16 sps:$4 sm:$0xff]   ;;  %s3904_s15 = smov [#allocation14]  }
  0x9f   : > { %v3439_v38 = vld [vmem:[#allocation7 + $0x40] ss:$16 sps:$4 sm:$0xff]   ;;  %v3440_v39 = vld [vmem:[#allocation7 + $0x24] ss:$16 sps:$4 sm:$0xff]   ;;  %v432_v40 = vpack.c.bf16 %v417_v35, %v416_v34  ;;  %v419_v46 = vld [vmem:[%s4137_s17 + $0x28] sm:$0xff]  ;;  %s3816_s14 = sshll.u32 %s3904_s15, 4  ;;  %s3817_s14 = int_to_ptr.vmem [resolvable:$false] %s3816_s14 }
  0xa0   : > { %553 = vmatpush1.bf16.msra.mxu0 %v3391_v8  ;;  %v3445_v43 = vld [vmem:[#allocation7 + $0x20] ss:$16 sps:$4 sm:$0xff]   ;;  %v3446_v44 = vld [vmem:[#allocation7 + $0x4] ss:$16 sps:$4 sm:$0xff]   ;;  %v3424_v47 = vld [vmem:[#allocation7 + $0x88] ss:$16 sps:$4 sm:$0xff]  }
  0xa1   : > { %554 = vmatprep.subr.bf16.mxu0 %v3392_v9  ;;  %1118 = vmatpush1.bf16.msra.mxu1 %v3421_v21  ;;  %v418_v45 = vld [vmem:[%s4137_s17 + $0x20] sm:$0xff]  ;;  %v3432_v48 = vld [vmem:[#allocation7 + $0x6c] ss:$16 sps:$4 sm:$0xff]   ;;  %v3430_v52 = vld [vmem:[#allocation7 + $0x68] ss:$16 sps:$4 sm:$0xff]   ;;  %s3818_s13 = scalar_lea.vmem %s3817_s14, 4096 }
  0xa2   : > { %1119 = vmatprep.subr.bf16.mxu1 %v3422_v22  ;;  %v3451_v49 = vld [vmem:[#allocation7] ss:$16 sps:$4 sm:$0xff]   ;;  %v3452_v50 = vld [vmem:[#allocation7 + $0x1e4] ss:$16 sps:$4 sm:$0xff]   ;;  %v433_v51 = vpack.c.bf16 %v419_v46, %v418_v45  ;;  %v3438_v53 = vld [vmem:[#allocation7 + $0x4c] ss:$16 sps:$4 sm:$0xff]  }
  0xa3   : > { %v3457_v54 = vld [vmem:[#allocation7 + $0x1e0] ss:$16 sps:$4 sm:$0xff]   ;;  %v421_v56 = vld [vmem:[%s4137_s17 + $0x38] sm:$0xff]  ;;  %v3458_v57 = vld [vmem:[#allocation7 + $0x1c4] ss:$16 sps:$4 sm:$0xff]  }
  0xa4   : > { %555 = vmatpush1.bf16.msra.mxu0 %v3394_v10  ;;  %v420_v55 = vld [vmem:[%s4137_s17 + $0x30] sm:$0xff]  ;;  %v3436_v58 = vld [vmem:[#allocation7 + $0x48] ss:$16 sps:$4 sm:$0xff]   ;;  %v3444_v59 = vld [vmem:[#allocation7 + $0x2c] ss:$16 sps:$4 sm:$0xff]  }
  0xa5   : > { %556 = vmatprep.subr.bf16.mxu0 %v3395_v11  ;;  %1120 = vmatpush1.bf16.msra.mxu1 %v3427_v27  ;;  %v3463_v60 = vld [vmem:[#allocation7 + $0x1c0] ss:$16 sps:$4 sm:$0xff]   ;;  %v3464_v61 = vld [vmem:[#allocation7 + $0x1a4] ss:$16 sps:$4 sm:$0xff]   ;;  %v3442_v62 = vld [vmem:[#allocation7 + $0x28] ss:$16 sps:$4 sm:$0xff]   ;;  %v434_v63 = vpack.c.bf16 %v421_v56, %v420_v55 }
  0xa6   : > { %1121 = vmatprep.subr.bf16.mxu1 %v3428_v28  ;;  %v3450_v1 = vld [vmem:[#allocation7 + $0xc] ss:$16 sps:$4 sm:$0xff]   ;;  %v3469_v2 = vld [vmem:[#allocation7 + $0x1a0] ss:$16 sps:$4 sm:$0xff]   ;;  %v3470_v3 = vld [vmem:[#allocation7 + $0x184] ss:$16 sps:$4 sm:$0xff]  }
  0xa7   : > { %v422_v4 = vld [vmem:[%s4137_s17 + $0x40] sm:$0xff]  ;;  %v423_v5 = vld [vmem:[%s4137_s17 + $0x48] sm:$0xff]  ;;  %v424_v14 = vld [vmem:[%s4137_s17 + $0x50] sm:$0xff] }
  0xa8   : > { %557 = vmatpush1.bf16.msra.mxu0 %v3397_v13  ;;  %v3448_v6 = vld [vmem:[#allocation7 + $0x8] ss:$16 sps:$4 sm:$0xff]   ;;  %v3456_v7 = vld [vmem:[#allocation7 + $0x1ec] ss:$16 sps:$4 sm:$0xff]   ;;  %v3475_v8 = vld [vmem:[#allocation7 + $0x180] ss:$16 sps:$4 sm:$0xff]   ;;  %v435_v11 = vpack.c.bf16 %v423_v5, %v422_v4 }
  0xa9   : > { %558 = vmatprep.subr.bf16.mxu0 %v3398_v16  ;;  %1122 = vmatpush1.bf16.msra.mxu1 %v3433_v32  ;;  %v3476_v9 = vld [vmem:[#allocation7 + $0x164] ss:$16 sps:$4 sm:$0xff]   ;;  %v3454_v10 = vld [vmem:[#allocation7 + $0x1e8] ss:$16 sps:$4 sm:$0xff]   ;;  %v3462_v12 = vld [vmem:[#allocation7 + $0x1cc] ss:$16 sps:$4 sm:$0xff]  }
  0xaa   : > { %1123 = vmatprep.subr.bf16.mxu1 %v3434_v33  ;;  %v3481_v13 = vld [vmem:[#allocation7 + $0x160] ss:$16 sps:$4 sm:$0xff]   ;;  %v425_v15 = vld [vmem:[%s4137_s17 + $0x58] sm:$0xff]  ;;  %v427_v22 = vld [vmem:[%s4137_s17 + $0x68] sm:$0xff] }
  0xab   : > { %v3460_v16 = vld [vmem:[#allocation7 + $0x1c8] ss:$16 sps:$4 sm:$0xff]   ;;  %v3468_v17 = vld [vmem:[#allocation7 + $0x1ac] ss:$16 sps:$4 sm:$0xff]   ;;  %v426_v21 = vld [vmem:[%s4137_s17 + $0x60] sm:$0xff] }
  0xac   : > { %559 = vmatpush1.bf16.msra.mxu0 %v3400_v19  ;;  %v3466_v18 = vld [vmem:[#allocation7 + $0x1a8] ss:$16 sps:$4 sm:$0xff]   ;;  %v436_v19 = vpack.c.bf16 %v425_v15, %v424_v14  ;;  %v3480_v24 = vld [vmem:[#allocation7 + $0x16c] ss:$16 sps:$4 sm:$0xff]   ;;  %v428_v27 = vld [vmem:[%s4137_s17 + $0x70] sm:$0xff] }
  0xad   : > { %560 = vmatprep.subr.bf16.mxu0 %v3401_v20  ;;  %1124 = vmatpush1.bf16.msra.mxu1 %v3439_v38  ;;  %v3474_v20 = vld [vmem:[#allocation7 + $0x18c] ss:$16 sps:$4 sm:$0xff]   ;;  %v3478_v25 = vld [vmem:[#allocation7 + $0x168] ss:$16 sps:$4 sm:$0xff]   ;;  %v3487_v33 = vld [vmem:[#allocation7 + $0x140] ss:$16 sps:$4 sm:$0xff]  }
  0xae   : > { %1125 = vmatprep.subr.bf16.mxu1 %v3440_v39  ;;  %v429_v28 = vld [vmem:[%s4137_s17 + $0x78] sm:$0xff]  ;;  %v3488_v34 = vld [vmem:[#allocation7 + $0x124] ss:$16 sps:$4 sm:$0xff]   ;;  %v3509_v14 = vld [vmem:[#allocation8 + $0x160] ss:$8 sps:$4 sm:$0xff]   ;;  %s4389_s17 = scalar_lea.vmem [#allocation14], %s2894_s2 }
  0xaf   : > { %v3484_v32 = vld [vmem:[#allocation7 + $0x148] ss:$16 sps:$4 sm:$0xff]   ;;  %v3492_v35 = vld [vmem:[#allocation7 + $0x12c] ss:$16 sps:$4 sm:$0xff]   ;;  %s3087_s2 = sshll.u32 %s3973_s11, 11  ;;  %s2751_s12 = sshll.u32 %s4389_s17, 4  ;;  %s4412_s12 = int_to_ptr.vmem [resolvable:$true] %s2751_s12 }
  0xb0   : > { %561 = vmatpush1.bf16.msra.mxu0 %v3403_v23  ;;  %v3472_v23 = vld [vmem:[#allocation7 + $0x188] ss:$16 sps:$4 sm:$0xff]   ;;  %v3498_v38 = vld [vmem:[#allocation7 + $0x10c] ss:$16 sps:$4 sm:$0xff]   ;;  %s4410_s25 = scalar_lea.hbm %s4465_s8, %s3087_s2  ;;  %s3812_s11 = scalar_lea.vmem %s4412_s12, 2048 }
  0xb1   : > { %1226 = vmatprep.subr.bf16.mxu0 %v3408_v26  ;;  %1126 = vmatpush1.bf16.msra.mxu1 %v3445_v43  ;;  %v437_v26 = vpack.c.bf16 %v427_v22, %v426_v21  ;;  %v3496_v39 = vld [vmem:[#allocation7 + $0x108] ss:$16 sps:$4 sm:$0xff]   ;;  %v456_v43 = vlaneseq  ;;  %p3813_p2 = scmp.ne.s32.totalorder %s4412_s12, %s3812_s11  ;;  %p3819_p4 = scmp.lt.s32.totalorder %s4412_s12, %s3817_s14 }
  0xb2   : > { %1127 = vmatprep.subr.bf16.mxu1 %v3446_v44  ;;  %p3820_p13 = scmp.lt.s32.totalorder %s3818_s13, %s3812_s11 }
  0xb3   : > { %579 = vmatmul.mubr.bf16.vlgmr.msra.gmra.mxu0 %v431_v29  ;;  %v438_v29 = vpack.c.bf16 %v429_v28, %v428_v27  ;;  %v4179_v44 = vshrl.u32 %v456_v43, 7  ;;  %v3520_v28 = vld [vmem:[#allocation8 + $0x44] ss:$8 sps:$4 sm:$0xff]   ;;  %p3814_p9 = pnand %p3813_p2, %p4494_p5 }
  0xb4   : > { %588 = vmatprep.mubr.bf16.mxu0 %v3903_v0  ;;  %1227 = vmatpush1.bf16.msra.mxu0 %v3406_v30  ;;  %v3482_v30 = vld [vmem:[#allocation7 + $0x144] ss:$16 sps:$4 sm:$0xff]   ;;  %p3821_p1 = por %p3820_p13, %p3819_p4 }
  0xb5   : > { %1228 = vmatprep.subr.bf16.mxu0 %v3414_v31  ;;  %1128 = vmatpush1.bf16.msra.mxu1 %v3451_v49  ;;  %v3486_v31 = vld [vmem:[#allocation7 + $0x14c] ss:$16 sps:$4 sm:$0xff]   ;;  %v4182_v45 = vsub.s32 1, %v4179_v44  ;;  %v4185_v46 = vsub.s32 0, %v4179_v44  ;;  %p3815_p8 = pneg %p3814_p9 }
  0xb6   : > { %1129 = vmatprep.subr.bf16.mxu1 %v3452_v50 }
  0xb7   : > { %p3822_p3 = pnand %p3821_p1, %p3815_p8 }
  0xb8   : > { %1229 = vmatpush1.bf16.msra.mxu0 %v3412_v36  ;;  %v3490_v36 = vld [vmem:[#allocation7 + $0x128] ss:$16 sps:$4 sm:$0xff]  }
  0xb9   : > { %1230 = vmatprep.subr.bf16.mxu0 %v3420_v37  ;;  %1130 = vmatpush2.bf16.msra.mxu1 %v3457_v54  ;;  %v3493_v37 = vld [vmem:[#allocation7 + $0x120] ss:$16 sps:$4 sm:$0xff]  }
  0xba   : > { %1131 = vmatprep.subr.bf16.mxu1 %v3458_v57 }
  0xbb   : > { %589 = vmatmul.mubr.bf16.gmra.mxu0 %v432_v40  ;;  %v3499_v40 = vld [vmem:[#allocation7 + $0x100] ss:$16 sps:$4 sm:$0xff]  }
  0xbc   : > { %598 = vmatprep.mubr.bf16.mxu0 %v3903_v0  ;;  %1231 = vmatpush1.bf16.msra.mxu0 %v3418_v41  ;;  %v3502_v41 = vld [vmem:[#allocation8 + $0x74] ss:$8 sps:$4 sm:$0xff]  }
  0xbd   : > { %1232 = vmatprep.subr.bf16.mxu0 %v3426_v42  ;;  %1132 = vmatpush2.bf16.msra.mxu1 %v3463_v60  ;;  %v3505_v42 = vld [vmem:[#allocation8 + $0x174] ss:$8 sps:$4 sm:$0xff]  }
  0xbe   : > { %1133 = vmatprep.subr.bf16.mxu1 %v3464_v61 }
  0xc0   : > { %1233 = vmatpush1.bf16.msra.mxu0 %v3424_v47  ;;  %v430_v47 = vld [vmem:[%s4464_s7] sm:$0x3] }
  0xc1   : > { %1234 = vmatprep.subr.bf16.mxu0 %v3432_v48  ;;  %1134 = vmatpush2.bf16.msra.mxu1 %v3469_v2  ;;  %v4191_v49 = vrot.slane %v430_v47, %v4182_v45  ;;  %v4194_v50 = vrot.slane %v430_v47, %v4185_v46  ;;  %v3500_v2 = vld [vmem:[#allocation8 + $0x70] ss:$8 sps:$4 sm:$0xff]  }
  0xc2   : > { %1135 = vmatprep.subr.bf16.mxu1 %v3470_v3  ;;  %v3503_v3 = vld [vmem:[#allocation8 + $0x170] ss:$8 sps:$4 sm:$0xff]  }
  0xc3   : > { %599 = vmatmul.mubr.bf16.gmra.mxu0 %v433_v51 }
  0xc4   : > { %608 = vmatprep.mubr.bf16.mxu0 %v3903_v0  ;;  %1235 = vmatpush1.bf16.msra.mxu0 %v3430_v52 }
  0xc5   : > { %1236 = vmatprep.subr.bf16.mxu0 %v3438_v53  ;;  %1136 = vmatpush2.bf16.msra.mxu1 %v3475_v8 }
  0xc6   : > { %1137 = vmatprep.subr.bf16.mxu1 %v3476_v9 }
  0xc8   : > { %1237 = vmatpush1.bf16.msra.mxu0 %v3436_v58 }
  0xc9   : > { %1238 = vmatprep.subr.bf16.mxu0 %v3444_v59  ;;  %1138 = vmatpush2.bf16.msra.mxu1 %v3481_v13  ;;  %v3506_v13 = vld [vmem:[#allocation8 + $0x60] ss:$8 sps:$4 sm:$0xff]  }
  0xca   : > { %1139 = vmatprep.subr.bf16.mxu1 %v3482_v30 }
  0xcb   : > { %609 = vmatmul.mubr.bf16.gmra.mxu0 %v434_v63 }
  0xcc   : > { %618 = vmatprep.mubr.bf16.mxu0 %v3903_v0  ;;  %1239 = vmatpush1.bf16.msra.mxu0 %v3442_v62 }
  0xcd   : > { %1240 = vmatprep.subr.bf16.mxu0 %v3450_v1  ;;  %1140 = vmatpush2.bf16.msra.mxu1 %v3487_v33 }
  0xce   : > { %1141 = vmatprep.subr.bf16.mxu1 %v3488_v34 }
  0xd0   : > { %1241 = vmatpush1.bf16.msra.mxu0 %v3448_v6  ;;  %v3508_v6 = vld [vmem:[#allocation8 + $0x64] ss:$8 sps:$4 sm:$0xff]  }
  0xd1   : > { %1242 = vmatprep.subr.bf16.mxu0 %v3456_v7  ;;  %1142 = vmatpush2.bf16.msra.mxu1 %v3493_v37  ;;  %v3511_v7 = vld [vmem:[#allocation8 + $0x164] ss:$8 sps:$4 sm:$0xff]  }
  0xd3   : > { %619 = vmatmul.mubr.bf16.gmra.mxu0 %v435_v11 }
  0xd4   : > { %628 = vmatprep.mubr.bf16.mxu0 %v3903_v0  ;;  %1243 = vmatpush2.bf16.msra.mxu0 %v3454_v10 }
  0xd5   : > { %1244 = vmatprep.subr.bf16.mxu0 %v3462_v12 }
  0xd8   : > { %1245 = vmatpush2.bf16.msra.mxu0 %v3460_v16 }
  0xd9   : > { %1246 = vmatprep.subr.bf16.mxu0 %v3468_v17  ;;  %v3514_v17 = vld [vmem:[#allocation8 + $0x54] ss:$8 sps:$4 sm:$0xff]  }
  0xdb   : > { %629 = vmatmul.mubr.bf16.gmra.mxu0 %v436_v19 }
  0xdc   : > { %638 = vmatprep.mubr.bf16.mxu0 %v3903_v0  ;;  %1247 = vmatpush2.bf16.msra.mxu0 %v3466_v18  ;;  %v3517_v18 = vld [vmem:[#allocation8 + $0x154] ss:$8 sps:$4 sm:$0xff]  }
  0xdd   : > { %1248 = vmatprep.subr.bf16.mxu0 %v3474_v20 }
  0xe0   : > { %1249 = vmatpush2.bf16.msra.mxu0 %v3472_v23 }
  0xe1   : > { %1250 = vmatprep.subr.bf16.mxu0 %v3480_v24  ;;  %v3512_v24 = vld [vmem:[#allocation8 + $0x50] ss:$8 sps:$4 sm:$0xff]  }
  0xe3   : > { %639 = vmatmul.mubr.bf16.gmra.mxu0 %v437_v26 }
  0xe4   : > { %648 = vmatprep.mubr.bf16.mxu0 %v3903_v0  ;;  %1251 = vmatpush2.bf16.msra.mxu0 %v3478_v25  ;;  %v3494_v0 = vld [vmem:[#allocation7 + $0x104] ss:$16 sps:$4 sm:$0xff]   ;;  %v3515_v25 = vld [vmem:[#allocation8 + $0x150] ss:$8 sps:$4 sm:$0xff]  }
  0xe5   : > { %1252 = vmatprep.subr.bf16.mxu0 %v3486_v31  ;;  %1143 = vmatprep.subr.bf16.mxu1 %v3494_v0 }
  0xe6   : > { %1144 = vmatpush2.bf16.msra.mxu1 %v3499_v40 }
  0xe7   : > { %1831 = vmatprep.subr.bf16.mxu1 %v3502_v41 }
  0xe8   : > { %1253 = vmatpush2.bf16.msra.mxu0 %v3484_v32 }
  0xe9   : > { %1254 = vmatprep.subr.bf16.mxu0 %v3492_v35  ;;  %v3518_v35 = vld [vmem:[#allocation8 + $0x40] ss:$8 sps:$4 sm:$0xff]  }
  0xeb   : > { %649 = vmatmul.mubr.bf16.gmra.mxu0 %v438_v29  ;;  %v3523_v29 = vld [vmem:[#allocation8 + $0x144] ss:$8 sps:$4 sm:$0xff]  }
  0xec   : > { %1255 = vmatpush2.bf16.msra.mxu0 %v3490_v36  ;;  %v3521_v36 = vld [vmem:[#allocation8 + $0x140] ss:$8 sps:$4 sm:$0xff]  }
  0xed   : > { %1256 = vmatprep.subr.bf16.mxu0 %v3498_v38  ;;  %v3526_v38 = vld [vmem:[#allocation8 + $0x34] ss:$8 sps:$4 sm:$0xff]  }
  0xf0   : > { %1257 = vmatpush2.bf16.msra.mxu0 %v3496_v39  ;;  %v3529_v39 = vld [vmem:[#allocation8 + $0x134] ss:$8 sps:$4 sm:$0xff]  }
  0xf1   : > { %1944 = vmatprep.subr.bf16.mxu0 %v3505_v42 }
 0x173   : > { %v580_v48 = vpop.f32.mrf.mxu0 }
 0x174   : > { %v581_v55 = vadd.f32 %v580_v48, %v4194_v50  ;;  %v3524_v48 = vld [vmem:[#allocation8 + $0x30] ss:$8 sps:$4 sm:$0xff]  }
 0x175   : > { %v582_v51 = vpop.f32.mrf.mxu0 }
 0x176   : > { %v583_v53 = vadd.f32 %v582_v51, %v4191_v49  ;;  %v659_v62 = vmax.f32 %v581_v55, 0.0  ;;  %v3527_v51 = vld [vmem:[#allocation8 + $0x130] ss:$8 sps:$4 sm:$0xff]   ;;  %v3535_v55 = vld [vmem:[#allocation8 + $0x124] ss:$8 sps:$4 sm:$0xff]  }
 0x177   : > { %v584_v52 = vpop.f32.mrf.mxu0 }
 0x178   : > { %v585_v54 = vadd.f32 %v584_v52, %v4194_v50  ;;  %v660_v60 = vmax.f32 %v583_v53, 0.0 }
 0x179   : > { %v586_v56 = vpop.f32.mrf.mxu0 }
 0x17a   : > { %v587_v57 = vadd.f32 %v586_v56, %v4191_v49  ;;  %v661_v58 = vmax.f32 %v585_v54, 0.0  ;;  %v3532_v54 = vld [vmem:[#allocation8 + $0x24] ss:$8 sps:$4 sm:$0xff]  }
 0x17b   : > { %v590_v59 = vpop.f32.mrf.mxu0 }
 0x17c   : > { %v662_v61 = vmax.f32 %v587_v57, 0.0  ;;  %v692_v4 = vpack.c.bf16 %v661_v58, %v659_v62  ;;  %v591_v10 = vadd.f32 %v590_v59, %v4194_v50  ;;  %v3533_v62 = vld [vmem:[#allocation8 + $0x120] ss:$8 sps:$4 sm:$0xff]  }
 0x17d   : > { %v592_v63 = vpop.f32.mrf.mxu0 }
 0x17e   : > { %v693_v1 = vpack.c.bf16 %v662_v61, %v660_v60  ;;  %v593_v8 = vadd.f32 %v592_v63, %v4191_v49  ;;  %v663_v21 = vmax.f32 %v591_v10, 0.0  ;;  %v3530_v61 = vld [vmem:[#allocation8 + $0x20] ss:$8 sps:$4 sm:$0xff]   ;;  %v3539_v10 = vld [vmem:[#allocation8 + $0x110] ss:$8 sps:$4 sm:$0xff]  }
 0x17f   : > { %v594_v5 = vpop.f32.mrf.mxu0 }
 0x180   : > { %v595_v9 = vadd.f32 %v594_v5, %v4194_v50  ;;  %1145 = vmatprep.mubr.bf16.mxu1 %v693_v1  ;;  %1258 = vmatprep.mubr.bf16.mxu0 %v693_v1  ;;  %v664_v19 = vmax.f32 %v593_v8, 0.0 }
 0x181   : > { %v596_v11 = vpop.f32.mrf.mxu0  ;;  %1146 = vmatmul.mubr.bf16.vlgmr.msra.gmra.mxu1 %v692_v4  ;;  %1259 = vmatmul.mubr.bf16.vlgmr.msra.gmra.mxu0 %v692_v4 }
 0x182   : > { %v597_v12 = vadd.f32 %v596_v11, %v4191_v49  ;;  %1832 = vmatpush1.bf16.msra.mxu1 %v3500_v2  ;;  %1945 = vmatpush1.bf16.msra.mxu0 %v3503_v3  ;;  %v665_v15 = vmax.f32 %v595_v9, 0.0  ;;  %v3538_v2 = vld [vmem:[#allocation8 + $0x14] ss:$8 sps:$4 sm:$0xff]   ;;  %v3536_v9 = vld [vmem:[#allocation8 + $0x10] ss:$8 sps:$4 sm:$0xff]  }
 0x183   : > { %v600_v16 = vpop.f32.mrf.mxu0  ;;  %1833 = vmatprep.subr.bf16.mxu1 %v3508_v6  ;;  %1946 = vmatprep.subr.bf16.mxu0 %v3511_v7  ;;  %v3541_v3 = vld [vmem:[#allocation8 + $0x114] ss:$8 sps:$4 sm:$0xff]  }
 0x184   : > { %v666_v20 = vmax.f32 %v597_v12, 0.0  ;;  %v694_v26 = vpack.c.bf16 %v665_v15, %v663_v21  ;;  %v601_v32 = vadd.f32 %v600_v16, %v4194_v50  ;;  %v3545_v21 = vld [vmem:[#allocation8 + $0x100] ss:$8 sps:$4 sm:$0xff]  }
 0x185   : > { %v602_v22 = vpop.f32.mrf.mxu0 }
 0x186   : > { %v695_v23 = vpack.c.bf16 %v666_v20, %v664_v19  ;;  %1834 = vmatpush1.bf16.msra.mxu1 %v3506_v13  ;;  %1947 = vmatpush1.bf16.msra.mxu0 %v3509_v14  ;;  %v603_v30 = vadd.f32 %v602_v22, %v4191_v49  ;;  %v667_v42 = vmax.f32 %v601_v32, 0.0  ;;  %v3544_v13 = vld [vmem:[#allocation8 + $0x4] ss:$8 sps:$4 sm:$0xff]   ;;  %v3542_v20 = vld [vmem:[#allocation8] ss:$8 sps:$4 sm:$0xff]  }
 0x187   : > { %v604_v27 = vpop.f32.mrf.mxu0  ;;  %1835 = vmatprep.subr.bf16.mxu1 %v3514_v17  ;;  %1948 = vmatprep.subr.bf16.mxu0 %v3517_v18  ;;  %v3547_v14 = vld [vmem:[#allocation8 + $0x104] ss:$8 sps:$4 sm:$0xff]   ;;  %v3551_v32 = vld [vmem:[#allocation8 + $0x1f0] ss:$8 sps:$4 sm:$0xff]  }
 0x188   : > { %v605_v31 = vadd.f32 %v604_v27, %v4194_v50  ;;  %1155 = vmatprep.mubr.bf16.mxu1 %v695_v23  ;;  %1268 = vmatprep.mubr.bf16.mxu0 %v695_v23  ;;  %v668_v40 = vmax.f32 %v603_v30, 0.0 }
 0x189   : > { %v606_v33 = vpop.f32.mrf.mxu0  ;;  %1156 = vmatmul.mubr.bf16.gmra.mxu1 %v694_v26  ;;  %1269 = vmatmul.mubr.bf16.gmra.mxu0 %v694_v26 }
 0x18a   : > { %v607_v34 = vadd.f32 %v606_v33, %v4191_v49  ;;  %1836 = vmatpush1.bf16.msra.mxu1 %v3512_v24  ;;  %1949 = vmatpush1.bf16.msra.mxu0 %v3515_v25  ;;  %v669_v37 = vmax.f32 %v605_v31, 0.0  ;;  %v3550_v24 = vld [vmem:[#allocation8 + $0xf4] ss:$8 sps:$4 sm:$0xff]   ;;  %v3548_v31 = vld [vmem:[#allocation8 + $0xf0] ss:$8 sps:$4 sm:$0xff]  }
 0x18b   : > { %v610_v0 = vpop.f32.mrf.mxu0  ;;  %1837 = vmatprep.subr.bf16.mxu1 %v3520_v28  ;;  %1950 = vmatprep.subr.bf16.mxu0 %v3523_v29  ;;  %v3553_v25 = vld [vmem:[#allocation8 + $0x1f4] ss:$8 sps:$4 sm:$0xff]  }
 0x18c   : > { %v670_v41 = vmax.f32 %v607_v34, 0.0  ;;  %v696_v52 = vpack.c.bf16 %v669_v37, %v667_v42  ;;  %v611_v58 = vadd.f32 %v610_v0, %v4194_v50  ;;  %v3557_v42 = vld [vmem:[#allocation8 + $0x1e0] ss:$8 sps:$4 sm:$0xff]  }
 0x18d   : > { %v612_v43 = vpop.f32.mrf.mxu0 }
 0x18e   : > { %v697_v47 = vpack.c.bf16 %v670_v41, %v668_v40  ;;  %1838 = vmatpush1.bf16.msra.mxu1 %v3518_v35  ;;  %1951 = vmatpush1.bf16.msra.mxu0 %v3521_v36  ;;  %v613_v56 = vadd.f32 %v612_v43, %v4191_v49  ;;  %v671_v6 = vmax.f32 %v611_v58, 0.0  ;;  %v3556_v35 = vld [vmem:[#allocation8 + $0xe4] ss:$8 sps:$4 sm:$0xff]   ;;  %v3554_v41 = vld [vmem:[#allocation8 + $0xe0] ss:$8 sps:$4 sm:$0xff]  }
 0x18f   : > { %v614_v53 = vpop.f32.mrf.mxu0  ;;  %1839 = vmatprep.subr.bf16.mxu1 %v3526_v38  ;;  %1952 = vmatprep.subr.bf16.mxu0 %v3529_v39  ;;  %v3559_v36 = vld [vmem:[#allocation8 + $0x1e4] ss:$8 sps:$4 sm:$0xff]   ;;  %v3563_v58 = vld [vmem:[#allocation8 + $0x1d0] ss:$8 sps:$4 sm:$0xff]  }
 0x190   : > { %v615_v57 = vadd.f32 %v614_v53, %v4194_v50  ;;  %1165 = vmatprep.mubr.bf16.mxu1 %v697_v47  ;;  %1278 = vmatprep.mubr.bf16.mxu0 %v697_v47  ;;  %v672_v4 = vmax.f32 %v613_v56, 0.0 }
 0x191   : > { %v616_v59 = vpop.f32.mrf.mxu0  ;;  %1166 = vmatmul.mubr.bf16.gmra.mxu1 %v696_v52  ;;  %1279 = vmatmul.mubr.bf16.gmra.mxu0 %v696_v52 }
 0x192   : > { %v617_v60 = vadd.f32 %v616_v59, %v4191_v49  ;;  %1840 = vmatpush1.bf16.msra.mxu1 %v3524_v48  ;;  %1953 = vmatpush1.bf16.msra.mxu0 %v3527_v51  ;;  %v673_v63 = vmax.f32 %v615_v57, 0.0  ;;  %v3562_v48 = vld [vmem:[#allocation8 + $0xd4] ss:$8 sps:$4 sm:$0xff]   ;;  %v3560_v57 = vld [vmem:[#allocation8 + $0xd0] ss:$8 sps:$4 sm:$0xff]  }
 0x193   : > { %v620_v1 = vpop.f32.mrf.mxu0  ;;  %1841 = vmatprep.subr.bf16.mxu1 %v3532_v54  ;;  %1954 = vmatprep.subr.bf16.mxu0 %v3535_v55  ;;  %v3565_v51 = vld [vmem:[#allocation8 + $0x1d4] ss:$8 sps:$4 sm:$0xff]  }
 0x194   : > { %v674_v5 = vmax.f32 %v617_v60, 0.0  ;;  %v698_v11 = vpack.c.bf16 %v673_v63, %v671_v6  ;;  %v621_v17 = vadd.f32 %v620_v1, %v4194_v50  ;;  %v3569_v6 = vld [vmem:[#allocation8 + $0x1c0] ss:$8 sps:$4 sm:$0xff]  }
 0x195   : > { %v622_v7 = vpop.f32.mrf.mxu0 }
 0x196   : > { %v699_v8 = vpack.c.bf16 %v674_v5, %v672_v4  ;;  %1842 = vmatpush1.bf16.msra.mxu1 %v3530_v61  ;;  %1955 = vmatpush1.bf16.msra.mxu0 %v3533_v62  ;;  %v623_v15 = vadd.f32 %v622_v7, %v4191_v49  ;;  %v675_v28 = vmax.f32 %v621_v17, 0.0  ;;  %v3568_v61 = vld [vmem:[#allocation8 + $0xc4] ss:$8 sps:$4 sm:$0xff]   ;;  %v3566_v5 = vld [vmem:[#allocation8 + $0xc0] ss:$8 sps:$4 sm:$0xff]  }
 0x197   : > { %v624_v12 = vpop.f32.mrf.mxu0  ;;  %1843 = vmatprep.subr.bf16.mxu1 %v3538_v2  ;;  %1956 = vmatprep.subr.bf16.mxu0 %v3541_v3  ;;  %v3571_v62 = vld [vmem:[#allocation8 + $0x1c4] ss:$8 sps:$4 sm:$0xff]   ;;  %v3575_v17 = vld [vmem:[#allocation8 + $0x1b0] ss:$8 sps:$4 sm:$0xff]  }
 0x198   : > { %v625_v16 = vadd.f32 %v624_v12, %v4194_v50  ;;  %1175 = vmatprep.mubr.bf16.mxu1 %v699_v8  ;;  %1288 = vmatprep.mubr.bf16.mxu0 %v699_v8  ;;  %v676_v26 = vmax.f32 %v623_v15, 0.0 }
 0x199   : > { %v626_v18 = vpop.f32.mrf.mxu0  ;;  %1176 = vmatmul.mubr.bf16.gmra.mxu1 %v698_v11  ;;  %1289 = vmatmul.mubr.bf16.gmra.mxu0 %v698_v11 }
 0x19a   : > { %v627_v19 = vadd.f32 %v626_v18, %v4191_v49  ;;  %1844 = vmatpush1.bf16.msra.mxu1 %v3536_v9  ;;  %1957 = vmatpush1.bf16.msra.mxu0 %v3539_v10  ;;  %v677_v22 = vmax.f32 %v625_v16, 0.0  ;;  %v3574_v9 = vld [vmem:[#allocation8 + $0xb4] ss:$8 sps:$4 sm:$0xff]   ;;  %v3572_v16 = vld [vmem:[#allocation8 + $0xb0] ss:$8 sps:$4 sm:$0xff]  }
 0x19b   : > { %v630_v23 = vpop.f32.mrf.mxu0  ;;  %1845 = vmatprep.subr.bf16.mxu1 %v3544_v13  ;;  %1958 = vmatprep.subr.bf16.mxu0 %v3547_v14  ;;  %v3577_v10 = vld [vmem:[#allocation8 + $0x1b4] ss:$8 sps:$4 sm:$0xff]  }
 0x19c   : > { %v678_v27 = vmax.f32 %v627_v19, 0.0  ;;  %v700_v33 = vpack.c.bf16 %v677_v22, %v675_v28  ;;  %v631_v38 = vadd.f32 %v630_v23, %v4194_v50 }
 0x19d   : > { %v632_v29 = vpop.f32.mrf.mxu0 }
 0x19e   : > { %v701_v30 = vpack.c.bf16 %v678_v27, %v676_v26  ;;  %1846 = vmatpush1.bf16.msra.mxu1 %v3542_v20  ;;  %1959 = vmatpush1.bf16.msra.mxu0 %v3545_v21  ;;  %v633_v37 = vadd.f32 %v632_v29, %v4191_v49  ;;  %v679_v54 = vmax.f32 %v631_v38, 0.0  ;;  %v3590_v38 = vld [vmem:[#allocation8 + $0x80] ss:$8 sps:$4 sm:$0xff]  }
 0x19f   : > { %v634_v34 = vpop.f32.mrf.mxu0  ;;  %1847 = vmatprep.subr.bf16.mxu1 %v3550_v24  ;;  %1960 = vmatprep.subr.bf16.mxu0 %v3553_v25 }
 0x1a0   : > { %v635_v0 = vadd.f32 %v634_v34, %v4194_v50  ;;  %1185 = vmatprep.mubr.bf16.mxu1 %v701_v30  ;;  %1298 = vmatprep.mubr.bf16.mxu0 %v701_v30  ;;  %v680_v52 = vmax.f32 %v633_v37, 0.0  ;;  %v3589_v34 = vld [vmem:[#allocation8 + $0x194] ss:$8 sps:$4 sm:$0xff]   ;;  %v3592_v37 = vld [vmem:[#allocation8 + $0x84] ss:$8 sps:$4 sm:$0xff]  }
 0x1a1   : > { %v636_v39 = vpop.f32.mrf.mxu0  ;;  %1186 = vmatmul.mubr.bf16.gmra.mxu1 %v700_v33  ;;  %1299 = vmatmul.mubr.bf16.gmra.mxu0 %v700_v33  ;;  %v3581_v33 = vld [vmem:[#allocation8 + $0x1a0] ss:$8 sps:$4 sm:$0xff]  }
 0x1a2   : > { %v637_v40 = vadd.f32 %v636_v39, %v4191_v49  ;;  %1848 = vmatpush2.bf16.msra.mxu1 %v3548_v31  ;;  %1961 = vmatpush2.bf16.msra.mxu0 %v3551_v32  ;;  %v681_v43 = vmax.f32 %v635_v0, 0.0  ;;  %v3580_v31 = vld [vmem:[#allocation8 + $0xa4] ss:$8 sps:$4 sm:$0xff]   ;;  %v3593_v39 = vld [vmem:[#allocation8 + $0x180] ss:$8 sps:$4 sm:$0xff]  }
 0x1a3   : > { %v640_v47 = vpop.f32.mrf.mxu0  ;;  %1849 = vmatprep.subr.bf16.mxu1 %v3556_v35  ;;  %1962 = vmatprep.subr.bf16.mxu0 %v3559_v36  ;;  %v3583_v32 = vld [vmem:[#allocation8 + $0x1a4] ss:$8 sps:$4 sm:$0xff]   ;;  %v3584_v35 = vld [vmem:[#allocation8 + $0x90] ss:$8 sps:$4 sm:$0xff]  }
 0x1a4   : > { %v682_v53 = vmax.f32 %v637_v40, 0.0  ;;  %v702_v59 = vpack.c.bf16 %v681_v43, %v679_v54  ;;  %v641_v2 = vadd.f32 %v640_v47, %v4194_v50  ;;  %v3587_v36 = vld [vmem:[#allocation8 + $0x190] ss:$8 sps:$4 sm:$0xff]   ;;  %v3595_v0 = vld [vmem:[#allocation8 + $0x184] ss:$8 sps:$4 sm:$0xff]  }
 0x1a5   : > { %v642_v55 = vpop.f32.mrf.mxu0  ;;  %v3596_v40 = vld [vmem:[#allocation10 + $0x78] sm:$0xff]   ;;  %v691_v43 = vld [vmem:[%s4464_s7 + $0x2] sm:$0xf] }
 0x1a6   : > { %v703_v56 = vpack.c.bf16 %v682_v53, %v680_v52  ;;  %1850 = vmatpush2.bf16.msra.mxu1 %v3554_v41  ;;  %1963 = vmatpush2.bf16.msra.mxu0 %v3557_v42  ;;  %v643_v63 = vadd.f32 %v642_v55, %v4191_v49  ;;  %v683_v13 = vmax.f32 %v641_v2, 0.0  ;;  %v787_v41 = vsub.s32 3, %v4179_v44 }
 0x1a7   : > { %v644_v60 = vpop.f32.mrf.mxu0  ;;  %1851 = vmatprep.subr.bf16.mxu1 %v3562_v48  ;;  %1964 = vmatprep.subr.bf16.mxu0 %v3565_v51  ;;  %v783_v42 = vsub.s32 2, %v4179_v44  ;;  %v4234_v51 = vrot.slane %v691_v43, %v4182_v45  ;;  %v4239_v53 = vrot.slane %v691_v43, %v4185_v46 }
 0x1a8   : > { %v645_v1 = vadd.f32 %v644_v60, %v4194_v50  ;;  %1195 = vmatprep.mubr.bf16.mxu1 %v703_v56  ;;  %1308 = vmatprep.mubr.bf16.mxu0 %v703_v56  ;;  %v684_v11 = vmax.f32 %v643_v63, 0.0  ;;  %v4236_v52 = vrot.slane %v691_v43, %v787_v41 }
 0x1a9   : > { %v646_v3 = vpop.f32.mrf.mxu0  ;;  %1196 = vmatmul.mubr.bf16.gmra.mxu1 %v702_v59  ;;  %1309 = vmatmul.mubr.bf16.gmra.mxu0 %v702_v59  ;;  %v4241_v54 = vrot.slane %v691_v43, %v783_v42 }
 0x1aa   : > { %v647_v4 = vadd.f32 %v646_v3, %v4191_v49  ;;  %1852 = vmatpush2.bf16.msra.mxu1 %v3560_v57  ;;  %1965 = vmatpush2.bf16.msra.mxu0 %v3563_v58  ;;  %v685_v7 = vmax.f32 %v645_v1, 0.0 }
 0x1ab   : > { %v650_v8 = vpop.f32.mrf.mxu0  ;;  %1853 = vmatprep.subr.bf16.mxu1 %v3568_v61  ;;  %1966 = vmatprep.subr.bf16.mxu0 %v3571_v62 }
 0x1ac   : > { %v686_v12 = vmax.f32 %v647_v4, 0.0  ;;  %v704_v18 = vpack.c.bf16 %v685_v7, %v683_v13  ;;  %v651_v22 = vadd.f32 %v650_v8, %v4194_v50 }
 0x1ad   : > { %v652_v14 = vpop.f32.mrf.mxu0 }
 0x1ae   : > { %v705_v15 = vpack.c.bf16 %v686_v12, %v684_v11  ;;  %1854 = vmatpush2.bf16.msra.mxu1 %v3566_v5  ;;  %1967 = vmatpush2.bf16.msra.mxu0 %v3569_v6  ;;  %v653_v20 = vadd.f32 %v652_v14, %v4191_v49  ;;  %v687_v28 = vmax.f32 %v651_v22, 0.0 }
 0x1af   : > { %v654_v19 = vpop.f32.mrf.mxu0  ;;  %1855 = vmatprep.subr.bf16.mxu1 %v3574_v9  ;;  %1968 = vmatprep.subr.bf16.mxu0 %v3577_v10 }
 0x1b0   : > { %v655_v21 = vadd.f32 %v654_v19, %v4194_v50  ;;  %1205 = vmatprep.mubr.bf16.mxu1 %v705_v15  ;;  %1318 = vmatprep.mubr.bf16.mxu0 %v705_v15  ;;  %v688_v26 = vmax.f32 %v653_v20, 0.0  ;;  %v3578_v50 = vld [vmem:[#allocation8 + $0xa0] ss:$8 sps:$4 sm:$0xff]   ;;  %v3597_v19 = vld [vmem:[#allocation10 + $0x38] sm:$0xff]  }
 0x1b1   : > { %v656_v23 = vpop.f32.mrf.mxu0  ;;  %1206 = vmatmul.mubr.bf16.gmra.mxu1 %v704_v18  ;;  %1319 = vmatmul.mubr.bf16.gmra.mxu0 %v704_v18 }
 0x1b2   : > { %v657_v24 = vadd.f32 %v656_v23, %v4191_v49  ;;  %1856 = vmatpush2.bf16.msra.mxu1 %v3572_v16  ;;  %1969 = vmatpush2.bf16.msra.mxu0 %v3575_v17  ;;  %v689_v25 = vmax.f32 %v655_v21, 0.0  ;;  %v3586_v49 = vld [vmem:[#allocation8 + $0x94] ss:$8 sps:$4 sm:$0xff]  }
 0x1b3   : > { %1857 = vmatprep.subr.bf16.mxu1 %v3580_v31  ;;  %1970 = vmatprep.subr.bf16.mxu0 %v3583_v32 }
 0x1b4   : > { %v690_v27 = vmax.f32 %v657_v24, 0.0  ;;  %v706_v30 = vpack.c.bf16 %v689_v25, %v687_v28  ;;  %v3598_v25 = vld [vmem:[#allocation10 + $0x70] sm:$0xff]  }
 0x1b6   : > { %v707_v29 = vpack.c.bf16 %v690_v27, %v688_v26  ;;  %1858 = vmatpush2.bf16.msra.mxu1 %v3578_v50  ;;  %1971 = vmatpush2.bf16.msra.mxu0 %v3581_v33 }
 0x1b7   : > { %1859 = vmatprep.subr.bf16.mxu1 %v3586_v49  ;;  %1972 = vmatprep.subr.bf16.mxu0 %v3589_v34  ;;  %v3599_v49 = vld [vmem:[#allocation10 + $0x30] sm:$0xff]  }
 0x1b8   : > { %1215 = vmatprep.mubr.bf16.mxu1 %v707_v29  ;;  %1328 = vmatprep.mubr.bf16.mxu0 %v707_v29 }
 0x1b9   : > { %1216 = vmatmul.mubr.bf16.gmra.mxu1 %v706_v30  ;;  %1329 = vmatmul.mubr.bf16.gmra.mxu0 %v706_v30 }
 0x1ba   : > { %1860 = vmatpush2.bf16.msra.mxu1 %v3584_v35  ;;  %1973 = vmatpush2.bf16.msra.mxu0 %v3587_v36 }
 0x1bb   : > { %1861 = vmatprep.subr.bf16.mxu1 %v3592_v37  ;;  %1974 = vmatprep.subr.bf16.mxu0 %v3595_v0  ;;  %v3600_v0 = vld [vmem:[#allocation10 + $0x68] sm:$0xff]  }
 0x1be   : > { %1862 = vmatpush2.bf16.msra.mxu1 %v3590_v38  ;;  %1975 = vmatpush2.bf16.msra.mxu0 %v3593_v39 }
 0x1bf   : > { %3088 = vmatprep.subr.bf16.mxu1 %v3596_v40 }
 0x241   : > { %v1147_v47 = vpop.f32.mrf.mxu1  ;;  %v1260_v48 = vpop.f32.mrf.mxu0 }
 0x242   : > { %v1148_v62 = vadd.f32 %v1147_v47, %v4239_v53  ;;  %v1261_v63 = vadd.f32 %v1260_v48, %v4241_v54 }
 0x243   : > { %v1149_v55 = vpop.f32.mrf.mxu1  ;;  %v1262_v56 = vpop.f32.mrf.mxu0 }
 0x244   : > { %v1150_v58 = vadd.f32 %v1149_v55, %v4234_v51  ;;  %v1263_v59 = vadd.f32 %v1262_v56, %v4236_v52  ;;  %v1339_v13 = vmax.f32 %v1148_v62, 0.0  ;;  %v1341_v14 = vmax.f32 %v1261_v63, 0.0  ;;  %v3602_v62 = vld [vmem:[#allocation10 + $0x60] sm:$0xff]  }
 0x245   : > { %v1151_v57 = vpop.f32.mrf.mxu1  ;;  %v1264_v44 = vpop.f32.mrf.mxu0 }
 0x246   : > { %v1152_v60 = vadd.f32 %v1151_v57, %v4239_v53  ;;  %v1265_v61 = vadd.f32 %v1264_v44, %v4241_v54  ;;  %v1340_v9 = vmax.f32 %v1150_v58, 0.0  ;;  %v1342_v10 = vmax.f32 %v1263_v59, 0.0  ;;  %v3601_v57 = vld [vmem:[#allocation10 + $0x28] sm:$0xff]  }
 0x247   : > { %v1153_v1 = vpop.f32.mrf.mxu1  ;;  %v1266_v2 = vpop.f32.mrf.mxu0 }
 0x248   : > { %v1154_v3 = vadd.f32 %v1153_v1, %v4234_v51  ;;  %v1267_v4 = vadd.f32 %v1266_v2, %v4236_v52  ;;  %v1343_v5 = vmax.f32 %v1152_v60, 0.0  ;;  %v1345_v6 = vmax.f32 %v1265_v61, 0.0 }
 0x249   : > { %v1157_v7 = vpop.f32.mrf.mxu1  ;;  %v1270_v8 = vpop.f32.mrf.mxu0 }
 0x24a   : > { %v1344_v11 = vmax.f32 %v1154_v3, 0.0  ;;  %v1346_v12 = vmax.f32 %v1267_v4, 0.0  ;;  %v1404_v20 = vpack.c.bf16 %v1343_v5, %v1339_v13  ;;  %v1406_v21 = vpack.c.bf16 %v1345_v6, %v1341_v14  ;;  %v3604_v14 = vld [vmem:[#allocation10 + $0x58] sm:$0xff]  }
 0x24b   : > { %v1159_v15 = vpop.f32.mrf.mxu1  ;;  %v1272_v16 = vpop.f32.mrf.mxu0  ;;  %v1158_v29 = vadd.f32 %v1157_v7, %v4239_v53  ;;  %v1271_v30 = vadd.f32 %v1270_v8, %v4241_v54 }
 0x24c   : > { %v1405_v17 = vpack.c.bf16 %v1344_v11, %v1340_v9  ;;  %v1407_v18 = vpack.c.bf16 %v1346_v12, %v1342_v10  ;;  %v1160_v22 = vadd.f32 %v1159_v15, %v4234_v51  ;;  %v1273_v26 = vadd.f32 %v1272_v16, %v4236_v52  ;;  %v3603_v9 = vld [vmem:[#allocation10 + $0x20] sm:$0xff]  }
 0x24d   : > { %v1161_v23 = vpop.f32.mrf.mxu1  ;;  %v1274_v24 = vpop.f32.mrf.mxu0  ;;  %v1347_v42 = vmax.f32 %v1158_v29, 0.0  ;;  %v1349_v43 = vmax.f32 %v1271_v30, 0.0 }
 0x24e   : > { %v1162_v27 = vadd.f32 %v1161_v23, %v4239_v53  ;;  %v1275_v28 = vadd.f32 %v1274_v24, %v4241_v54  ;;  %1863 = vmatprep.mubr.bf16.mxu1 %v1405_v17  ;;  %1976 = vmatprep.mubr.bf16.mxu0 %v1407_v18  ;;  %v1348_v38 = vmax.f32 %v1160_v22, 0.0  ;;  %v1350_v39 = vmax.f32 %v1273_v26, 0.0 }
 0x24f   : > { %v1163_v31 = vpop.f32.mrf.mxu1  ;;  %v1276_v32 = vpop.f32.mrf.mxu0  ;;  %1864 = vmatmul.mubr.bf16.vlgmr.msra.gmra.mxu1 %v1404_v20  ;;  %1977 = vmatmul.mubr.bf16.vlgmr.msra.gmra.mxu0 %v1406_v21 }
 0x250   : > { %v1164_v50 = vadd.f32 %v1163_v31, %v4234_v51  ;;  %v1277_v33 = vadd.f32 %v1276_v32, %v4236_v52  ;;  %3089 = vmatpush3.bf16.msra.mxu1 %v3597_v19  ;;  %v1351_v34 = vmax.f32 %v1162_v27, 0.0  ;;  %v1353_v35 = vmax.f32 %v1275_v28, 0.0  ;;  %v3606_v31 = vld [vmem:[#allocation10 + $0x50] sm:$0xff]  }
 0x251   : > { %v1167_v36 = vpop.f32.mrf.mxu1  ;;  %v1280_v37 = vpop.f32.mrf.mxu0  ;;  %3090 = vmatprep.subr.bf16.mxu1 %v3598_v25  ;;  %v3605_v25 = vld [vmem:[#allocation10 + $0x18] sm:$0xff]  }
 0x252   : > { %v1352_v40 = vmax.f32 %v1164_v50, 0.0  ;;  %v1354_v41 = vmax.f32 %v1277_v33, 0.0  ;;  %v1408_v44 = vpack.c.bf16 %v1351_v34, %v1347_v42  ;;  %v1410_v58 = vpack.c.bf16 %v1353_v35, %v1349_v43  ;;  %v3608_v43 = vld [vmem:[#allocation10 + $0x48] sm:$0xff]  }
 0x253   : > { %v1169_v47 = vpop.f32.mrf.mxu1  ;;  %v1282_v48 = vpop.f32.mrf.mxu0  ;;  %v1168_v3 = vadd.f32 %v1167_v36, %v4239_v53  ;;  %v1281_v4 = vadd.f32 %v1280_v37, %v4241_v54 }
 0x254   : > { %v1409_v55 = vpack.c.bf16 %v1352_v40, %v1348_v38  ;;  %v1411_v56 = vpack.c.bf16 %v1354_v41, %v1350_v39  ;;  %3091 = vmatpush3.bf16.msra.mxu1 %v3599_v49  ;;  %v1170_v59 = vadd.f32 %v1169_v47, %v4234_v51  ;;  %v1283_v63 = vadd.f32 %v1282_v48, %v4236_v52  ;;  %v3607_v38 = vld [vmem:[#allocation10 + $0x10] sm:$0xff]  }
 0x255   : > { %v1171_v60 = vpop.f32.mrf.mxu1  ;;  %v1284_v61 = vpop.f32.mrf.mxu0  ;;  %3092 = vmatprep.subr.bf16.mxu1 %v3600_v0  ;;  %v1355_v19 = vmax.f32 %v1168_v3, 0.0  ;;  %v1357_v20 = vmax.f32 %v1281_v4, 0.0 }
 0x256   : > { %v1172_v1 = vadd.f32 %v1171_v60, %v4239_v53  ;;  %v1285_v2 = vadd.f32 %v1284_v61, %v4241_v54  ;;  %1873 = vmatprep.mubr.bf16.mxu1 %v1409_v55  ;;  %1986 = vmatprep.mubr.bf16.mxu0 %v1411_v56  ;;  %v1356_v15 = vmax.f32 %v1170_v59, 0.0  ;;  %v1358_v16 = vmax.f32 %v1283_v63, 0.0 }
 0x257   : > { %v1173_v5 = vpop.f32.mrf.mxu1  ;;  %v1286_v6 = vpop.f32.mrf.mxu0  ;;  %1874 = vmatmul.mubr.bf16.gmra.mxu1 %v1408_v44  ;;  %1987 = vmatmul.mubr.bf16.gmra.mxu0 %v1410_v58 }
 0x258   : > { %v1174_v7 = vadd.f32 %v1173_v5, %v4234_v51  ;;  %v1287_v8 = vadd.f32 %v1286_v6, %v4236_v52  ;;  %3093 = vmatpush3.bf16.msra.mxu1 %v3601_v57  ;;  %v1359_v10 = vmax.f32 %v1172_v1, 0.0  ;;  %v1361_v11 = vmax.f32 %v1285_v2, 0.0 }
 0x259   : > { %v1177_v12 = vpop.f32.mrf.mxu1  ;;  %v1290_v13 = vpop.f32.mrf.mxu0  ;;  %3094 = vmatprep.subr.bf16.mxu1 %v3602_v62 }
 0x25a   : > { %v1360_v17 = vmax.f32 %v1174_v7, 0.0  ;;  %v1362_v18 = vmax.f32 %v1287_v8, 0.0  ;;  %v1412_v26 = vpack.c.bf16 %v1359_v10, %v1355_v19  ;;  %v1414_v27 = vpack.c.bf16 %v1361_v11, %v1357_v20 }
 0x25b   : > { %v1179_v21 = vpop.f32.mrf.mxu1  ;;  %v1292_v22 = vpop.f32.mrf.mxu0  ;;  %v1178_v49 = vadd.f32 %v1177_v12, %v4239_v53  ;;  %v1291_v34 = vadd.f32 %v1290_v13, %v4241_v54 }
 0x25c   : > { %v1413_v23 = vpack.c.bf16 %v1360_v17, %v1356_v15  ;;  %v1415_v24 = vpack.c.bf16 %v1362_v18, %v1358_v16  ;;  %3095 = vmatpush3.bf16.msra.mxu1 %v3603_v9  ;;  %v1180_v28 = vadd.f32 %v1179_v21, %v4234_v51  ;;  %v1293_v32 = vadd.f32 %v1292_v22, %v4236_v52 }
 0x25d   : > { %v1181_v29 = vpop.f32.mrf.mxu1  ;;  %v1294_v30 = vpop.f32.mrf.mxu0  ;;  %3096 = vmatprep.subr.bf16.mxu1 %v3604_v14  ;;  %v1363_v57 = vmax.f32 %v1178_v49, 0.0  ;;  %v1365_v44 = vmax.f32 %v1291_v34, 0.0 }
 0x25e   : > { %v1182_v50 = vadd.f32 %v1181_v29, %v4239_v53  ;;  %v1295_v33 = vadd.f32 %v1294_v30, %v4241_v54  ;;  %1883 = vmatprep.mubr.bf16.mxu1 %v1413_v23  ;;  %1996 = vmatprep.mubr.bf16.mxu0 %v1415_v24  ;;  %v1364_v47 = vmax.f32 %v1180_v28, 0.0  ;;  %v1366_v48 = vmax.f32 %v1293_v32, 0.0 }
 0x25f   : > { %v1183_v35 = vpop.f32.mrf.mxu1  ;;  %v1296_v36 = vpop.f32.mrf.mxu0  ;;  %1884 = vmatmul.mubr.bf16.gmra.mxu1 %v1412_v26  ;;  %1997 = vmatmul.mubr.bf16.gmra.mxu0 %v1414_v27 }
 0x260   : > { %v1184_v37 = vadd.f32 %v1183_v35, %v4234_v51  ;;  %v1297_v0 = vadd.f32 %v1296_v36, %v4236_v52  ;;  %3097 = vmatpush3.bf16.msra.mxu1 %v3605_v25  ;;  %v1367_v39 = vmax.f32 %v1182_v50, 0.0  ;;  %v1369_v40 = vmax.f32 %v1295_v33, 0.0 }
 0x261   : > { %v1187_v41 = vpop.f32.mrf.mxu1  ;;  %v1300_v42 = vpop.f32.mrf.mxu0  ;;  %3098 = vmatprep.subr.bf16.mxu1 %v3606_v31 }
 0x262   : > { %v1368_v55 = vmax.f32 %v1184_v37, 0.0  ;;  %v1370_v56 = vmax.f32 %v1297_v0, 0.0  ;;  %v1416_v62 = vpack.c.bf16 %v1367_v39, %v1363_v57  ;;  %v1418_v63 = vpack.c.bf16 %v1369_v40, %v1365_v44 }
 0x263   : > { %v1189_v58 = vpop.f32.mrf.mxu1  ;;  %v1302_v59 = vpop.f32.mrf.mxu0  ;;  %v1188_v7 = vadd.f32 %v1187_v41, %v4239_v53  ;;  %v1301_v8 = vadd.f32 %v1300_v42, %v4241_v54 }
 0x264   : > { %v1417_v60 = vpack.c.bf16 %v1368_v55, %v1364_v47  ;;  %v1419_v61 = vpack.c.bf16 %v1370_v56, %v1366_v48  ;;  %3099 = vmatpush3.bf16.msra.mxu1 %v3607_v38  ;;  %v1190_v1 = vadd.f32 %v1189_v58, %v4234_v51  ;;  %v1303_v4 = vadd.f32 %v1302_v59, %v4236_v52 }
 0x265   : > { %v1191_v2 = vpop.f32.mrf.mxu1  ;;  %v1304_v3 = vpop.f32.mrf.mxu0  ;;  %3100 = vmatprep.subr.bf16.mxu1 %v3608_v43  ;;  %v1371_v21 = vmax.f32 %v1188_v7, 0.0  ;;  %v1373_v22 = vmax.f32 %v1301_v8, 0.0 }
 0x266   : > { %v1192_v5 = vadd.f32 %v1191_v2, %v4239_v53  ;;  %v1305_v6 = vadd.f32 %v1304_v3, %v4241_v54  ;;  %1893 = vmatprep.mubr.bf16.mxu1 %v1417_v60  ;;  %2006 = vmatprep.mubr.bf16.mxu0 %v1419_v61  ;;  %v1372_v17 = vmax.f32 %v1190_v1, 0.0  ;;  %v1374_v18 = vmax.f32 %v1303_v4, 0.0 }
 0x267   : > { %v1193_v9 = vpop.f32.mrf.mxu1  ;;  %v1306_v10 = vpop.f32.mrf.mxu0  ;;  %1894 = vmatmul.mubr.bf16.gmra.mxu1 %v1416_v62  ;;  %2007 = vmatmul.mubr.bf16.gmra.mxu0 %v1418_v63 }
 0x268   : > { %v1194_v11 = vadd.f32 %v1193_v9, %v4234_v51  ;;  %v1307_v12 = vadd.f32 %v1306_v10, %v4236_v52  ;;  %v1375_v13 = vmax.f32 %v1192_v5, 0.0  ;;  %v1377_v14 = vmax.f32 %v1305_v6, 0.0 }
 0x269   : > { %v1197_v15 = vpop.f32.mrf.mxu1  ;;  %v1310_v16 = vpop.f32.mrf.mxu0 }
 0x26a   : > { %v1376_v19 = vmax.f32 %v1194_v11, 0.0  ;;  %v1378_v20 = vmax.f32 %v1307_v12, 0.0  ;;  %v1420_v27 = vpack.c.bf16 %v1375_v13, %v1371_v21  ;;  %v1422_v28 = vpack.c.bf16 %v1377_v14, %v1373_v22 }
 0x26b   : > { %v1199_v23 = vpop.f32.mrf.mxu1  ;;  %v1312_v24 = vpop.f32.mrf.mxu0  ;;  %v1198_v49 = vadd.f32 %v1197_v15, %v4239_v53  ;;  %v1311_v34 = vadd.f32 %v1310_v16, %v4241_v54 }
 0x26c   : > { %v1421_v25 = vpack.c.bf16 %v1376_v19, %v1372_v17  ;;  %v1423_v26 = vpack.c.bf16 %v1378_v20, %v1374_v18  ;;  %v1200_v29 = vadd.f32 %v1199_v23, %v4234_v51  ;;  %v1313_v32 = vadd.f32 %v1312_v24, %v4236_v52 }
 0x26d   : > { %v1201_v30 = vpop.f32.mrf.mxu1  ;;  %v1314_v31 = vpop.f32.mrf.mxu0  ;;  %v1379_v55 = vmax.f32 %v1198_v49, 0.0  ;;  %v1381_v56 = vmax.f32 %v1311_v34, 0.0 }
 0x26e   : > { %v1202_v50 = vadd.f32 %v1201_v30, %v4239_v53  ;;  %v1315_v33 = vadd.f32 %v1314_v31, %v4241_v54  ;;  %1903 = vmatprep.mubr.bf16.mxu1 %v1421_v25  ;;  %2016 = vmatprep.mubr.bf16.mxu0 %v1423_v26  ;;  %v1380_v42 = vmax.f32 %v1200_v29, 0.0  ;;  %v1382_v43 = vmax.f32 %v1313_v32, 0.0 }
 0x26f   : > { %v1203_v35 = vpop.f32.mrf.mxu1  ;;  %v1316_v36 = vpop.f32.mrf.mxu0  ;;  %1904 = vmatmul.mubr.bf16.gmra.mxu1 %v1420_v27  ;;  %2017 = vmatmul.mubr.bf16.gmra.mxu0 %v1422_v28 }
 0x270   : > { %v1204_v37 = vadd.f32 %v1203_v35, %v4234_v51  ;;  %v1317_v0 = vadd.f32 %v1316_v36, %v4236_v52  ;;  %v1383_v38 = vmax.f32 %v1202_v50, 0.0  ;;  %v1385_v39 = vmax.f32 %v1315_v33, 0.0 }
 0x271   : > { %v1207_v40 = vpop.f32.mrf.mxu1  ;;  %v1320_v41 = vpop.f32.mrf.mxu0 }
 0x272   : > { %v1384_v47 = vmax.f32 %v1204_v37, 0.0  ;;  %v1386_v48 = vmax.f32 %v1317_v0, 0.0  ;;  %v1424_v60 = vpack.c.bf16 %v1383_v38, %v1379_v55  ;;  %v1426_v61 = vpack.c.bf16 %v1385_v39, %v1381_v56  ;;  %v3609_v55 = vld [vmem:[#allocation10 + $0x8] sm:$0xff]   ;;  %v3612_v56 = vld [vmem:[#allocation11 + $0x38] sm:$0xff]  }
 0x273   : > { %v1209_v57 = vpop.f32.mrf.mxu1  ;;  %v1322_v44 = vpop.f32.mrf.mxu0  ;;  %v1208_v5 = vadd.f32 %v1207_v40, %v4239_v53  ;;  %v1321_v6 = vadd.f32 %v1320_v41, %v4241_v54  ;;  %3101 = vmatpush3.bf16.msra.mxu1 %v3609_v55  ;;  %3184 = vmatprep.subr.bf16.mxu0 %v3612_v56 }
 0x274   : > { %v1425_v58 = vpack.c.bf16 %v1384_v47, %v1380_v42  ;;  %v1427_v59 = vpack.c.bf16 %v1386_v48, %v1382_v43  ;;  %v1210_v62 = vadd.f32 %v1209_v57, %v4234_v51  ;;  %v1323_v2 = vadd.f32 %v1322_v44, %v4236_v52  ;;  %v3613_v57 = vld [vmem:[#allocation11 + $0x30] sm:$0xff]   ;;  %3185 = vmatpush3.bf16.msra.mxu0 %v3612_v56  ;;  %v3614_v44 = vld [vmem:[#allocation11 + $0x28] sm:$0xff]  }
 0x275   : > { %v1211_v63 = vpop.f32.mrf.mxu1  ;;  %v1324_v1 = vpop.f32.mrf.mxu0  ;;  %v1387_v19 = vmax.f32 %v1208_v5, 0.0  ;;  %v1389_v20 = vmax.f32 %v1321_v6, 0.0  ;;  %3186 = vmatprep.subr.bf16.mxu0 %v3613_v57 }
 0x276   : > { %v1212_v3 = vadd.f32 %v1211_v63, %v4239_v53  ;;  %v1325_v4 = vadd.f32 %v1324_v1, %v4241_v54  ;;  %1913 = vmatprep.mubr.bf16.mxu1 %v1425_v58  ;;  %2026 = vmatprep.mubr.bf16.mxu0 %v1427_v59  ;;  %v1388_v15 = vmax.f32 %v1210_v62, 0.0  ;;  %v1390_v16 = vmax.f32 %v1323_v2, 0.0  ;;  %v1403_v58 = vld [vmem:[%s4464_s7 + $0x6] sm:$0x3] }
 0x277   : > { %v1213_v7 = vpop.f32.mrf.mxu1  ;;  %v1326_v8 = vpop.f32.mrf.mxu0  ;;  %1914 = vmatmul.mubr.bf16.gmra.mxu1 %v1424_v60  ;;  %2027 = vmatmul.mubr.bf16.gmra.mxu0 %v1426_v61  ;;  %v4311_v59 = vrot.slane %v1403_v58, %v4182_v45  ;;  %v4314_v60 = vrot.slane %v1403_v58, %v4185_v46 }
 0x278   : > { %v1214_v9 = vadd.f32 %v1213_v7, %v4234_v51  ;;  %v1327_v10 = vadd.f32 %v1326_v8, %v4236_v52  ;;  %v1391_v11 = vmax.f32 %v1212_v3, 0.0  ;;  %v1393_v12 = vmax.f32 %v1325_v4, 0.0  ;;  %3187 = vmatpush3.bf16.msra.mxu0 %v3613_v57 }
 0x279   : > { %v1217_v13 = vpop.f32.mrf.mxu1  ;;  %v1330_v14 = vpop.f32.mrf.mxu0  ;;  %3188 = vmatprep.subr.bf16.mxu0 %v3614_v44 }
 0x27a   : > { %v1392_v17 = vmax.f32 %v1214_v9, 0.0  ;;  %v1394_v18 = vmax.f32 %v1327_v10, 0.0  ;;  %v1428_v25 = vpack.c.bf16 %v1391_v11, %v1387_v19  ;;  %v1430_v26 = vpack.c.bf16 %v1393_v12, %v1389_v20 }
 0x27b   : > { %v1219_v21 = vpop.f32.mrf.mxu1  ;;  %v1332_v22 = vpop.f32.mrf.mxu0  ;;  %v1218_v50 = vadd.f32 %v1217_v13, %v4239_v53  ;;  %v1331_v33 = vadd.f32 %v1330_v14, %v4241_v54 }
 0x27c   : > { %v1429_v23 = vpack.c.bf16 %v1392_v17, %v1388_v15  ;;  %v1431_v24 = vpack.c.bf16 %v1394_v18, %v1390_v16  ;;  %v1220_v27 = vadd.f32 %v1219_v21, %v4234_v51  ;;  %v1333_v30 = vadd.f32 %v1332_v22, %v4236_v52  ;;  %3189 = vmatpush3.bf16.msra.mxu0 %v3614_v44 }
 0x27d   : > { %v1221_v28 = vpop.f32.mrf.mxu1  ;;  %v1334_v29 = vpop.f32.mrf.mxu0  ;;  %v1395_v42 = vmax.f32 %v1218_v50, 0.0  ;;  %v1397_v43 = vmax.f32 %v1331_v33, 0.0 }
 0x27e   : > { %v1222_v31 = vadd.f32 %v1221_v28, %v4239_v53  ;;  %v1335_v32 = vadd.f32 %v1334_v29, %v4241_v54  ;;  %1923 = vmatprep.mubr.bf16.mxu1 %v1429_v23  ;;  %2036 = vmatprep.mubr.bf16.mxu0 %v1431_v24  ;;  %v1396_v38 = vmax.f32 %v1220_v27, 0.0  ;;  %v1398_v39 = vmax.f32 %v1333_v30, 0.0 }
 0x27f   : > { %v1223_v49 = vpop.f32.mrf.mxu1  ;;  %v1336_v34 = vpop.f32.mrf.mxu0  ;;  %1924 = vmatmul.mubr.bf16.gmra.mxu1 %v1428_v25  ;;  %2037 = vmatmul.mubr.bf16.gmra.mxu0 %v1430_v26 }
 0x280   : > { %v1224_v35 = vadd.f32 %v1223_v49, %v4234_v51  ;;  %v1337_v36 = vadd.f32 %v1336_v34, %v4236_v52  ;;  %v1399_v37 = vmax.f32 %v1222_v31, 0.0  ;;  %v1401_v0 = vmax.f32 %v1335_v32, 0.0  ;;  %v3610_v51 = vld [vmem:[#allocation10 + $0x40] sm:$0xff]  }
 0x281   : > { %v3611_v52 = vld [vmem:[#allocation10] sm:$0xff]   ;;  %3102 = vmatprep.subr.bf16.mxu1 %v3610_v51 }
 0x282   : > { %v1400_v40 = vmax.f32 %v1224_v35, 0.0  ;;  %v1402_v41 = vmax.f32 %v1337_v36, 0.0  ;;  %v1432_v48 = vpack.c.bf16 %v1399_v37, %v1395_v42  ;;  %v1434_v54 = vpack.c.bf16 %v1401_v0, %v1397_v43  ;;  %3103 = vmatpush3.bf16.msra.mxu1 %v3611_v52 }
 0x284   : > { %v1433_v47 = vpack.c.bf16 %v1400_v40, %v1396_v38  ;;  %v1435_v53 = vpack.c.bf16 %v1402_v41, %v1398_v39 }
 0x286   : > { %1933 = vmatprep.mubr.bf16.mxu1 %v1433_v47  ;;  %2046 = vmatprep.mubr.bf16.mxu0 %v1435_v53 }
 0x287   : > { %1934 = vmatmul.mubr.bf16.gmra.mxu1 %v1432_v48  ;;  %2047 = vmatmul.mubr.bf16.gmra.mxu0 %v1434_v54 }
 0x30f   : > { %v1865_v61 = vpop.f32.mrf.mxu1  ;;  %v1978_v62 = vpop.f32.mrf.mxu0 }
 0x310   : > { %v1866_v3 = vadd.f32 %v1865_v61, %v4314_v60 }
 0x311   : > { %v1867_v63 = vpop.f32.mrf.mxu1  ;;  %v1980_v1 = vpop.f32.mrf.mxu0 }
 0x312   : > { %v1868_v2 = vadd.f32 %v1867_v63, %v4311_v59  ;;  %v1979_v46 = vadd.f32 %v1978_v62, %v1866_v3 }
 0x313   : > { %v1869_v4 = vpop.f32.mrf.mxu1  ;;  %v1982_v5 = vpop.f32.mrf.mxu0 }
 0x314   : > { %v1870_v6 = vadd.f32 %v1869_v4, %v4314_v60  ;;  %v1981_v9 = vadd.f32 %v1980_v1, %v1868_v2  ;;  %v2057_v20 = vmax.f32 %v1979_v46, 0.0 }
 0x315   : > { %v1871_v7 = vpop.f32.mrf.mxu1  ;;  %v1984_v8 = vpop.f32.mrf.mxu0 }
 0x316   : > { %v1983_v45 = vadd.f32 %v1982_v5, %v1870_v6  ;;  %v1872_v10 = vadd.f32 %v1871_v7, %v4311_v59  ;;  %v2058_v17 = vmax.f32 %v1981_v9, 0.0 }
 0x317   : > { %v1875_v11 = vpop.f32.mrf.mxu1  ;;  %v1988_v12 = vpop.f32.mrf.mxu0 }
 0x318   : > { %v1985_v13 = vadd.f32 %v1984_v8, %v1872_v10  ;;  %v2059_v14 = vmax.f32 %v1983_v45, 0.0  ;;  %v1876_v21 = vadd.f32 %v1875_v11, %v4314_v60 }
 0x319   : > { %v1877_v15 = vpop.f32.mrf.mxu1  ;;  %v1990_v16 = vpop.f32.mrf.mxu0 }
 0x31a   : > { %v2060_v18 = vmax.f32 %v1985_v13, 0.0  ;;  %v1878_v19 = vadd.f32 %v1877_v15, %v4311_v59  ;;  %v2090_v26 = vpack.c.bf16 %v2059_v14, %v2057_v20  ;;  %v1989_v32 = vadd.f32 %v1988_v12, %v1876_v21 }
 0x31b   : > { %v1879_v22 = vpop.f32.mrf.mxu1  ;;  %v1992_v23 = vpop.f32.mrf.mxu0 }
 0x31c   : > { %v2091_v24 = vpack.c.bf16 %v2060_v18, %v2058_v17  ;;  %v1880_v25 = vadd.f32 %v1879_v22, %v4314_v60  ;;  %v1991_v29 = vadd.f32 %v1990_v16, %v1878_v19  ;;  %v2061_v39 = vmax.f32 %v1989_v32, 0.0 }
 0x31d   : > { %v1881_v27 = vpop.f32.mrf.mxu1  ;;  %v1994_v28 = vpop.f32.mrf.mxu0 }
 0x31e   : > { %v1993_v30 = vadd.f32 %v1992_v23, %v1880_v25  ;;  %v1882_v31 = vadd.f32 %v1881_v27, %v4311_v59  ;;  %2272 = vmatprep.mubr.bf16.mxu1 %v2091_v24  ;;  %v2062_v37 = vmax.f32 %v1991_v29, 0.0 }
 0x31f   : > { %v1885_v50 = vpop.f32.mrf.mxu1  ;;  %v1998_v33 = vpop.f32.mrf.mxu0  ;;  %2273 = vmatmul.mubr.bf16.vlgmr.msra.gmra.mxu1 %v2090_v26 }
 0x320   : > { %v1995_v49 = vadd.f32 %v1994_v28, %v1882_v31  ;;  %v2063_v34 = vmax.f32 %v1993_v30, 0.0  ;;  %v1886_v40 = vadd.f32 %v1885_v50, %v4314_v60 }
 0x321   : > { %v1887_v35 = vpop.f32.mrf.mxu1  ;;  %v2000_v36 = vpop.f32.mrf.mxu0 }
 0x322   : > { %v2064_v0 = vmax.f32 %v1995_v49, 0.0  ;;  %v1888_v38 = vadd.f32 %v1887_v35, %v4311_v59  ;;  %v2092_v53 = vpack.c.bf16 %v2063_v34, %v2061_v39  ;;  %v1999_v56 = vadd.f32 %v1998_v33, %v1886_v40 }
 0x323   : > { %v1889_v41 = vpop.f32.mrf.mxu1  ;;  %v2002_v42 = vpop.f32.mrf.mxu0 }
 0x324   : > { %v2093_v43 = vpack.c.bf16 %v2064_v0, %v2062_v37  ;;  %v1890_v47 = vadd.f32 %v1889_v41, %v4314_v60  ;;  %v2001_v55 = vadd.f32 %v2000_v36, %v1888_v38  ;;  %v2065_v4 = vmax.f32 %v1999_v56, 0.0 }
 0x325   : > { %v1891_v48 = vpop.f32.mrf.mxu1  ;;  %v2004_v54 = vpop.f32.mrf.mxu0 }
 0x326   : > { %v2003_v51 = vadd.f32 %v2002_v42, %v1890_v47  ;;  %v1892_v52 = vadd.f32 %v1891_v48, %v4311_v59  ;;  %2280 = vmatprep.mubr.bf16.mxu1 %v2093_v43  ;;  %v2066_v1 = vmax.f32 %v2001_v55, 0.0 }
 0x327   : > { %v1895_v57 = vpop.f32.mrf.mxu1  ;;  %v2008_v44 = vpop.f32.mrf.mxu0  ;;  %2281 = vmatmul.mubr.bf16.gmra.mxu1 %v2092_v53 }
 0x328   : > { %v2005_v58 = vadd.f32 %v2004_v54, %v1892_v52  ;;  %v2067_v61 = vmax.f32 %v2003_v51, 0.0  ;;  %v1896_v5 = vadd.f32 %v1895_v57, %v4314_v60 }
 0x329   : > { %v1897_v62 = vpop.f32.mrf.mxu1  ;;  %v2010_v63 = vpop.f32.mrf.mxu0 }
 0x32a   : > { %v2068_v2 = vmax.f32 %v2005_v58, 0.0  ;;  %v1898_v3 = vadd.f32 %v1897_v62, %v4311_v59  ;;  %v2094_v45 = vpack.c.bf16 %v2067_v61, %v2065_v4  ;;  %v2009_v14 = vadd.f32 %v2008_v44, %v1896_v5 }
 0x32b   : > { %v1899_v6 = vpop.f32.mrf.mxu1  ;;  %v2012_v7 = vpop.f32.mrf.mxu0 }
 0x32c   : > { %v2095_v8 = vpack.c.bf16 %v2068_v2, %v2066_v1  ;;  %v1900_v9 = vadd.f32 %v1899_v6, %v4314_v60  ;;  %v2011_v11 = vadd.f32 %v2010_v63, %v1898_v3  ;;  %v2069_v24 = vmax.f32 %v2009_v14, 0.0 }
 0x32d   : > { %v1901_v10 = vpop.f32.mrf.mxu1  ;;  %v2014_v46 = vpop.f32.mrf.mxu0 }
 0x32e   : > { %v2013_v12 = vadd.f32 %v2012_v7, %v1900_v9  ;;  %v1902_v13 = vadd.f32 %v1901_v10, %v4311_v59  ;;  %2288 = vmatprep.mubr.bf16.mxu1 %v2095_v8  ;;  %v2070_v21 = vmax.f32 %v2011_v11, 0.0 }
 0x32f   : > { %v1905_v15 = vpop.f32.mrf.mxu1  ;;  %v2018_v16 = vpop.f32.mrf.mxu0  ;;  %2289 = vmatmul.mubr.bf16.gmra.mxu1 %v2094_v45 }
 0x330   : > { %v2015_v17 = vadd.f32 %v2014_v46, %v1902_v13  ;;  %v2071_v18 = vmax.f32 %v2013_v12, 0.0  ;;  %v1906_v25 = vadd.f32 %v1905_v15, %v4314_v60 }
 0x331   : > { %v1907_v19 = vpop.f32.mrf.mxu1  ;;  %v2020_v20 = vpop.f32.mrf.mxu0 }
 0x332   : > { %v2072_v22 = vmax.f32 %v2015_v17, 0.0  ;;  %v1908_v23 = vadd.f32 %v1907_v19, %v4311_v59  ;;  %v2096_v30 = vpack.c.bf16 %v2071_v18, %v2069_v24  ;;  %v2019_v34 = vadd.f32 %v2018_v16, %v1906_v25 }
 0x333   : > { %v1909_v26 = vpop.f32.mrf.mxu1  ;;  %v2022_v27 = vpop.f32.mrf.mxu0 }
 0x334   : > { %v2097_v28 = vpack.c.bf16 %v2072_v22, %v2070_v21  ;;  %v1910_v29 = vadd.f32 %v1909_v26, %v4314_v60  ;;  %v2021_v50 = vadd.f32 %v2020_v20, %v1908_v23  ;;  %v2073_v43 = vmax.f32 %v2019_v34, 0.0 }
 0x335   : > { %v1911_v31 = vpop.f32.mrf.mxu1  ;;  %v2024_v32 = vpop.f32.mrf.mxu0 }
 0x336   : > { %v2023_v33 = vadd.f32 %v2022_v27, %v1910_v29  ;;  %v1912_v49 = vadd.f32 %v1911_v31, %v4311_v59  ;;  %2296 = vmatprep.mubr.bf16.mxu1 %v2097_v28  ;;  %v2074_v40 = vmax.f32 %v2021_v50, 0.0 }
 0x337   : > { %v1915_v35 = vpop.f32.mrf.mxu1  ;;  %v2028_v36 = vpop.f32.mrf.mxu0  ;;  %2297 = vmatmul.mubr.bf16.gmra.mxu1 %v2096_v30 }
 0x338   : > { %v2025_v37 = vadd.f32 %v2024_v32, %v1912_v49  ;;  %v2075_v0 = vmax.f32 %v2023_v33, 0.0  ;;  %v1916_v47 = vadd.f32 %v1915_v35, %v4314_v60 }
 0x339   : > { %v1917_v38 = vpop.f32.mrf.mxu1  ;;  %v2030_v39 = vpop.f32.mrf.mxu0 }
 0x33a   : > { %v2076_v41 = vmax.f32 %v2025_v37, 0.0  ;;  %v1918_v42 = vadd.f32 %v1917_v38, %v4311_v59  ;;  %v2098_v51 = vpack.c.bf16 %v2075_v0, %v2073_v43  ;;  %v2029_v61 = vadd.f32 %v2028_v36, %v1916_v47 }
 0x33b   : > { %v1919_v53 = vpop.f32.mrf.mxu1  ;;  %v2032_v48 = vpop.f32.mrf.mxu0 }
 0x33c   : > { %v2099_v54 = vpack.c.bf16 %v2076_v41, %v2074_v40  ;;  %v1920_v55 = vadd.f32 %v1919_v53, %v4314_v60  ;;  %v2031_v57 = vadd.f32 %v2030_v39, %v1918_v42  ;;  %v2077_v8 = vmax.f32 %v2029_v61, 0.0  ;;  %v3616_v53 = vld [vmem:[#allocation11 + $0x18] sm:$0xff]  }
 0x33d   : > { %v1921_v52 = vpop.f32.mrf.mxu1  ;;  %v2034_v56 = vpop.f32.mrf.mxu0 }
 0x33e   : > { %v2033_v44 = vadd.f32 %v2032_v48, %v1920_v55  ;;  %v1922_v58 = vadd.f32 %v1921_v52, %v4311_v59  ;;  %2304 = vmatprep.mubr.bf16.mxu1 %v2099_v54  ;;  %v2078_v5 = vmax.f32 %v2031_v57, 0.0  ;;  %v3618_v48 = vld [vmem:[#allocation11 + $0x8] sm:$0xff]   ;;  %v3619_v54 = vld [vmem:[#allocation11] sm:$0xff]   ;;  %v3620_v55 = vld [vmem:[#allocation13 + $0x38] sm:$0xff]  }
 0x33f   : > { %v1925_v62 = vpop.f32.mrf.mxu1  ;;  %v2038_v63 = vpop.f32.mrf.mxu0  ;;  %2305 = vmatmul.mubr.bf16.gmra.mxu1 %v2098_v51  ;;  %v3621_v51 = vld [vmem:[#allocation13 + $0x30] sm:$0xff]   ;;  %3248 = vmatprep.subr.bf16.mxu1 %v3620_v55  ;;  %v3622_v52 = vld [vmem:[#allocation13 + $0x28] sm:$0xff]   ;;  %v4351_v57 = vld [vmem:[#allocation13 + $0x18] sm:$0xff]  }
 0x340   : > { %v2035_v1 = vadd.f32 %v2034_v56, %v1922_v58  ;;  %v2079_v2 = vmax.f32 %v2033_v44, 0.0  ;;  %v1926_v9 = vadd.f32 %v1925_v62, %v4314_v60  ;;  %3256 = vmatpush3.bf16.msra.mxu1 %v3620_v55  ;;  %v4348_v56 = vld [vmem:[#allocation13 + $0x20] sm:$0xff]   ;;  %v4359_v62 = vld [vmem:[%s4464_s7 + $0x8] ss:$0 sm:$0xff] }
 0x341   : > { %v1927_v3 = vpop.f32.mrf.mxu1  ;;  %v2040_v4 = vpop.f32.mrf.mxu0  ;;  %3249 = vmatprep.subr.bf16.mxu1 %v3621_v51 }
 0x342   : > { %v2080_v6 = vmax.f32 %v2035_v1, 0.0  ;;  %v1928_v7 = vadd.f32 %v1927_v3, %v4311_v59  ;;  %v2100_v12 = vpack.c.bf16 %v2079_v2, %v2077_v8  ;;  %v2039_v18 = vadd.f32 %v2038_v63, %v1926_v9 }
 0x343   : > { %v1929_v45 = vpop.f32.mrf.mxu1  ;;  %v2042_v10 = vpop.f32.mrf.mxu0 }
 0x344   : > { %v2101_v46 = vpack.c.bf16 %v2080_v6, %v2078_v5  ;;  %v1930_v11 = vadd.f32 %v1929_v45, %v4314_v60  ;;  %v2041_v15 = vadd.f32 %v2040_v4, %v1928_v7  ;;  %v2081_v28 = vmax.f32 %v2039_v18, 0.0  ;;  %3257 = vmatpush3.bf16.msra.mxu1 %v3621_v51 }
 0x345   : > { %v1931_v13 = vpop.f32.mrf.mxu1  ;;  %v2044_v14 = vpop.f32.mrf.mxu0  ;;  %3250 = vmatprep.subr.bf16.mxu1 %v3622_v52 }
 0x346   : > { %v2043_v16 = vadd.f32 %v2042_v10, %v1930_v11  ;;  %v1932_v17 = vadd.f32 %v1931_v13, %v4311_v59  ;;  %2312 = vmatprep.mubr.bf16.mxu1 %v2101_v46  ;;  %v2082_v25 = vmax.f32 %v2041_v15, 0.0 }
 0x347   : > { %v1935_v19 = vpop.f32.mrf.mxu1  ;;  %v2048_v20 = vpop.f32.mrf.mxu0  ;;  %2313 = vmatmul.mubr.bf16.gmra.mxu1 %v2100_v12 }
 0x348   : > { %v2045_v21 = vadd.f32 %v2044_v14, %v1932_v17  ;;  %v2083_v22 = vmax.f32 %v2043_v16, 0.0  ;;  %v1936_v29 = vadd.f32 %v1935_v19, %v4314_v60  ;;  %3258 = vmatpush3.bf16.msra.mxu1 %v3622_v52 }
 0x349   : > { %v1937_v23 = vpop.f32.mrf.mxu1  ;;  %v2050_v24 = vpop.f32.mrf.mxu0  ;;  %3251 = vmatprep.subr.bf16.mxu1 %v4348_v56 }
 0x34a   : > { %v2084_v26 = vmax.f32 %v2045_v21, 0.0  ;;  %v1938_v27 = vadd.f32 %v1937_v23, %v4311_v59  ;;  %v2102_v33 = vpack.c.bf16 %v2083_v22, %v2081_v28  ;;  %v2049_v37 = vadd.f32 %v2048_v20, %v1936_v29 }
 0x34b   : > { %v1939_v30 = vpop.f32.mrf.mxu1  ;;  %v2052_v31 = vpop.f32.mrf.mxu0 }
 0x34c   : > { %v2103_v32 = vpack.c.bf16 %v2084_v26, %v2082_v25  ;;  %v1940_v50 = vadd.f32 %v1939_v30, %v4314_v60  ;;  %v2051_v34 = vadd.f32 %v2050_v24, %v1938_v27  ;;  %v2085_v42 = vmax.f32 %v2049_v37, 0.0  ;;  %v3615_v60 = vld [vmem:[#allocation11 + $0x20] sm:$0xff]   ;;  %3259 = vmatpush3.bf16.msra.mxu1 %v4348_v56 }
 0x34d   : > { %v1941_v49 = vpop.f32.mrf.mxu1  ;;  %v2054_v0 = vpop.f32.mrf.mxu0  ;;  %3190 = vmatprep.subr.bf16.mxu0 %v3615_v60  ;;  %3252 = vmatprep.subr.bf16.mxu1 %v4351_v57 }
 0x34e   : > { %v2053_v35 = vadd.f32 %v2052_v31, %v1940_v50  ;;  %v1942_v36 = vadd.f32 %v1941_v49, %v4311_v59  ;;  %2320 = vmatprep.mubr.bf16.mxu1 %v2103_v32  ;;  %v2086_v40 = vmax.f32 %v2051_v34, 0.0  ;;  %3191 = vmatpush3.bf16.msra.mxu0 %v3615_v60  ;;  %v3617_v59 = vld [vmem:[#allocation11 + $0x10] sm:$0xff]  }
 0x34f   : > { %2321 = vmatmul.mubr.bf16.gmra.mxu1 %v2102_v33  ;;  %3192 = vmatprep.subr.bf16.mxu0 %v3616_v53 }
 0x350   : > { %v2055_v38 = vadd.f32 %v2054_v0, %v1942_v36  ;;  %v2087_v39 = vmax.f32 %v2053_v35, 0.0  ;;  %3260 = vmatpush3.bf16.msra.mxu1 %v4351_v57 }
 0x352   : > { %v2088_v41 = vmax.f32 %v2055_v38, 0.0  ;;  %v2104_v47 = vpack.c.bf16 %v2087_v39, %v2085_v42  ;;  %3193 = vmatpush3.bf16.msra.mxu0 %v3616_v53 }
 0x353   : > { %3194 = vmatprep.subr.bf16.mxu0 %v3617_v59 }
 0x354   : > { %v2105_v43 = vpack.c.bf16 %v2088_v41, %v2086_v40 }
 0x356   : > { %2328 = vmatprep.mubr.bf16.mxu1 %v2105_v43  ;;  %3195 = vmatpush3.bf16.msra.mxu0 %v3617_v59 }
 0x357   : > { %2329 = vmatmul.mubr.bf16.gmra.mxu1 %v2104_v47  ;;  %3196 = vmatprep.subr.bf16.mxu0 %v3618_v48 }
 0x35a   : > { %3197 = vmatpush3.bf16.msra.mxu0 %v3618_v48 }
 0x35b   : > { %3198 = vmatprep.subr.bf16.mxu0 %v3619_v54 }
 0x35e   : > { %3199 = vmatpush3.bf16.msra.mxu0 %v3619_v54 }
 0x35f   : > { %3216 = vmatprep.subr.bf16.mxu0 %v3620_v55 }
 0x3df   : > { %v3104_v44 = vpop.f32.mrf.mxu1 }
 0x3e1   : > { %v3105_v58 = vpop.f32.mrf.mxu1 }
 0x3e2   : > { %v3106_v61 = vadd.f32 %v3105_v58, %v3104_v44 }
 0x3e3   : > { %v3107_v63 = vpop.f32.mrf.mxu1 }
 0x3e4   : > { %v2275_v2 = vadd.f32 %v3106_v61, %v4359_v62 }
 0x3e5   : > { %v3108_v1 = vpop.f32.mrf.mxu1 }
 0x3e6   : > { %v3109_v3 = vadd.f32 %v3108_v1, %v3107_v63  ;;  %v2337_v7 = vmax.f32 %v2275_v2, 0.0 }
 0x3e7   : > { %v3110_v4 = vpop.f32.mrf.mxu1 }
 0x3e8   : > { %v2278_v5 = vadd.f32 %v3109_v3, %v4359_v62 }
 0x3e9   : > { %v3111_v6 = vpop.f32.mrf.mxu1 }
 0x3ea   : > { %v2338_v8 = vmax.f32 %v2278_v5, 0.0  ;;  %v3112_v9 = vadd.f32 %v3111_v6, %v3110_v4 }
 0x3eb   : > { %v3113_v45 = vpop.f32.mrf.mxu1 }
 0x3ec   : > { %v2354_v10 = vpack.c.bf16 %v2338_v8, %v2337_v7  ;;  %v2283_v11 = vadd.f32 %v3112_v9, %v4359_v62 }
 0x3ed   : > { %v3114_v46 = vpop.f32.mrf.mxu1 }
 0x3ee   : > { %v3115_v12 = vadd.f32 %v3114_v46, %v3113_v45  ;;  %3200 = vmatprep.mubr.bf16.mxu0 %v2354_v10  ;;  %v2339_v16 = vmax.f32 %v2283_v11, 0.0 }
 0x3ef   : > { %v3116_v13 = vpop.f32.mrf.mxu1 }
 0x3f0   : > { %v2286_v14 = vadd.f32 %v3115_v12, %v4359_v62 }
 0x3f1   : > { %v3117_v15 = vpop.f32.mrf.mxu1 }
 0x3f2   : > { %v2340_v17 = vmax.f32 %v2286_v14, 0.0  ;;  %v3118_v18 = vadd.f32 %v3117_v15, %v3116_v13 }
 0x3f3   : > { %v3119_v19 = vpop.f32.mrf.mxu1 }
 0x3f4   : > { %v2355_v20 = vpack.c.bf16 %v2340_v17, %v2339_v16  ;;  %v2291_v22 = vadd.f32 %v3118_v18, %v4359_v62 }
 0x3f5   : > { %v3120_v21 = vpop.f32.mrf.mxu1 }
 0x3f6   : > { %v3121_v23 = vadd.f32 %v3120_v21, %v3119_v19  ;;  %3201 = vmatmul.mubr.bf16.vlgmr.msra.gmra.mxu0 %v2355_v20  ;;  %v2341_v27 = vmax.f32 %v2291_v22, 0.0  ;;  %v3625_v20 = vld [vmem:[#allocation13 + $0x10] sm:$0xff]   ;;  %v3626_v21 = vld [vmem:[#allocation13 + $0x8] sm:$0xff]   ;;  %v3627_v22 = vld [vmem:[#allocation13] sm:$0xff]  }
 0x3f7   : > { %v3122_v24 = vpop.f32.mrf.mxu1  ;;  %3217 = vmatpush3.bf16.msra.mxu0 %v3620_v55  ;;  %3253 = vmatprep.subr.bf16.mxu1 %v3625_v20 }
 0x3f8   : > { %v2294_v25 = vadd.f32 %v3121_v23, %v4359_v62  ;;  %3218 = vmatprep.subr.bf16.mxu0 %v3621_v51  ;;  %3261 = vmatpush3.bf16.msra.mxu1 %v3625_v20 }
 0x3f9   : > { %v3123_v26 = vpop.f32.mrf.mxu1  ;;  %3254 = vmatprep.subr.bf16.mxu1 %v3626_v21 }
 0x3fa   : > { %v2342_v28 = vmax.f32 %v2294_v25, 0.0  ;;  %v3124_v29 = vadd.f32 %v3123_v26, %v3122_v24  ;;  %v3063_v24 = vld [vmem:[%s4464_s7 + $0x9] ss:$0 sm:$0xff] }
 0x3fb   : > { %v3125_v30 = vpop.f32.mrf.mxu1  ;;  %3219 = vmatpush3.bf16.msra.mxu0 %v3621_v51 }
 0x3fc   : > { %v2356_v31 = vpack.c.bf16 %v2342_v28, %v2341_v27  ;;  %3220 = vmatprep.subr.bf16.mxu0 %v3622_v52  ;;  %v2299_v50 = vadd.f32 %v3124_v29, %v4359_v62  ;;  %3262 = vmatpush3.bf16.msra.mxu1 %v3626_v21 }
 0x3fd   : > { %v3126_v32 = vpop.f32.mrf.mxu1  ;;  %3255 = vmatprep.subr.bf16.mxu1 %v3627_v22 }
 0x3fe   : > { %v3127_v33 = vadd.f32 %v3126_v32, %v3125_v30  ;;  %3204 = vmatprep.mubr.bf16.mxu0 %v2356_v31  ;;  %v2343_v36 = vmax.f32 %v2299_v50, 0.0 }
 0x3ff   : > { %v3128_v49 = vpop.f32.mrf.mxu1  ;;  %3221 = vmatpush3.bf16.msra.mxu0 %v3622_v52 }
 0x400   : > { %v2302_v34 = vadd.f32 %v3127_v33, %v4359_v62  ;;  %3222 = vmatprep.subr.bf16.mxu0 %v4348_v56  ;;  %3263 = vmatpush3.bf16.msra.mxu1 %v3627_v22 }
 0x401   : > { %v3129_v35 = vpop.f32.mrf.mxu1 }
 0x402   : > { %v2344_v37 = vmax.f32 %v2302_v34, 0.0  ;;  %v3130_v0 = vadd.f32 %v3129_v35, %v3128_v49 }
 0x403   : > { %v3131_v38 = vpop.f32.mrf.mxu1  ;;  %3223 = vmatpush3.bf16.msra.mxu0 %v4348_v56 }
 0x404   : > { %v2357_v39 = vpack.c.bf16 %v2344_v37, %v2343_v36  ;;  %3224 = vmatprep.subr.bf16.mxu0 %v4351_v57  ;;  %v2307_v41 = vadd.f32 %v3130_v0, %v4359_v62 }
 0x405   : > { %v3132_v40 = vpop.f32.mrf.mxu1 }
 0x406   : > { %v3133_v42 = vadd.f32 %v3132_v40, %v3131_v38  ;;  %3205 = vmatmul.mubr.bf16.gmra.mxu0 %v2357_v39  ;;  %v2345_v53 = vmax.f32 %v2307_v41, 0.0 }
 0x407   : > { %v3134_v43 = vpop.f32.mrf.mxu1  ;;  %3225 = vmatpush3.bf16.msra.mxu0 %v4351_v57 }
 0x408   : > { %v2310_v47 = vadd.f32 %v3133_v42, %v4359_v62  ;;  %3226 = vmatprep.subr.bf16.mxu0 %v3625_v20 }
 0x409   : > { %v3135_v60 = vpop.f32.mrf.mxu1 }
 0x40a   : > { %v2346_v59 = vmax.f32 %v2310_v47, 0.0  ;;  %v3136_v48 = vadd.f32 %v3135_v60, %v3134_v43 }
 0x40b   : > { %v3137_v54 = vpop.f32.mrf.mxu1  ;;  %3227 = vmatpush3.bf16.msra.mxu0 %v3625_v20 }
 0x40c   : > { %v2358_v55 = vpack.c.bf16 %v2346_v59, %v2345_v53  ;;  %v2315_v52 = vadd.f32 %v3136_v48, %v4359_v62  ;;  %3228 = vmatprep.subr.bf16.mxu0 %v3626_v21 }
 0x40d   : > { %v3138_v51 = vpop.f32.mrf.mxu1 }
 0x40e   : > { %v3139_v56 = vadd.f32 %v3138_v51, %v3137_v54  ;;  %3208 = vmatprep.mubr.bf16.mxu0 %v2358_v55  ;;  %v2347_v63 = vmax.f32 %v2315_v52, 0.0 }
 0x40f   : > { %v3140_v44 = vpop.f32.mrf.mxu1  ;;  %3229 = vmatpush3.bf16.msra.mxu0 %v3626_v21 }
 0x410   : > { %v2318_v58 = vadd.f32 %v3139_v56, %v4359_v62  ;;  %3230 = vmatprep.subr.bf16.mxu0 %v3627_v22 }
 0x411   : > { %v3141_v61 = vpop.f32.mrf.mxu1 }
 0x412   : > { %v2348_v1 = vmax.f32 %v2318_v58, 0.0  ;;  %v3142_v57 = vadd.f32 %v3141_v61, %v3140_v44 }
 0x413   : > { %v3143_v2 = vpop.f32.mrf.mxu1  ;;  %3231 = vmatpush3.bf16.msra.mxu0 %v3627_v22 }
 0x414   : > { %v2359_v3 = vpack.c.bf16 %v2348_v1, %v2347_v63  ;;  %v2323_v5 = vadd.f32 %v3142_v57, %v4359_v62 }
 0x415   : > { %v3144_v4 = vpop.f32.mrf.mxu1 }
 0x416   : > { %v3145_v6 = vadd.f32 %v3144_v4, %v3143_v2  ;;  %3209 = vmatmul.mubr.bf16.gmra.mxu0 %v2359_v3  ;;  %v2349_v45 = vmax.f32 %v2323_v5, 0.0 }
 0x417   : > { %v3146_v7 = vpop.f32.mrf.mxu1 }
 0x418   : > { %v2326_v8 = vadd.f32 %v3145_v6, %v4359_v62 }
 0x419   : > { %v3147_v9 = vpop.f32.mrf.mxu1 }
 0x41a   : > { %v2350_v10 = vmax.f32 %v2326_v8, 0.0  ;;  %v3148_v46 = vadd.f32 %v3147_v9, %v3146_v7 }
 0x41b   : > { %v3149_v11 = vpop.f32.mrf.mxu1 }
 0x41c   : > { %v2360_v12 = vpack.c.bf16 %v2350_v10, %v2349_v45  ;;  %v2331_v14 = vadd.f32 %v3148_v46, %v4359_v62 }
 0x41d   : > { %v3150_v13 = vpop.f32.mrf.mxu1 }
 0x41e   : > { %v3151_v15 = vadd.f32 %v3150_v13, %v3149_v11  ;;  %3212 = vmatprep.mubr.bf16.mxu0 %v2360_v12  ;;  %v2351_v17 = vmax.f32 %v2331_v14, 0.0 }
 0x420   : > { %v2334_v16 = vadd.f32 %v3151_v15, %v4359_v62 }
 0x422   : > { %v2352_v18 = vmax.f32 %v2334_v16, 0.0  ;;  %v3072_v16 = vld [vmem:[%s4464_s7 + $0xa] ss:$0 sm:$0xff] }
 0x424   : > { %v2361_v19 = vpack.c.bf16 %v2352_v18, %v2351_v17 }
 0x426   : > { %3213 = vmatmul.mubr.bf16.gmra.mxu0 %v2361_v19 }
 0x4b6   : > { %v3202_v62 = vpop.f32.mrf.mxu0 }
 0x4b7   : > { %v2475_v28 = vadd.f32 %v3202_v62, %v3063_v24 }
 0x4b8   : > { %v2466_v23 = vpop.f32.mrf.mxu0 }
 0x4b9   : > { %v2467_v26 = vadd.f32 %v3063_v24, %v2466_v23  ;;  %v2531_v33 = vmax.f32 %v2475_v28, 0.0 }
 0x4ba   : > { %v3203_v25 = vpop.f32.mrf.mxu0 }
 0x4bb   : > { %v2478_v27 = vadd.f32 %v3203_v25, %v3063_v24  ;;  %v2529_v32 = vmax.f32 %v2467_v26, 0.0 }
 0x4bc   : > { %v2469_v29 = vpop.f32.mrf.mxu0 }
 0x4bd   : > { %v2470_v30 = vadd.f32 %v3063_v24, %v2469_v29  ;;  %v2532_v31 = vmax.f32 %v2478_v27, 0.0 }
 0x4bf   : > { %v2530_v50 = vmax.f32 %v2470_v30, 0.0  ;;  %v2547_v34 = vpack.c.bf16 %v2532_v31, %v2531_v33 }
 0x4c1   : > { %v2546_v49 = vpack.c.bf16 %v2530_v50, %v2529_v32 }
 0x4c3   : > { %3232 = vmatprep.mubr.bf16.mxu0 %v2546_v49 }
 0x4c4   : > { %3233 = vmatmul.mubr.bf16.vlgmr.msra.gmra.mxu0 %v2547_v34 }
 0x4c6   : > { %v3206_v35 = vpop.f32.mrf.mxu0 }
 0x4c7   : > { %v2491_v39 = vadd.f32 %v3206_v35, %v3063_v24 }
 0x4c8   : > { %v2482_v36 = vpop.f32.mrf.mxu0 }
 0x4c9   : > { %v2483_v0 = vadd.f32 %v3063_v24, %v2482_v36  ;;  %v2535_v60 = vmax.f32 %v2491_v39, 0.0 }
 0x4ca   : > { %v3207_v37 = vpop.f32.mrf.mxu0 }
 0x4cb   : > { %v2494_v38 = vadd.f32 %v3207_v37, %v3063_v24  ;;  %v2533_v43 = vmax.f32 %v2483_v0, 0.0 }
 0x4cc   : > { %v2485_v40 = vpop.f32.mrf.mxu0 }
 0x4cd   : > { %v2486_v41 = vadd.f32 %v3063_v24, %v2485_v40  ;;  %v2536_v42 = vmax.f32 %v2494_v38, 0.0 }
 0x4cf   : > { %v2534_v47 = vmax.f32 %v2486_v41, 0.0  ;;  %v2549_v59 = vpack.c.bf16 %v2536_v42, %v2535_v60 }
 0x4d1   : > { %v2548_v53 = vpack.c.bf16 %v2534_v47, %v2533_v43 }
 0x4d3   : > { %3236 = vmatprep.mubr.bf16.mxu0 %v2548_v53 }
 0x4d4   : > { %3237 = vmatmul.mubr.bf16.gmra.mxu0 %v2549_v59 }
 0x4d6   : > { %v3210_v48 = vpop.f32.mrf.mxu0 }
 0x4d7   : > { %v2507_v56 = vadd.f32 %v3210_v48, %v3063_v24 }
 0x4d8   : > { %v2498_v54 = vpop.f32.mrf.mxu0 }
 0x4d9   : > { %v2499_v51 = vadd.f32 %v3063_v24, %v2498_v54  ;;  %v2539_v57 = vmax.f32 %v2507_v56, 0.0 }
 0x4da   : > { %v3211_v55 = vpop.f32.mrf.mxu0 }
 0x4db   : > { %v2510_v52 = vadd.f32 %v3211_v55, %v3063_v24  ;;  %v2537_v63 = vmax.f32 %v2499_v51, 0.0 }
 0x4dc   : > { %v2501_v44 = vpop.f32.mrf.mxu0 }
 0x4dd   : > { %v2502_v58 = vadd.f32 %v3063_v24, %v2501_v44  ;;  %v2540_v61 = vmax.f32 %v2510_v52, 0.0 }
 0x4df   : > { %v2538_v1 = vmax.f32 %v2502_v58, 0.0  ;;  %v2551_v3 = vpack.c.bf16 %v2540_v61, %v2539_v57 }
 0x4e1   : > { %v2550_v2 = vpack.c.bf16 %v2538_v1, %v2537_v63 }
 0x4e3   : > { %3240 = vmatprep.mubr.bf16.mxu1 %v2550_v2 }
 0x4e4   : > { %3241 = vmatmul.mubr.bf16.vlgmr.msra.gmra.mxu1 %v2551_v3 }
 0x4e6   : > { %v3214_v4 = vpop.f32.mrf.mxu0 }
 0x4e7   : > { %v2523_v9 = vadd.f32 %v3214_v4, %v3063_v24 }
 0x4e8   : > { %v2514_v5 = vpop.f32.mrf.mxu0 }
 0x4e9   : > { %v2515_v7 = vadd.f32 %v3063_v24, %v2514_v5  ;;  %v2543_v13 = vmax.f32 %v2523_v9, 0.0 }
 0x4ea   : > { %v3215_v6 = vpop.f32.mrf.mxu0 }
 0x4eb   : > { %v2526_v8 = vadd.f32 %v3215_v6, %v3063_v24  ;;  %v2541_v11 = vmax.f32 %v2515_v7, 0.0 }
 0x4ec   : > { %v2517_v45 = vpop.f32.mrf.mxu0 }
 0x4ed   : > { %v2518_v10 = vadd.f32 %v3063_v24, %v2517_v45  ;;  %v2544_v46 = vmax.f32 %v2526_v8, 0.0 }
 0x4ef   : > { %v2542_v12 = vmax.f32 %v2518_v10, 0.0  ;;  %v2553_v15 = vpack.c.bf16 %v2544_v46, %v2543_v13 }
 0x4f1   : > { %v2552_v14 = vpack.c.bf16 %v2542_v12, %v2541_v11 }
 0x4f3   : > { %3244 = vmatprep.mubr.bf16.mxu1 %v2552_v14 }
 0x4f4   : > { %3245 = vmatmul.mubr.bf16.gmra.mxu1 %v2553_v15 }
 0x584   : > { %v3234_v17 = vpop.f32.mrf.mxu0 }
 0x585   : > { %v2667_v18 = vadd.f32 %v3234_v17, %v3072_v16 }
 0x586   : > { %v2658_v19 = vpop.f32.mrf.mxu0 }
 0x587   : > { %2723 = vst [vmem:[%s4389_s17 + $0x10] sm:$0xff] %v2667_v18  ;;  %v2659_v20 = vadd.f32 %v3072_v16, %v2658_v19 }
 0x588   : > { %v3235_v21 = vpop.f32.mrf.mxu0 }
 0x589   : > { %2721 = vst [vmem:[%s4389_s17] sm:$0xff] %v2659_v20  ;;  %v2670_v22 = vadd.f32 %v3235_v21, %v3072_v16 }
 0x58a   : > { %v2661_v62 = vpop.f32.mrf.mxu0 }
 0x58b   : > { %2724 = vst [vmem:[%s4389_s17 + $0x18] sm:$0xff] %v2670_v22  ;;  %v2662_v23 = vadd.f32 %v3072_v16, %v2661_v62 }
 0x58d   : > { %2722 = vst [vmem:[%s4389_s17 + $0x8] sm:$0xff] %v2662_v23 }
 0x594   : > { %v3238_v24 = vpop.f32.mrf.mxu0 }
 0x595   : > { %v2683_v25 = vadd.f32 %v3238_v24, %v3072_v16 }
 0x596   : > { %v2674_v26 = vpop.f32.mrf.mxu0 }
 0x597   : > { %2727 = vst [vmem:[%s4389_s17 + $0x30] sm:$0xff] %v2683_v25  ;;  %v2675_v27 = vadd.f32 %v3072_v16, %v2674_v26 }
 0x598   : > { %v3239_v28 = vpop.f32.mrf.mxu0 }
 0x599   : > { %2725 = vst [vmem:[%s4389_s17 + $0x20] sm:$0xff] %v2675_v27  ;;  %v2686_v29 = vadd.f32 %v3239_v28, %v3072_v16 }
 0x59a   : > { %v2677_v30 = vpop.f32.mrf.mxu0 }
 0x59b   : > { %2728 = vst [vmem:[%s4389_s17 + $0x38] sm:$0xff] %v2686_v29  ;;  %v2678_v31 = vadd.f32 %v3072_v16, %v2677_v30 }
 0x59d   : > { %2726 = vst [vmem:[%s4389_s17 + $0x28] sm:$0xff] %v2678_v31 }
 0x5a4   : > { %v3242_v32 = vpop.f32.mrf.mxu1 }
 0x5a5   : > { %v2699_v50 = vadd.f32 %v3242_v32, %v3072_v16 }
 0x5a6   : > { %v2690_v33 = vpop.f32.mrf.mxu1 }
 0x5a7   : > { %2731 = vst [vmem:[%s4389_s17 + $0x50] sm:$0xff] %v2699_v50  ;;  %v2691_v49 = vadd.f32 %v3072_v16, %v2690_v33 }
 0x5a8   : > { %v3243_v34 = vpop.f32.mrf.mxu1 }
 0x5a9   : > { %2729 = vst [vmem:[%s4389_s17 + $0x40] sm:$0xff] %v2691_v49  ;;  %v2702_v35 = vadd.f32 %v3243_v34, %v3072_v16 }
 0x5aa   : > { %v2693_v36 = vpop.f32.mrf.mxu1 }
 0x5ab   : > { %2732 = vst [vmem:[%s4389_s17 + $0x58] sm:$0xff] %v2702_v35  ;;  %v2694_v37 = vadd.f32 %v3072_v16, %v2693_v36 }
 0x5ad   : > { %2730 = vst [vmem:[%s4389_s17 + $0x48] sm:$0xff] %v2694_v37 }
 0x5b4   : > { %v3246_v0 = vpop.f32.mrf.mxu1 }
 0x5b5   : > { %v2715_v38 = vadd.f32 %v3246_v0, %v3072_v16 }
 0x5b6   : > { %v2706_v39 = vpop.f32.mrf.mxu1 }
 0x5b7   : > { %2735 = vst [vmem:[%s4389_s17 + $0x70] sm:$0xff] %v2715_v38  ;;  %v2707_v40 = vadd.f32 %v3072_v16, %v2706_v39 }
 0x5b8   : > { %v3247_v41 = vpop.f32.mrf.mxu1 }
 0x5b9   : > { %2733 = vst [vmem:[%s4389_s17 + $0x60] sm:$0xff] %v2707_v40  ;;  %v2718_v42 = vadd.f32 %v3247_v41, %v3072_v16 }
 0x5ba   : > { %v2709_v43 = vpop.f32.mrf.mxu1 }
 0x5bb   : > { %2736 = vst [vmem:[%s4389_s17 + $0x78] sm:$0xff] %v2718_v42  ;;  %v2710_v47 = vadd.f32 %v3072_v16, %v2709_v43 }
 0x5bd   : > { %2734 = vst [vmem:[%s4389_s17 + $0x68] sm:$0xff] %v2710_v47 }
 0x5be   : > { %3825 = shalt.err (!%p3822_p3)
}
 0x5bf   : > { %s3826_s23 = scalar_lea.hbm %s4410_s25, 2048  ;;  %s3830_s20 = scalar_lea.hbm %s4465_s8, 4096 }
 0x5c0   : > { %p3827_p6 = scmp.ne.s32.totalorder %s4410_s25, %s3826_s23  ;;  %p3831_p11 = scmp.lt.s32.totalorder %s4410_s25, %s4465_s8 }
 0x5c1   : > { %p3832_p7 = scmp.lt.s32.totalorder %s3830_s20, %s3826_s23 }
 0x5c2   : > { %p3828_p10 = pnand %p3827_p6, %p4494_p5 }
 0x5c3   : > { %p3833_p0 = por %p3832_p7, %p3831_p11 }
 0x5c4   : > { %p3829_p12 = pneg %p3828_p10 }
 0x5c6   : > { %p3834_p2 = pnand %p3833_p0, %p3829_p12 }
 0x5c8   : > { %3837 = shalt.err (!%p3834_p2)
}
 0x5c9   : > { %s3905_s21 = smov 128   ;;  %s3906_s10 = smov 8  }
 0x5ca   : > { %3290 = dma.vmem_to_hbm [thread:$0]  (%p4494_p5), %s4412_s12, 2048, %s4410_s25, %s2738_s26, %s3905_s21, %s3905_s21, %s3906_s10  }
 0x5cb PF: > { %s2766_s11 = sand.u32 1, %s3876_s27   ;;  %p4495_p9 = scmp.ne.s32.totalorder %s4482_s19, 0 }
 0x5cc   : > { %p4496_p8 = scmp.ge.s32.totalorder %s3888_s30, 2  ;;  %s2767_s15 = scalar_lea.sflag [#allocation4], %s2766_s11 }
 0x5ce   : > { %p3316_p4 = pnand %p4496_p8, %p4495_p9 }
 0x5d0   : > { %p3317_p13 = pneg %p3316_p4 }
 0x5d2   : > { %3871 = dma.done.wait (%p3317_p13), %s2767_s15, 2048  }
 0x5d3   : > { %3873 = vsyncadd (%p3317_p13), %s2767_s15, 4294965248  ;;  %p24_p1 = scmp.ge.s32.totalorder %s4056_s18, 4   ;;  %s4497_s27 = smov %s3880_s28 }
 0x5d4   : > { %s4498_s28 = smov %s3884_s29  ;;  %s4499_s29 = smov %s4067_s9 }
 0x5d5   : > { %s4500_s30 = smov %s4056_s18  ;;  %26 = sbr.rel (!%p24_p1) target bundleno = 11 (0xb), region = 121 }
 0x5da   :  { %2772 = vsyncpa [#allocation3], 1 }
 0x5db   :  { %2774 = vsyncpa [#allocation3 + $0x1], 1 }
 0x5dc   :  { %2775 = vsyncpa [#allocation6], 1 }
 0x5dd   :  { %2776 = vsyncpa [#allocation9], 1 }
 0x5de   :  { %2777 = vsyncpa [#allocation12], 1 }
 0x5df   :  { %2778 = vsyncpa [#allocation4], 1 }
 0x5e0   :  { %2780 = vsyncpa [#allocation4 + $0x1], 1 }

</bundles_post_ra>
